<compile_context>
chip_gen: v6e
topology: v6e:2x2x1
jax: 0.10.0
libtpu: 0.0.40
codegen_flags: <defaults>
</compile_context>

<pallas_src>
import functools
import math

import jax
import jax.numpy as jnp
from jax.experimental import pallas as pl
from jax.experimental.pallas import tpu as pltpu

# ----------------------------- synthetic config ------------------------------
B = 2              # batch
C_IN = 3           # image channels
IMG = 16           # image H = W
PATCH = 4          # CLIP patch size -> 16 patches
N_PATCH = (IMG // PATCH) ** 2
VISION_WIDTH = 32  # CLIP visual width (encoder_width of the Q-Former)
HIDDEN = 32        # BERT hidden_size (== vision_width, as in ViT-B + Q-Former)
HEADS = 4
DH = HIDDEN // HEADS
NUM_Q = 8          # cfg.num_query_tokens
LAYERS = 2         # cfg.num_hidden_layers
INTER = 64         # BERT intermediate size
PROJ_DIM = 16      # CLIP visual projection dim (text embedding dim)
N_CLASSES = 10     # number of label text features
RMCLS = True       # cfg.rmcls


# ------------------------------ Pallas kernels --------------------------------
def _clip_encode_kernel(p_ref, w_ref, pos_ref, cls_ref, g_ref, b_ref,
                        opatch_ref, ocls_ref, *, eps):
    """Fused CLIP patch embedding: im2col-matmul + positional emb + ln_pre.

    p_ref   : (B*N, C*P*P)  flattened patches
    w_ref   : (C*P*P, Vw)   patch-conv weight (CLIP conv has no bias)
    pos_ref : (B*N, Vw)     per-batch tiled patch positional embeddings
    cls_ref : (1, Vw)       class embedding + pos[0]
    """
    def ln(t):
        mu = jnp.mean(t, axis=-1, keepdims=True)
        var = jnp.mean(jnp.square(t - mu), axis=-1, keepdims=True)
        return (t - mu) * jax.lax.rsqrt(var + eps) * g_ref[...] + b_ref[...]

    pf = jnp.dot(p_ref[...], w_ref[...], preferred_element_type=jnp.float32)
    pf = pf + pos_ref[...]
    opatch_ref[...] = ln(pf).astype(opatch_ref.dtype)
    ocls_ref[...] = ln(cls_ref[...].astype(jnp.float32)).astype(ocls_ref.dtype)


def clip_encode_image(cp, x):
    """Minimal stand-in for clip_model.encode_image (proj removed); one kernel."""
    Bq = x.shape[0]
    n = IMG // PATCH
    patches = x.reshape(Bq, C_IN, n, PATCH, n, PATCH)
    patches = patches.transpose(0, 2, 4, 1, 3, 5).reshape(
        Bq * n * n, C_IN * PATCH * PATCH)
    pos = cp["pos_emb"]
    pos_patch = jnp.tile(pos[1:], (Bq, 1))                     # (B*N, Vw)
    cls_row = (cp["class_emb"] + pos[0])[None, :]              # (1, Vw)
    opatch, ocls = pl.pallas_call(
        functools.partial(_clip_encode_kernel, eps=1e-5),
        out_shape=(
            jax.ShapeDtypeStruct((Bq * n * n, VISION_WIDTH), jnp.float32),
            jax.ShapeDtypeStruct((1, VISION_WIDTH), jnp.float32),
        ),
    )(patches, cp["patch_w"], pos_patch, cls_row,
      cp["ln_pre_g"].reshape(1, -1), cp["ln_pre_b"].reshape(1, -1))
    feat_patch = opatch.reshape(Bq, n * n, VISION_WIDTH)
    # TODO(synk): frozen CLIP ViT transformer stack / ln_post (external
    # clip_model weights) are not reproduced in this synthetic encoder.
    return feat_patch, ocls


def _qformer_kernel(
        qtok_ref, emb_g_ref, emb_b_ref, enc_ref,
        w_sqkv_ref, b_sqkv_ref, w_so_ref, b_so_ref, g_sln_ref, b_sln_ref,
        w_cq_ref, b_cq_ref, w_ckv_ref, b_ckv_ref, w_co_ref, b_co_ref,
        g_cln_ref, b_cln_ref,
        w1_ref, b1_ref, w2_ref, b2_ref, g_fln_ref, b_fln_ref,
        h_ref, ca_ref,
        ctx_ref):
    """One full Q-Former layer per grid step (self-attn, cross-attn, FFN).

    The hidden state lives in the VMEM-resident `h_ref` output block (constant
    block index -> never re-fetched / written back until the last layer).
    Only the cross-attention probabilities (the module's att_weights output)
    and the final hidden state ever reach HBM.
    """
    Bq, nh, Q, Nkv = ca_ref.shape
    H = h_ref.shape[-1]
    dh = H // nh
    scale = 1.0 / math.sqrt(dh)

    def ln(t, g, b, eps=1e-12):
        mu = jnp.mean(t, axis=-1, keepdims=True)
        var = jnp.mean(jnp.square(t - mu), axis=-1, keepdims=True)
        return (t - mu) * jax.lax.rsqrt(var + eps) * g + b

    def softmax_rows(s):
        m = jnp.max(s, axis=-1, keepdims=True)
        e = jnp.exp(s - m)
        return e / jnp.sum(e, axis=-1, keepdims=True)

    @pl.when(pl.program_id(0) == 0)
    def _():
        # BertEmbeddings: LayerNorm over the (expanded) query tokens.
        h_ref[...] = ln(qtok_ref[...].astype(jnp.float32),
                        emb_g_ref[...], emb_b_ref[...])

    h = h_ref[...]                                              # (B*Q, H)

    # ----- self-attention: single fused QKV matmul, probs stay in VMEM -------
    qkv = jnp.dot(h, w_sqkv_ref[...],
                  preferred_element_type=jnp.float32) + b_sqkv_ref[...]
    for bi in range(Bq):
        rq = slice(bi * Q, (bi + 1) * Q)
        for hd in range(nh):
            cq = slice(hd * dh, (hd + 1) * dh)
            ck = slice(H + hd * dh, H + (hd + 1) * dh)
            cv = slice(2 * H + hd * dh, 2 * H + (hd + 1) * dh)
            s = jax.lax.dot_general(
                qkv[rq, cq], qkv[rq, ck], (((1,), (1,)), ((), ())),
                preferred_element_type=jnp.float32) * scale
            p = softmax_rows(s)
            ctx_ref[rq, cq] = jnp.dot(p, qkv[rq, cv],
                                      preferred_element_type=jnp.float32)
    sa = jnp.dot(ctx_ref[...], w_so_ref[...],
                 preferred_element_type=jnp.float32) + b_so_ref[...]
    h = ln(h + sa, g_sln_ref[...], b_sln_ref[...])

    # ----- cross-attention to image features (mask all-ones => no mask) ------
    qc = jnp.dot(h, w_cq_ref[...],
                 preferred_element_type=jnp.float32) + b_cq_ref[...]
    kv = jnp.dot(enc_ref[...], w_ckv_ref[...],
                 preferred_element_type=jnp.float32) + b_ckv_ref[...]
    for bi in range(Bq):
        rq = slice(bi * Q, (bi + 1) * Q)
        rk = slice(bi * Nkv, (bi + 1) * Nkv)
        for hd in range(nh):
            cs = slice(hd * dh, (hd + 1) * dh)
            cvv = slice(H + hd * dh, H + (hd + 1) * dh)
            s = jax.lax.dot_general(
                qc[rq, cs], kv[rk, cs], (((1,), (1,)), ((), ())),
                preferred_element_type=jnp.float32) * scale
            p = softmax_rows(s)
            ca_ref[bi, hd, :, :] = p.astype(ca_ref.dtype)       # att_weights out
            ctx_ref[rq, cs] = jnp.dot(p, kv[rk, cvv],
                                      preferred_element_type=jnp.float32)
    co = jnp.dot(ctx_ref[...], w_co_ref[...],
                 preferred_element_type=jnp.float32) + b_co_ref[...]
    h = ln(h + co, g_cln_ref[...], b_cln_ref[...])

    # --------------------------- fused feed-forward --------------------------
    f = jnp.dot(h, w1_ref[...], preferred_element_type=jnp.float32) + b1_ref[...]
    # TODO(synk): HF BERT uses the exact erf-based GELU; the tanh approximation
    # is kept here for a guaranteed Mosaic lowering (small systematic drift).
    f = jax.nn.gelu(f, approximate=True)
    f = jnp.dot(f, w2_ref[...], preferred_element_type=jnp.float32) + b2_ref[...]
    h = ln(h + f, g_fln_ref[...], b_fln_ref[...])

    h_ref[...] = h


def qformer_apply(qp, query_tokens_b, enc_hidden):
    """BertModel(query_embeds=..., encoder_hidden_states=..., cross_attention_freq=1)
    as a single pallas_call with grid=(LAYERS,)."""
    Bq, Q, H = query_tokens_b.shape
    _, Nkv, Vw = enc_hidden.shape
    L = qp["w_self_qkv"].shape[0]
    nh = HEADS

    qt2 = query_tokens_b.reshape(Bq * Q, H)
    enc2 = enc_hidden.reshape(Bq * Nkv, Vw)

    def rep(arr):        # same (full) block every layer
        shape = arr.shape
        return pl.BlockSpec(shape, lambda l: (0,) * len(shape))

    def per_layer(arr):  # leading layer axis, squeezed out inside the kernel
        return pl.BlockSpec((None,) + arr.shape[1:],
                            lambda l: (l,) + (0,) * (arr.ndim - 1))

    rep_inputs = [qt2, qp["emb_ln_g"], qp["emb_ln_b"], enc2]
    layer_ws = [
        qp["w_self_qkv"], qp["b_self_qkv"], qp["w_self_o"], qp["b_self_o"],
        qp["ln_self_g"], qp["ln_self_b"],
        qp["w_cross_q"], qp["b_cross_q"], qp["w_cross_kv"], qp["b_cross_kv"],
        qp["w_cross_o"], qp["b_cross_o"], qp["ln_cross_g"], qp["ln_cross_b"],
        qp["w_ffn1"], qp["b_ffn1"], qp["w_ffn2"], qp["b_ffn2"],
        qp["ln_ffn_g"], qp["ln_ffn_b"],
    ]

    last_hidden2, cross_att = pl.pallas_call(
        _qformer_kernel,
        grid=(L,),
        in_specs=[rep(a) for a in rep_inputs] + [per_layer(w) for w in layer_ws],
        out_specs=(
            pl.BlockSpec((Bq * Q, H), lambda l: (0, 0)),            # resident carry
            pl.BlockSpec((None, Bq, nh, Q, Nkv), lambda l: (l, 0, 0, 0, 0)),
        ),
        out_shape=(
            jax.ShapeDtypeStruct((Bq * Q, H), jnp.float32),
            jax.ShapeDtypeStruct((L, Bq, nh, Q, Nkv), jnp.float32),
        ),
        scratch_shapes=[pltpu.VMEM((Bq * Q, H), jnp.float32)],      # attn context
        compiler_params=pltpu.CompilerParams(
            dimension_semantics=("arbitrary",)),                    # layers are sequential
    )(*rep_inputs, *layer_ws)
    return last_hidden2, cross_att


def _head_kernel(h_ref, proj_ref, t_ref, maxv_ref, idx_ref, sm_ref):
    """Fused head: visual projection, logits vs. text features, softmax over the
    query-token axis, and max/argmax over the query-token axis (reuses the max)."""
    Bq, Q, C = sm_ref.shape
    qf = jnp.dot(h_ref[...], proj_ref[...],
                 preferred_element_type=jnp.float32)               # (B*Q, P)
    logits = jax.lax.dot_general(
        qf, t_ref[...], (((1,), (1,)), ((), ())),
        preferred_element_type=jnp.float32).reshape(Bq, Q, C)      # (B, Q, C)
    m = jnp.max(logits, axis=1, keepdims=True)                     # (B, 1, C)
    e = jnp.exp(logits - m)
    sm_ref[...] = (e / jnp.sum(e, axis=1, keepdims=True)).astype(sm_ref.dtype)
    # reuse m: no second cross-sublane reduction over logits
    maxv_ref[...] = jnp.max(m, axis=1).astype(maxv_ref.dtype)
    qi = jax.lax.broadcasted_iota(jnp.int32, logits.shape, 1)
    idx = jnp.min(jnp.where(logits == m, qi, Q), axis=1)           # first occurrence
    idx_ref[...] = idx.astype(jnp.int32)


def head(last_hidden2, proj, text_features, batch, num_q):
    C = text_features.shape[0]
    maxv, idx, sm = pl.pallas_call(
        _head_kernel,
        out_shape=(
            jax.ShapeDtypeStruct((batch, C), jnp.float32),
            jax.ShapeDtypeStruct((batch, C), jnp.int32),   # NOTE: torch gives int64
            jax.ShapeDtypeStruct((batch, num_q, C), jnp.float32),
        ),
    )(last_hidden2, proj, text_features)
    cos_similarity = jnp.transpose(sm, (0, 2, 1))                  # (B, C, Q)
    return maxv, idx, cos_similarity


# --------------------------------- model glue ---------------------------------
def qks_forward(params, x):
    feat_patch, feat_cls = clip_encode_image(params["clip"], x)    # (B,N,Vw), (1,Vw)
    if RMCLS:
        image_features = feat_patch                                # class token dropped
    else:
        cls = jnp.broadcast_to(feat_cls[None], (x.shape[0], 1, VISION_WIDTH))
        image_features = jnp.concatenate([cls, feat_patch], axis=1)

    query_tokens = jnp.broadcast_to(params["query_tokens"],
                                    (x.shape[0], NUM_Q, HIDDEN))
    last_hidden2, cross_att = qformer_apply(params["qformer"], query_tokens,
                                            image_features)
    logits, indices, cos_similarity = head(last_hidden2, params["proj"],
                                           params["text_features"],
                                           x.shape[0], NUM_Q)
    att_weights = tuple(cross_att[l] for l in range(cross_att.shape[0]))
    return {
        "logits": logits,                    # (B, C)   = logits.max(dim=1).values
        "indices": indices,                  # (B, C)   = logits.max(dim=1).indices
        "cos_similarity": cos_similarity,    # (B, C, Q)
        "att_weights": att_weights,          # tuple of (B, H, Q, N) per layer
    }


# ------------------------------ parameter init --------------------------------
def init_params(key):
    keys = iter(jax.random.split(key, 32))

    def nrm(shape, std=0.02):
        return (std * jax.random.normal(next(keys), shape)).astype(jnp.float32)

    def zeros(shape):
        return jnp.zeros(shape, jnp.float32)

    def ones(shape):
        return jnp.ones(shape, jnp.float32)

    clip = {
        "patch_w": nrm((C_IN * PATCH * PATCH, VISION_WIDTH)),
        "class_emb": nrm((VISION_WIDTH,)),
        "pos_emb": nrm((1 + N_PATCH, VISION_WIDTH)),
        "ln_pre_g": ones((VISION_WIDTH,)),
        "ln_pre_b": zeros((VISION_WIDTH,)),
    }

    L = LAYERS
    qformer = {
        "emb_ln_g": ones((1, HIDDEN)), "emb_ln_b": zeros((1, HIDDEN)),
        # self-attention: fused QKV weight, columns = [Wq | Wk | Wv]
        "w_self_qkv": nrm((L, HIDDEN, 3 * HIDDEN)),
        "b_self_qkv": zeros((L, 1, 3 * HIDDEN)),
        "w_self_o": nrm((L, HIDDEN, HIDDEN)), "b_self_o": zeros((L, 1, HIDDEN)),
        "ln_self_g": ones((L, 1, HIDDEN)), "ln_self_b": zeros((L, 1, HIDDEN)),
        # cross-attention: fused KV weight on the image features
        "w_cross_q": nrm((L, HIDDEN, HIDDEN)), "b_cross_q": zeros((L, 1, HIDDEN)),
        "w_cross_kv": nrm((L, VISION_WIDTH, 2 * HIDDEN)),
        "b_cross_kv": zeros((L, 1, 2 * HIDDEN)),
        "w_cross_o": nrm((L, HIDDEN, HIDDEN)), "b_cross_o": zeros((L, 1, HIDDEN)),
        "ln_cross_g": ones((L, 1, HIDDEN)), "ln_cross_b": zeros((L, 1, HIDDEN)),
        # feed-forward
        "w_ffn1": nrm((L, HIDDEN, INTER)), "b_ffn1": zeros((L, 1, INTER)),
        "w_ffn2": nrm((L, INTER, HIDDEN)), "b_ffn2": zeros((L, 1, HIDDEN)),
        "ln_ffn_g": ones((L, 1, HIDDEN)), "ln_ffn_b": zeros((L, 1, HIDDEN)),
    }

    return {
        "clip": clip,
        "qformer": qformer,
        # nn.Parameter(zeros).normal_(std=initializer_range)
        "query_tokens": nrm((1, NUM_Q, HIDDEN)),
        # clip_model.visual.proj
        "proj": nrm((HIDDEN, PROJ_DIM), std=HIDDEN ** -0.5),
        # precomputed CLIP text features (stand-in; real ones come from
        # prompt_engineering / cached .npy = file I/O + frozen text encoder)
        "text_features": nrm((N_CLASSES, PROJ_DIM), std=1.0),
    }


# ------------------------------------ main -------------------------------------
if __name__ == "__main__":
    key = jax.random.PRNGKey(0)
    pkey, xkey = jax.random.split(key)
    params = init_params(pkey)
    x = jax.random.normal(xkey, (B, C_IN, IMG, IMG), dtype=jnp.float32)

    out = jax.jit(qks_forward)(params, x)
    out = jax.block_until_ready(out)

    assert out["logits"].shape == (B, N_CLASSES)
    assert out["indices"].shape == (B, N_CLASSES)
    assert out["cos_similarity"].shape == (B, N_CLASSES, NUM_Q)
    assert len(out["att_weights"]) == LAYERS
    assert out["att_weights"][0].shape == (B, HEADS, NUM_Q, N_PATCH)
    # each cos_similarity row is a softmax over query tokens -> sums to 1
    assert bool(jnp.allclose(out["cos_similarity"].sum(-1), 1.0, atol=1e-4))

    print("KERNEL_OK")
</pallas_src>

<mosaic_0001>
module attributes {stable_mosaic.version = 11 : i64} {
  func.func @_clip_encode_kernel(%arg0: memref<32x48xf32, #tpu.memory_space<vmem>>, %arg1: memref<48x32xf32, #tpu.memory_space<vmem>>, %arg2: memref<32x32xf32, #tpu.memory_space<vmem>>, %arg3: memref<1x32xf32, #tpu.memory_space<vmem>>, %arg4: memref<1x32xf32, #tpu.memory_space<vmem>>, %arg5: memref<1x32xf32, #tpu.memory_space<vmem>>, %arg6: memref<32x32xf32, #tpu.memory_space<vmem>>, %arg7: memref<1x32xf32, #tpu.memory_space<vmem>>) attributes {dimension_semantics = [], scalar_prefetch = 0 : i64, scratch_operands = 0 : i64, tpu.core_type = #tpu.core_type<tc>} {
    %c0 = arith.constant 0 : index
    %c0_0 = arith.constant 0 : index
    %0 = vector.load %arg0[%c0, %c0_0] : memref<32x48xf32, #tpu.memory_space<vmem>>, vector<32x48xf32>
    %c0_1 = arith.constant 0 : index
    %c0_2 = arith.constant 0 : index
    %1 = vector.load %arg1[%c0_1, %c0_2] : memref<48x32xf32, #tpu.memory_space<vmem>>, vector<48x32xf32>
    %cst = arith.constant dense<0.000000e+00> : vector<32x32xf32>
    %2 = tpu.matmul %0, %1, %cst {dimension_numbers = #tpu.dot_dimension_numbers<[1], [0], [0], [1], [0, 0, 1, 1], [], []>} : vector<32x48xf32>, vector<48x32xf32>, vector<32x32xf32> -> vector<32x32xf32>
    %c0_3 = arith.constant 0 : index
    %c0_4 = arith.constant 0 : index
    %3 = vector.load %arg2[%c0_3, %c0_4] : memref<32x32xf32, #tpu.memory_space<vmem>>, vector<32x32xf32>
    %4 = arith.addf %2, %3 : vector<32x32xf32>
    %cst_5 = arith.constant dense<0.000000e+00> : vector<32xf32>
    %5 = vector.multi_reduction <add>, %4, %cst_5 [1] : vector<32x32xf32> to vector<32xf32>
    %6 = vector.shape_cast %5 : vector<32xf32> to vector<32x1xf32>
    %cst_6 = arith.constant 3.200000e+01 : f32
    %7 = vector.broadcast %cst_6 : f32 to vector<32x1xf32>
    %8 = arith.divf %6, %7 : vector<32x1xf32>
    %9 = vector.broadcast %8 : vector<32x1xf32> to vector<32x32xf32>
    %10 = arith.subf %4, %9 : vector<32x32xf32>
    %11 = arith.mulf %10, %10 : vector<32x32xf32>
    %cst_7 = arith.constant dense<0.000000e+00> : vector<32xf32>
    %12 = vector.multi_reduction <add>, %11, %cst_7 [1] : vector<32x32xf32> to vector<32xf32>
    %13 = vector.shape_cast %12 : vector<32xf32> to vector<32x1xf32>
    %cst_8 = arith.constant 3.200000e+01 : f32
    %14 = vector.broadcast %cst_8 : f32 to vector<32x1xf32>
    %15 = arith.divf %13, %14 : vector<32x1xf32>
    %16 = vector.broadcast %8 : vector<32x1xf32> to vector<32x32xf32>
    %17 = arith.subf %4, %16 : vector<32x32xf32>
    %cst_9 = arith.constant 9.99999974E-6 : f32
    %18 = vector.broadcast %cst_9 : f32 to vector<32x1xf32>
    %19 = arith.addf %15, %18 : vector<32x1xf32>
    %20 = math.rsqrt %19 : vector<32x1xf32>
    %21 = vector.broadcast %20 : vector<32x1xf32> to vector<32x32xf32>
    %22 = arith.mulf %17, %21 : vector<32x32xf32>
    %c0_10 = arith.constant 0 : index
    %c0_11 = arith.constant 0 : index
    %23 = vector.load %arg4[%c0_10, %c0_11] : memref<1x32xf32, #tpu.memory_space<vmem>>, vector<1x32xf32>
    %24 = vector.broadcast %23 : vector<1x32xf32> to vector<32x32xf32>
    %25 = arith.mulf %22, %24 : vector<32x32xf32>
    %c0_12 = arith.constant 0 : index
    %c0_13 = arith.constant 0 : index
    %26 = vector.load %arg5[%c0_12, %c0_13] : memref<1x32xf32, #tpu.memory_space<vmem>>, vector<1x32xf32>
    %27 = vector.broadcast %26 : vector<1x32xf32> to vector<32x32xf32>
    %28 = arith.addf %25, %27 : vector<32x32xf32>
    %c0_14 = arith.constant 0 : index
    %c0_15 = arith.constant 0 : index
    %29 = vector.load %arg6[%c0_14, %c0_15] : memref<32x32xf32, #tpu.memory_space<vmem>>, vector<32x32xf32>
    tpu.vector_store %arg6[%c0_14, %c0_15], %28 {strides = array<i32>} : memref<32x32xf32, #tpu.memory_space<vmem>>, vector<32x32xf32>,
    %c0_16 = arith.constant 0 : index
    %c0_17 = arith.constant 0 : index
    %30 = vector.load %arg3[%c0_16, %c0_17] : memref<1x32xf32, #tpu.memory_space<vmem>>, vector<1x32xf32>
    %cst_18 = arith.constant dense<0.000000e+00> : vector<1xf32>
    %31 = vector.multi_reduction <add>, %30, %cst_18 [1] : vector<1x32xf32> to vector<1xf32>
    %32 = vector.shape_cast %31 : vector<1xf32> to vector<1x1xf32>
    %cst_19 = arith.constant 3.200000e+01 : f32
    %33 = vector.broadcast %cst_19 : f32 to vector<1x1xf32>
    %34 = arith.divf %32, %33 : vector<1x1xf32>
    %35 = vector.broadcast %34 : vector<1x1xf32> to vector<1x32xf32>
    %36 = arith.subf %30, %35 : vector<1x32xf32>
    %37 = arith.mulf %36, %36 : vector<1x32xf32>
    %cst_20 = arith.constant dense<0.000000e+00> : vector<1xf32>
    %38 = vector.multi_reduction <add>, %37, %cst_20 [1] : vector<1x32xf32> to vector<1xf32>
    %39 = vector.shape_cast %38 : vector<1xf32> to vector<1x1xf32>
    %cst_21 = arith.constant 3.200000e+01 : f32
    %40 = vector.broadcast %cst_21 : f32 to vector<1x1xf32>
    %41 = arith.divf %39, %40 : vector<1x1xf32>
    %42 = vector.broadcast %34 : vector<1x1xf32> to vector<1x32xf32>
    %43 = arith.subf %30, %42 : vector<1x32xf32>
    %cst_22 = arith.constant 9.99999974E-6 : f32
    %44 = vector.broadcast %cst_22 : f32 to vector<1x1xf32>
    %45 = arith.addf %41, %44 : vector<1x1xf32>
    %46 = math.rsqrt %45 : vector<1x1xf32>
    %47 = vector.broadcast %46 : vector<1x1xf32> to vector<1x32xf32>
    %48 = arith.mulf %43, %47 : vector<1x32xf32>
    %c0_23 = arith.constant 0 : index
    %c0_24 = arith.constant 0 : index
    %49 = vector.load %arg4[%c0_23, %c0_24] : memref<1x32xf32, #tpu.memory_space<vmem>>, vector<1x32xf32>
    %50 = arith.mulf %48, %49 : vector<1x32xf32>
    %c0_25 = arith.constant 0 : index
    %c0_26 = arith.constant 0 : index
    %51 = vector.load %arg5[%c0_25, %c0_26] : memref<1x32xf32, #tpu.memory_space<vmem>>, vector<1x32xf32>
    %52 = arith.addf %50, %51 : vector<1x32xf32>
    %c0_27 = arith.constant 0 : index
    %c0_28 = arith.constant 0 : index
    %53 = vector.load %arg7[%c0_27, %c0_28] : memref<1x32xf32, #tpu.memory_space<vmem>>, vector<1x32xf32>
    tpu.vector_store %arg7[%c0_27, %c0_28], %52 {strides = array<i32>} : memref<1x32xf32, #tpu.memory_space<vmem>>, vector<1x32xf32>,
    return
  }
}

module attributes {stable_mosaic.version = 11 : i64} {
  func.func @_head_kernel(%arg0: memref<16x32xf32, #tpu.memory_space<vmem>>, %arg1: memref<32x16xf32, #tpu.memory_space<vmem>>, %arg2: memref<10x16xf32, #tpu.memory_space<vmem>>, %arg3: memref<2x10xf32, #tpu.memory_space<vmem>>, %arg4: memref<2x10xi32, #tpu.memory_space<vmem>>, %arg5: memref<2x8x10xf32, #tpu.memory_space<vmem>>) attributes {dimension_semantics = [], scalar_prefetch = 0 : i64, scratch_operands = 0 : i64, tpu.core_type = #tpu.core_type<tc>} {
    %c0 = arith.constant 0 : index
    %c0_0 = arith.constant 0 : index
    %0 = vector.load %arg0[%c0, %c0_0] : memref<16x32xf32, #tpu.memory_space<vmem>>, vector<16x32xf32>
    %c0_1 = arith.constant 0 : index
    %c0_2 = arith.constant 0 : index
    %1 = vector.load %arg1[%c0_1, %c0_2] : memref<32x16xf32, #tpu.memory_space<vmem>>, vector<32x16xf32>
    %cst = arith.constant dense<0.000000e+00> : vector<16x16xf32>
    %2 = tpu.matmul %0, %1, %cst {dimension_numbers = #tpu.dot_dimension_numbers<[1], [0], [0], [1], [0, 0, 1, 1], [], []>} : vector<16x32xf32>, vector<32x16xf32>, vector<16x16xf32> -> vector<16x16xf32>
    %c0_3 = arith.constant 0 : index
    %c0_4 = arith.constant 0 : index
    %3 = vector.load %arg2[%c0_3, %c0_4] : memref<10x16xf32, #tpu.memory_space<vmem>>, vector<10x16xf32>
    %cst_5 = arith.constant dense<0.000000e+00> : vector<16x10xf32>
    %4 = tpu.matmul %2, %3, %cst_5 {dimension_numbers = #tpu.dot_dimension_numbers<[1], [1], [0], [0], [0, 0, 1, 0], [], []>} : vector<16x16xf32>, vector<10x16xf32>, vector<16x10xf32> -> vector<16x10xf32>
    %5 = vector.shape_cast %4 : vector<16x10xf32> to vector<2x8x10xf32>
    %cst_6 = arith.constant dense<0xFF800000> : vector<2x10xf32>
    %6 = vector.multi_reduction <maximumf>, %5, %cst_6 [1] : vector<2x8x10xf32> to vector<2x10xf32>
    %7 = vector.shape_cast %6 : vector<2x10xf32> to vector<2x1x10xf32>
    %8 = vector.broadcast %7 : vector<2x1x10xf32> to vector<2x8x10xf32>
    %9 = arith.subf %5, %8 : vector<2x8x10xf32>
    %10 = math.exp %9 : vector<2x8x10xf32>
    %cst_7 = arith.constant dense<0.000000e+00> : vector<2x10xf32>
    %11 = vector.multi_reduction <add>, %10, %cst_7 [1] : vector<2x8x10xf32> to vector<2x10xf32>
    %12 = vector.shape_cast %11 : vector<2x10xf32> to vector<2x1x10xf32>
    %13 = vector.broadcast %12 : vector<2x1x10xf32> to vector<2x8x10xf32>
    %14 = arith.divf %10, %13 : vector<2x8x10xf32>
    %c0_8 = arith.constant 0 : index
    %c0_9 = arith.constant 0 : index
    %c0_10 = arith.constant 0 : index
    %15 = vector.load %arg5[%c0_8, %c0_9, %c0_10] : memref<2x8x10xf32, #tpu.memory_space<vmem>>, vector<2x8x10xf32>
    tpu.vector_store %arg5[%c0_8, %c0_9, %c0_10], %14 {strides = array<i32>} : memref<2x8x10xf32, #tpu.memory_space<vmem>>, vector<2x8x10xf32>,
    %cst_11 = arith.constant dense<0xFF800000> : vector<2x10xf32>
    %16 = vector.multi_reduction <maximumf>, %7, %cst_11 [1] : vector<2x1x10xf32> to vector<2x10xf32>
    %c0_12 = arith.constant 0 : index
    %c0_13 = arith.constant 0 : index
    %17 = vector.load %arg3[%c0_12, %c0_13] : memref<2x10xf32, #tpu.memory_space<vmem>>, vector<2x10xf32>
    tpu.vector_store %arg3[%c0_12, %c0_13], %16 {strides = array<i32>} : memref<2x10xf32, #tpu.memory_space<vmem>>, vector<2x10xf32>,
    %18 = tpu.iota {dimensions = array<i32: 1>} : vector<2x8x10xi32>
    %19 = vector.broadcast %7 : vector<2x1x10xf32> to vector<2x8x10xf32>
    %20 = arith.cmpf oeq, %5, %19 : vector<2x8x10xf32>
    %c8_i32 = arith.constant 8 : i32
    %21 = vector.broadcast %c8_i32 : i32 to vector<2x8x10xi32>
    %22 = arith.select %20, %18, %21 : vector<2x8x10xi1>, vector<2x8x10xi32>
    %cst_14 = arith.constant dense<2147483647> : vector<2x10xi32>
    %23 = vector.multi_reduction <minsi>, %22, %cst_14 [1] : vector<2x8x10xi32> to vector<2x10xi32>
    %c0_15 = arith.constant 0 : index
    %c0_16 = arith.constant 0 : index
    %24 = vector.load %arg4[%c0_15, %c0_16] : memref<2x10xi32, #tpu.memory_space<vmem>>, vector<2x10xi32>
    tpu.vector_store %arg4[%c0_15, %c0_16], %23 {strides = array<i32>} : memref<2x10xi32, #tpu.memory_space<vmem>>, vector<2x10xi32>,
    return
  }
}

module attributes {stable_mosaic.version = 11 : i64} {
  func.func @_qformer_kernel(%arg0: i32, %arg1: memref<16x32xf32, #tpu.memory_space<vmem>>, %arg2: memref<1x32xf32, #tpu.memory_space<vmem>>, %arg3: memref<1x32xf32, #tpu.memory_space<vmem>>, %arg4: memref<32x32xf32, #tpu.memory_space<vmem>>, %arg5: memref<1x32x96xf32, #tpu.memory_space<vmem>>, %arg6: memref<1x1x96xf32, #tpu.memory_space<vmem>>, %arg7: memref<1x32x32xf32, #tpu.memory_space<vmem>>, %arg8: memref<1x1x32xf32, #tpu.memory_space<vmem>>, %arg9: memref<1x1x32xf32, #tpu.memory_space<vmem>>, %arg10: memref<1x1x32xf32, #tpu.memory_space<vmem>>, %arg11: memref<1x32x32xf32, #tpu.memory_space<vmem>>, %arg12: memref<1x1x32xf32, #tpu.memory_space<vmem>>, %arg13: memref<1x32x64xf32, #tpu.memory_space<vmem>>, %arg14: memref<1x1x64xf32, #tpu.memory_space<vmem>>, %arg15: memref<1x32x32xf32, #tpu.memory_space<vmem>>, %arg16: memref<1x1x32xf32, #tpu.memory_space<vmem>>, %arg17: memref<1x1x32xf32, #tpu.memory_space<vmem>>, %arg18: memref<1x1x32xf32, #tpu.memory_space<vmem>>, %arg19: memref<1x32x64xf32, #tpu.memory_space<vmem>>, %arg20: memref<1x1x64xf32, #tpu.memory_space<vmem>>, %arg21: memref<1x64x32xf32, #tpu.memory_space<vmem>>, %arg22: memref<1x1x32xf32, #tpu.memory_space<vmem>>, %arg23: memref<1x1x32xf32, #tpu.memory_space<vmem>>, %arg24: memref<1x1x32xf32, #tpu.memory_space<vmem>>, %arg25: memref<16x32xf32, #tpu.memory_space<vmem>>, %arg26: memref<1x2x4x8x16xf32, #tpu.memory_space<vmem>>, %arg27: memref<16x32xf32, #tpu.memory_space<vmem>>) attributes {dimension_semantics = [#tpu.dimension_semantics<arbitrary>], iteration_bounds = array<i64: 2>, scalar_prefetch = 0 : i64, scratch_operands = 1 : i64, tpu.core_type = #tpu.core_type<tc>, window_params = [{pipeline_mode = #tpu.pipeline_mode<synchronous>, transform_indices = @transform_0, window_bounds = array<i64: 16, 32>}, {pipeline_mode = #tpu.pipeline_mode<synchronous>, transform_indices = @transform_1, window_bounds = array<i64: 1, 32>}, {pipeline_mode = #tpu.pipeline_mode<synchronous>, transform_indices = @transform_2, window_bounds = array<i64: 1, 32>}, {pipeline_mode = #tpu.pipeline_mode<synchronous>, transform_indices = @transform_3, window_bounds = array<i64: 32, 32>}, {transform_indices = @transform_4, window_bounds = array<i64: 1, 32, 96>}, {transform_indices = @transform_5, window_bounds = array<i64: 1, 1, 96>}, {transform_indices = @transform_6, window_bounds = array<i64: 1, 32, 32>}, {transform_indices = @transform_7, window_bounds = array<i64: 1, 1, 32>}, {transform_indices = @transform_8, window_bounds = array<i64: 1, 1, 32>}, {transform_indices = @transform_9, window_bounds = array<i64: 1, 1, 32>}, {transform_indices = @transform_10, window_bounds = array<i64: 1, 32, 32>}, {transform_indices = @transform_11, window_bounds = array<i64: 1, 1, 32>}, {transform_indices = @transform_12, window_bounds = array<i64: 1, 32, 64>}, {transform_indices = @transform_13, window_bounds = array<i64: 1, 1, 64>}, {transform_indices = @transform_14, window_bounds = array<i64: 1, 32, 32>}, {transform_indices = @transform_15, window_bounds = array<i64: 1, 1, 32>}, {transform_indices = @transform_16, window_bounds = array<i64: 1, 1, 32>}, {transform_indices = @transform_17, window_bounds = array<i64: 1, 1, 32>}, {transform_indices = @transform_18, window_bounds = array<i64: 1, 32, 64>}, {transform_indices = @transform_19, window_bounds = array<i64: 1, 1, 64>}, {transform_indices = @transform_20, window_bounds = array<i64: 1, 64, 32>}, {transform_indices = @transform_21, window_bounds = array<i64: 1, 1, 32>}, {transform_indices = @transform_22, window_bounds = array<i64: 1, 1, 32>}, {transform_indices = @transform_23, window_bounds = array<i64: 1, 1, 32>}, {pipeline_mode = #tpu.pipeline_mode<synchronous>, transform_indices = @transform_24, window_bounds = array<i64: 16, 32>}, {transform_indices = @transform_25, window_bounds = array<i64: 1, 2, 4, 8, 16>}]} {
    %c0_i32 = arith.constant 0 : i32
    %0 = arith.cmpi eq, %arg0, %c0_i32 : i32
    %1 = arith.extui %0 : i1 to i32
    %c0_i32_0 = arith.constant 0 : i32
    %2 = arith.cmpi ne, %1, %c0_i32_0 : i32
    scf.if %2 {
      %c0_241 = arith.constant 0 : index
      %c0_242 = arith.constant 0 : index
      %447 = vector.load %arg1[%c0_241, %c0_242] : memref<16x32xf32, #tpu.memory_space<vmem>>, vector<16x32xf32>
      %c0_243 = arith.constant 0 : index
      %c0_244 = arith.constant 0 : index
      %448 = vector.load %arg2[%c0_243, %c0_244] : memref<1x32xf32, #tpu.memory_space<vmem>>, vector<1x32xf32>
      %c0_245 = arith.constant 0 : index
      %c0_246 = arith.constant 0 : index
      %449 = vector.load %arg3[%c0_245, %c0_246] : memref<1x32xf32, #tpu.memory_space<vmem>>, vector<1x32xf32>
      %cst_247 = arith.constant dense<0.000000e+00> : vector<16xf32>
      %450 = vector.multi_reduction <add>, %447, %cst_247 [1] : vector<16x32xf32> to vector<16xf32>
      %451 = vector.shape_cast %450 : vector<16xf32> to vector<16x1xf32>
      %cst_248 = arith.constant 3.200000e+01 : f32
      %452 = vector.broadcast %cst_248 : f32 to vector<16x1xf32>
      %453 = arith.divf %451, %452 : vector<16x1xf32>
      %454 = vector.broadcast %453 : vector<16x1xf32> to vector<16x32xf32>
      %455 = arith.subf %447, %454 : vector<16x32xf32>
      %456 = arith.mulf %455, %455 : vector<16x32xf32>
      %cst_249 = arith.constant dense<0.000000e+00> : vector<16xf32>
      %457 = vector.multi_reduction <add>, %456, %cst_249 [1] : vector<16x32xf32> to vector<16xf32>
      %458 = vector.shape_cast %457 : vector<16xf32> to vector<16x1xf32>
      %cst_250 = arith.constant 3.200000e+01 : f32
      %459 = vector.broadcast %cst_250 : f32 to vector<16x1xf32>
      %460 = arith.divf %458, %459 : vector<16x1xf32>
      %461 = vector.broadcast %453 : vector<16x1xf32> to vector<16x32xf32>
      %462 = arith.subf %447, %461 : vector<16x32xf32>
      %cst_251 = arith.constant 9.99999996E-13 : f32
      %463 = vector.broadcast %cst_251 : f32 to vector<16x1xf32>
      %464 = arith.addf %460, %463 : vector<16x1xf32>
      %465 = math.rsqrt %464 : vector<16x1xf32>
      %466 = vector.broadcast %465 : vector<16x1xf32> to vector<16x32xf32>
      %467 = arith.mulf %462, %466 : vector<16x32xf32>
      %468 = vector.broadcast %448 : vector<1x32xf32> to vector<16x32xf32>
      %469 = arith.mulf %467, %468 : vector<16x32xf32>
      %470 = vector.broadcast %449 : vector<1x32xf32> to vector<16x32xf32>
      %471 = arith.addf %469, %470 : vector<16x32xf32>
      %c0_252 = arith.constant 0 : index
      %c0_253 = arith.constant 0 : index
      %472 = vector.load %arg25[%c0_252, %c0_253] : memref<16x32xf32, #tpu.memory_space<vmem>>, vector<16x32xf32>
      tpu.vector_store %arg25[%c0_252, %c0_253], %471 {strides = array<i32>} : memref<16x32xf32, #tpu.memory_space<vmem>>, vector<16x32xf32>,
    } else {
    }
    %c0 = arith.constant 0 : index
    %c0_1 = arith.constant 0 : index
    %3 = vector.load %arg25[%c0, %c0_1] : memref<16x32xf32, #tpu.memory_space<vmem>>, vector<16x32xf32>
    %c0_2 = arith.constant 0 : index
    %c0_3 = arith.constant 0 : index
    %c0_4 = arith.constant 0 : index
    %4 = vector.load %arg5[%c0_2, %c0_3, %c0_4] : memref<1x32x96xf32, #tpu.memory_space<vmem>>, vector<1x32x96xf32>
    %5 = vector.shape_cast %4 : vector<1x32x96xf32> to vector<32x96xf32>
    %cst = arith.constant dense<0.000000e+00> : vector<16x96xf32>
    %6 = tpu.matmul %3, %5, %cst {dimension_numbers = #tpu.dot_dimension_numbers<[1], [0], [0], [1], [0, 0, 1, 1], [], []>} : vector<16x32xf32>, vector<32x96xf32>, vector<16x96xf32> -> vector<16x96xf32>
    %c0_5 = arith.constant 0 : index
    %c0_6 = arith.constant 0 : index
    %c0_7 = arith.constant 0 : index
    %7 = vector.load %arg6[%c0_5, %c0_6, %c0_7] : memref<1x1x96xf32, #tpu.memory_space<vmem>>, vector<1x1x96xf32>
    %8 = vector.shape_cast %7 : vector<1x1x96xf32> to vector<1x96xf32>
    %9 = vector.broadcast %8 : vector<1x96xf32> to vector<16x96xf32>
    %10 = arith.addf %6, %9 : vector<16x96xf32>
    %11 = vector.extract_strided_slice %10 {offsets = [0, 0], sizes = [8, 8], strides = [1, 1]} : vector<16x96xf32> to vector<8x8xf32>
    %12 = vector.extract_strided_slice %10 {offsets = [0, 32], sizes = [8, 8], strides = [1, 1]} : vector<16x96xf32> to vector<8x8xf32>
    %cst_8 = arith.constant dense<0.000000e+00> : vector<8x8xf32>
    %13 = tpu.matmul %11, %12, %cst_8 {dimension_numbers = #tpu.dot_dimension_numbers<[1], [1], [0], [0], [0, 0, 1, 0], [], []>} : vector<8x8xf32>, vector<8x8xf32>, vector<8x8xf32> -> vector<8x8xf32>
    %cst_9 = arith.constant 0.353553385 : f32
    %14 = vector.broadcast %cst_9 : f32 to vector<8x8xf32>
    %15 = arith.mulf %13, %14 : vector<8x8xf32>
    %cst_10 = arith.constant dense<0xFF800000> : vector<8xf32>
    %16 = vector.multi_reduction <maximumf>, %15, %cst_10 [1] : vector<8x8xf32> to vector<8xf32>
    %17 = vector.shape_cast %16 : vector<8xf32> to vector<8x1xf32>
    %18 = vector.broadcast %17 : vector<8x1xf32> to vector<8x8xf32>
    %19 = arith.subf %15, %18 : vector<8x8xf32>
    %20 = math.exp %19 : vector<8x8xf32>
    %cst_11 = arith.constant dense<0.000000e+00> : vector<8xf32>
    %21 = vector.multi_reduction <add>, %20, %cst_11 [1] : vector<8x8xf32> to vector<8xf32>
    %22 = vector.shape_cast %21 : vector<8xf32> to vector<8x1xf32>
    %23 = vector.broadcast %22 : vector<8x1xf32> to vector<8x8xf32>
    %24 = arith.divf %20, %23 : vector<8x8xf32>
    %25 = vector.extract_strided_slice %10 {offsets = [0, 64], sizes = [8, 8], strides = [1, 1]} : vector<16x96xf32> to vector<8x8xf32>
    %cst_12 = arith.constant dense<0.000000e+00> : vector<8x8xf32>
    %26 = tpu.matmul %24, %25, %cst_12 {dimension_numbers = #tpu.dot_dimension_numbers<[1], [0], [0], [1], [0, 0, 1, 1], [], []>} : vector<8x8xf32>, vector<8x8xf32>, vector<8x8xf32> -> vector<8x8xf32>
    %c0_13 = arith.constant 0 : index
    %c0_14 = arith.constant 0 : index
    %27 = vector.load %arg27[%c0_13, %c0_14] : memref<16x32xf32, #tpu.memory_space<vmem>>, vector<8x8xf32>
    tpu.vector_store %arg27[%c0_13, %c0_14], %26 {strides = array<i32>} : memref<16x32xf32, #tpu.memory_space<vmem>>, vector<8x8xf32>,
    %28 = vector.extract_strided_slice %10 {offsets = [0, 8], sizes = [8, 8], strides = [1, 1]} : vector<16x96xf32> to vector<8x8xf32>
    %29 = vector.extract_strided_slice %10 {offsets = [0, 40], sizes = [8, 8], strides = [1, 1]} : vector<16x96xf32> to vector<8x8xf32>
    %cst_15 = arith.constant dense<0.000000e+00> : vector<8x8xf32>
    %30 = tpu.matmul %28, %29, %cst_15 {dimension_numbers = #tpu.dot_dimension_numbers<[1], [1], [0], [0], [0, 0, 1, 0], [], []>} : vector<8x8xf32>, vector<8x8xf32>, vector<8x8xf32> -> vector<8x8xf32>
    %cst_16 = arith.constant 0.353553385 : f32
    %31 = vector.broadcast %cst_16 : f32 to vector<8x8xf32>
    %32 = arith.mulf %30, %31 : vector<8x8xf32>
    %cst_17 = arith.constant dense<0xFF800000> : vector<8xf32>
    %33 = vector.multi_reduction <maximumf>, %32, %cst_17 [1] : vector<8x8xf32> to vector<8xf32>
    %34 = vector.shape_cast %33 : vector<8xf32> to vector<8x1xf32>
    %35 = vector.broadcast %34 : vector<8x1xf32> to vector<8x8xf32>
    %36 = arith.subf %32, %35 : vector<8x8xf32>
    %37 = math.exp %36 : vector<8x8xf32>
    %cst_18 = arith.constant dense<0.000000e+00> : vector<8xf32>
    %38 = vector.multi_reduction <add>, %37, %cst_18 [1] : vector<8x8xf32> to vector<8xf32>
    %39 = vector.shape_cast %38 : vector<8xf32> to vector<8x1xf32>
    %40 = vector.broadcast %39 : vector<8x1xf32> to vector<8x8xf32>
    %41 = arith.divf %37, %40 : vector<8x8xf32>
    %42 = vector.extract_strided_slice %10 {offsets = [0, 72], sizes = [8, 8], strides = [1, 1]} : vector<16x96xf32> to vector<8x8xf32>
    %cst_19 = arith.constant dense<0.000000e+00> : vector<8x8xf32>
    %43 = tpu.matmul %41, %42, %cst_19 {dimension_numbers = #tpu.dot_dimension_numbers<[1], [0], [0], [1], [0, 0, 1, 1], [], []>} : vector<8x8xf32>, vector<8x8xf32>, vector<8x8xf32> -> vector<8x8xf32>
    %c0_20 = arith.constant 0 : index
    %c8 = arith.constant 8 : index
    %44 = vector.load %arg27[%c0_20, %c8] : memref<16x32xf32, #tpu.memory_space<vmem>>, vector<8x8xf32>
    tpu.vector_store %arg27[%c0_20, %c8], %43 {strides = array<i32>} : memref<16x32xf32, #tpu.memory_space<vmem>>, vector<8x8xf32>,
    %45 = vector.extract_strided_slice %10 {offsets = [0, 16], sizes = [8, 8], strides = [1, 1]} : vector<16x96xf32> to vector<8x8xf32>
    %46 = vector.extract_strided_slice %10 {offsets = [0, 48], sizes = [8, 8], strides = [1, 1]} : vector<16x96xf32> to vector<8x8xf32>
    %cst_21 = arith.constant dense<0.000000e+00> : vector<8x8xf32>
    %47 = tpu.matmul %45, %46, %cst_21 {dimension_numbers = #tpu.dot_dimension_numbers<[1], [1], [0], [0], [0, 0, 1, 0], [], []>} : vector<8x8xf32>, vector<8x8xf32>, vector<8x8xf32> -> vector<8x8xf32>
    %cst_22 = arith.constant 0.353553385 : f32
    %48 = vector.broadcast %cst_22 : f32 to vector<8x8xf32>
    %49 = arith.mulf %47, %48 : vector<8x8xf32>
    %cst_23 = arith.constant dense<0xFF800000> : vector<8xf32>
    %50 = vector.multi_reduction <maximumf>, %49, %cst_23 [1] : vector<8x8xf32> to vector<8xf32>
    %51 = vector.shape_cast %50 : vector<8xf32> to vector<8x1xf32>
    %52 = vector.broadcast %51 : vector<8x1xf32> to vector<8x8xf32>
    %53 = arith.subf %49, %52 : vector<8x8xf32>
    %54 = math.exp %53 : vector<8x8xf32>
    %cst_24 = arith.constant dense<0.000000e+00> : vector<8xf32>
    %55 = vector.multi_reduction <add>, %54, %cst_24 [1] : vector<8x8xf32> to vector<8xf32>
    %56 = vector.shape_cast %55 : vector<8xf32> to vector<8x1xf32>
    %57 = vector.broadcast %56 : vector<8x1xf32> to vector<8x8xf32>
    %58 = arith.divf %54, %57 : vector<8x8xf32>
    %59 = vector.extract_strided_slice %10 {offsets = [0, 80], sizes = [8, 8], strides = [1, 1]} : vector<16x96xf32> to vector<8x8xf32>
    %cst_25 = arith.constant dense<0.000000e+00> : vector<8x8xf32>
    %60 = tpu.matmul %58, %59, %cst_25 {dimension_numbers = #tpu.dot_dimension_numbers<[1], [0], [0], [1], [0, 0, 1, 1], [], []>} : vector<8x8xf32>, vector<8x8xf32>, vector<8x8xf32> -> vector<8x8xf32>
    %c0_26 = arith.constant 0 : index
    %c16 = arith.constant 16 : index
    %61 = vector.load %arg27[%c0_26, %c16] : memref<16x32xf32, #tpu.memory_space<vmem>>, vector<8x8xf32>
    tpu.vector_store %arg27[%c0_26, %c16], %60 {strides = array<i32>} : memref<16x32xf32, #tpu.memory_space<vmem>>, vector<8x8xf32>,
    %62 = vector.extract_strided_slice %10 {offsets = [0, 24], sizes = [8, 8], strides = [1, 1]} : vector<16x96xf32> to vector<8x8xf32>
    %63 = vector.extract_strided_slice %10 {offsets = [0, 56], sizes = [8, 8], strides = [1, 1]} : vector<16x96xf32> to vector<8x8xf32>
    %cst_27 = arith.constant dense<0.000000e+00> : vector<8x8xf32>
    %64 = tpu.matmul %62, %63, %cst_27 {dimension_numbers = #tpu.dot_dimension_numbers<[1], [1], [0], [0], [0, 0, 1, 0], [], []>} : vector<8x8xf32>, vector<8x8xf32>, vector<8x8xf32> -> vector<8x8xf32>
    %cst_28 = arith.constant 0.353553385 : f32
    %65 = vector.broadcast %cst_28 : f32 to vector<8x8xf32>
    %66 = arith.mulf %64, %65 : vector<8x8xf32>
    %cst_29 = arith.constant dense<0xFF800000> : vector<8xf32>
    %67 = vector.multi_reduction <maximumf>, %66, %cst_29 [1] : vector<8x8xf32> to vector<8xf32>
    %68 = vector.shape_cast %67 : vector<8xf32> to vector<8x1xf32>
    %69 = vector.broadcast %68 : vector<8x1xf32> to vector<8x8xf32>
    %70 = arith.subf %66, %69 : vector<8x8xf32>
    %71 = math.exp %70 : vector<8x8xf32>
    %cst_30 = arith.constant dense<0.000000e+00> : vector<8xf32>
    %72 = vector.multi_reduction <add>, %71, %cst_30 [1] : vector<8x8xf32> to vector<8xf32>
    %73 = vector.shape_cast %72 : vector<8xf32> to vector<8x1xf32>
    %74 = vector.broadcast %73 : vector<8x1xf32> to vector<8x8xf32>
    %75 = arith.divf %71, %74 : vector<8x8xf32>
    %76 = vector.extract_strided_slice %10 {offsets = [0, 88], sizes = [8, 8], strides = [1, 1]} : vector<16x96xf32> to vector<8x8xf32>
    %cst_31 = arith.constant dense<0.000000e+00> : vector<8x8xf32>
    %77 = tpu.matmul %75, %76, %cst_31 {dimension_numbers = #tpu.dot_dimension_numbers<[1], [0], [0], [1], [0, 0, 1, 1], [], []>} : vector<8x8xf32>, vector<8x8xf32>, vector<8x8xf32> -> vector<8x8xf32>
    %c0_32 = arith.constant 0 : index
    %c24 = arith.constant 24 : index
    %78 = vector.load %arg27[%c0_32, %c24] : memref<16x32xf32, #tpu.memory_space<vmem>>, vector<8x8xf32>
    tpu.vector_store %arg27[%c0_32, %c24], %77 {strides = array<i32>} : memref<16x32xf32, #tpu.memory_space<vmem>>, vector<8x8xf32>,
    %79 = vector.extract_strided_slice %10 {offsets = [8, 0], sizes = [8, 8], strides = [1, 1]} : vector<16x96xf32> to vector<8x8xf32>
    %80 = vector.extract_strided_slice %10 {offsets = [8, 32], sizes = [8, 8], strides = [1, 1]} : vector<16x96xf32> to vector<8x8xf32>
    %cst_33 = arith.constant dense<0.000000e+00> : vector<8x8xf32>
    %81 = tpu.matmul %79, %80, %cst_33 {dimension_numbers = #tpu.dot_dimension_numbers<[1], [1], [0], [0], [0, 0, 1, 0], [], []>} : vector<8x8xf32>, vector<8x8xf32>, vector<8x8xf32> -> vector<8x8xf32>
    %cst_34 = arith.constant 0.353553385 : f32
    %82 = vector.broadcast %cst_34 : f32 to vector<8x8xf32>
    %83 = arith.mulf %81, %82 : vector<8x8xf32>
    %cst_35 = arith.constant dense<0xFF800000> : vector<8xf32>
    %84 = vector.multi_reduction <maximumf>, %83, %cst_35 [1] : vector<8x8xf32> to vector<8xf32>
    %85 = vector.shape_cast %84 : vector<8xf32> to vector<8x1xf32>
    %86 = vector.broadcast %85 : vector<8x1xf32> to vector<8x8xf32>
    %87 = arith.subf %83, %86 : vector<8x8xf32>
    %88 = math.exp %87 : vector<8x8xf32>
    %cst_36 = arith.constant dense<0.000000e+00> : vector<8xf32>
    %89 = vector.multi_reduction <add>, %88, %cst_36 [1] : vector<8x8xf32> to vector<8xf32>
    %90 = vector.shape_cast %89 : vector<8xf32> to vector<8x1xf32>
    %91 = vector.broadcast %90 : vector<8x1xf32> to vector<8x8xf32>
    %92 = arith.divf %88, %91 : vector<8x8xf32>
    %93 = vector.extract_strided_slice %10 {offsets = [8, 64], sizes = [8, 8], strides = [1, 1]} : vector<16x96xf32> to vector<8x8xf32>
    %cst_37 = arith.constant dense<0.000000e+00> : vector<8x8xf32>
    %94 = tpu.matmul %92, %93, %cst_37 {dimension_numbers = #tpu.dot_dimension_numbers<[1], [0], [0], [1], [0, 0, 1, 1], [], []>} : vector<8x8xf32>, vector<8x8xf32>, vector<8x8xf32> -> vector<8x8xf32>
    %c8_38 = arith.constant 8 : index
    %c0_39 = arith.constant 0 : index
    %95 = vector.load %arg27[%c8_38, %c0_39] : memref<16x32xf32, #tpu.memory_space<vmem>>, vector<8x8xf32>
    tpu.vector_store %arg27[%c8_38, %c0_39], %94 {strides = array<i32>} : memref<16x32xf32, #tpu.memory_space<vmem>>, vector<8x8xf32>,
    %96 = vector.extract_strided_slice %10 {offsets = [8, 8], sizes = [8, 8], strides = [1, 1]} : vector<16x96xf32> to vector<8x8xf32>
    %97 = vector.extract_strided_slice %10 {offsets = [8, 40], sizes = [8, 8], strides = [1, 1]} : vector<16x96xf32> to vector<8x8xf32>
    %cst_40 = arith.constant dense<0.000000e+00> : vector<8x8xf32>
    %98 = tpu.matmul %96, %97, %cst_40 {dimension_numbers = #tpu.dot_dimension_numbers<[1], [1], [0], [0], [0, 0, 1, 0], [], []>} : vector<8x8xf32>, vector<8x8xf32>, vector<8x8xf32> -> vector<8x8xf32>
    %cst_41 = arith.constant 0.353553385 : f32
    %99 = vector.broadcast %cst_41 : f32 to vector<8x8xf32>
    %100 = arith.mulf %98, %99 : vector<8x8xf32>
    %cst_42 = arith.constant dense<0xFF800000> : vector<8xf32>
    %101 = vector.multi_reduction <maximumf>, %100, %cst_42 [1] : vector<8x8xf32> to vector<8xf32>
    %102 = vector.shape_cast %101 : vector<8xf32> to vector<8x1xf32>
    %103 = vector.broadcast %102 : vector<8x1xf32> to vector<8x8xf32>
    %104 = arith.subf %100, %103 : vector<8x8xf32>
    %105 = math.exp %104 : vector<8x8xf32>
    %cst_43 = arith.constant dense<0.000000e+00> : vector<8xf32>
    %106 = vector.multi_reduction <add>, %105, %cst_43 [1] : vector<8x8xf32> to vector<8xf32>
    %107 = vector.shape_cast %106 : vector<8xf32> to vector<8x1xf32>
    %108 = vector.broadcast %107 : vector<8x1xf32> to vector<8x8xf32>
    %109 = arith.divf %105, %108 : vector<8x8xf32>
    %110 = vector.extract_strided_slice %10 {offsets = [8, 72], sizes = [8, 8], strides = [1, 1]} : vector<16x96xf32> to vector<8x8xf32>
    %cst_44 = arith.constant dense<0.000000e+00> : vector<8x8xf32>
    %111 = tpu.matmul %109, %110, %cst_44 {dimension_numbers = #tpu.dot_dimension_numbers<[1], [0], [0], [1], [0, 0, 1, 1], [], []>} : vector<8x8xf32>, vector<8x8xf32>, vector<8x8xf32> -> vector<8x8xf32>
    %c8_45 = arith.constant 8 : index
    %c8_46 = arith.constant 8 : index
    %112 = vector.load %arg27[%c8_45, %c8_46] : memref<16x32xf32, #tpu.memory_space<vmem>>, vector<8x8xf32>
    tpu.vector_store %arg27[%c8_45, %c8_46], %111 {strides = array<i32>} : memref<16x32xf32, #tpu.memory_space<vmem>>, vector<8x8xf32>,
    %113 = vector.extract_strided_slice %10 {offsets = [8, 16], sizes = [8, 8], strides = [1, 1]} : vector<16x96xf32> to vector<8x8xf32>
    %114 = vector.extract_strided_slice %10 {offsets = [8, 48], sizes = [8, 8], strides = [1, 1]} : vector<16x96xf32> to vector<8x8xf32>
    %cst_47 = arith.constant dense<0.000000e+00> : vector<8x8xf32>
    %115 = tpu.matmul %113, %114, %cst_47 {dimension_numbers = #tpu.dot_dimension_numbers<[1], [1], [0], [0], [0, 0, 1, 0], [], []>} : vector<8x8xf32>, vector<8x8xf32>, vector<8x8xf32> -> vector<8x8xf32>
    %cst_48 = arith.constant 0.353553385 : f32
    %116 = vector.broadcast %cst_48 : f32 to vector<8x8xf32>
    %117 = arith.mulf %115, %116 : vector<8x8xf32>
    %cst_49 = arith.constant dense<0xFF800000> : vector<8xf32>
    %118 = vector.multi_reduction <maximumf>, %117, %cst_49 [1] : vector<8x8xf32> to vector<8xf32>
    %119 = vector.shape_cast %118 : vector<8xf32> to vector<8x1xf32>
    %120 = vector.broadcast %119 : vector<8x1xf32> to vector<8x8xf32>
    %121 = arith.subf %117, %120 : vector<8x8xf32>
    %122 = math.exp %121 : vector<8x8xf32>
    %cst_50 = arith.constant dense<0.000000e+00> : vector<8xf32>
    %123 = vector.multi_reduction <add>, %122, %cst_50 [1] : vector<8x8xf32> to vector<8xf32>
    %124 = vector.shape_cast %123 : vector<8xf32> to vector<8x1xf32>
    %125 = vector.broadcast %124 : vector<8x1xf32> to vector<8x8xf32>
    %126 = arith.divf %122, %125 : vector<8x8xf32>
    %127 = vector.extract_strided_slice %10 {offsets = [8, 80], sizes = [8, 8], strides = [1, 1]} : vector<16x96xf32> to vector<8x8xf32>
    %cst_51 = arith.constant dense<0.000000e+00> : vector<8x8xf32>
    %128 = tpu.matmul %126, %127, %cst_51 {dimension_numbers = #tpu.dot_dimension_numbers<[1], [0], [0], [1], [0, 0, 1, 1], [], []>} : vector<8x8xf32>, vector<8x8xf32>, vector<8x8xf32> -> vector<8x8xf32>
    %c8_52 = arith.constant 8 : index
    %c16_53 = arith.constant 16 : index
    %129 = vector.load %arg27[%c8_52, %c16_53] : memref<16x32xf32, #tpu.memory_space<vmem>>, vector<8x8xf32>
    tpu.vector_store %arg27[%c8_52, %c16_53], %128 {strides = array<i32>} : memref<16x32xf32, #tpu.memory_space<vmem>>, vector<8x8xf32>,
    %130 = vector.extract_strided_slice %10 {offsets = [8, 24], sizes = [8, 8], strides = [1, 1]} : vector<16x96xf32> to vector<8x8xf32>
    %131 = vector.extract_strided_slice %10 {offsets = [8, 56], sizes = [8, 8], strides = [1, 1]} : vector<16x96xf32> to vector<8x8xf32>
    %cst_54 = arith.constant dense<0.000000e+00> : vector<8x8xf32>
    %132 = tpu.matmul %130, %131, %cst_54 {dimension_numbers = #tpu.dot_dimension_numbers<[1], [1], [0], [0], [0, 0, 1, 0], [], []>} : vector<8x8xf32>, vector<8x8xf32>, vector<8x8xf32> -> vector<8x8xf32>
    %cst_55 = arith.constant 0.353553385 : f32
    %133 = vector.broadcast %cst_55 : f32 to vector<8x8xf32>
    %134 = arith.mulf %132, %133 : vector<8x8xf32>
    %cst_56 = arith.constant dense<0xFF800000> : vector<8xf32>
    %135 = vector.multi_reduction <maximumf>, %134, %cst_56 [1] : vector<8x8xf32> to vector<8xf32>
    %136 = vector.shape_cast %135 : vector<8xf32> to vector<8x1xf32>
    %137 = vector.broadcast %136 : vector<8x1xf32> to vector<8x8xf32>
    %138 = arith.subf %134, %137 : vector<8x8xf32>
    %139 = math.exp %138 : vector<8x8xf32>
    %cst_57 = arith.constant dense<0.000000e+00> : vector<8xf32>
    %140 = vector.multi_reduction <add>, %139, %cst_57 [1] : vector<8x8xf32> to vector<8xf32>
    %141 = vector.shape_cast %140 : vector<8xf32> to vector<8x1xf32>
    %142 = vector.broadcast %141 : vector<8x1xf32> to vector<8x8xf32>
    %143 = arith.divf %139, %142 : vector<8x8xf32>
    %144 = vector.extract_strided_slice %10 {offsets = [8, 88], sizes = [8, 8], strides = [1, 1]} : vector<16x96xf32> to vector<8x8xf32>
    %cst_58 = arith.constant dense<0.000000e+00> : vector<8x8xf32>
    %145 = tpu.matmul %143, %144, %cst_58 {dimension_numbers = #tpu.dot_dimension_numbers<[1], [0], [0], [1], [0, 0, 1, 1], [], []>} : vector<8x8xf32>, vector<8x8xf32>, vector<8x8xf32> -> vector<8x8xf32>
    %c8_59 = arith.constant 8 : index
    %c24_60 = arith.constant 24 : index
    %146 = vector.load %arg27[%c8_59, %c24_60] : memref<16x32xf32, #tpu.memory_space<vmem>>, vector<8x8xf32>
    tpu.vector_store %arg27[%c8_59, %c24_60], %145 {strides = array<i32>} : memref<16x32xf32, #tpu.memory_space<vmem>>, vector<8x8xf32>,
    %c0_61 = arith.constant 0 : index
    %c0_62 = arith.constant 0 : index
    %147 = vector.load %arg27[%c0_61, %c0_62] : memref<16x32xf32, #tpu.memory_space<vmem>>, vector<16x32xf32>
    %c0_63 = arith.constant 0 : index
    %c0_64 = arith.constant 0 : index
    %c0_65 = arith.constant 0 : index
    %148 = vector.load %arg7[%c0_63, %c0_64, %c0_65] : memref<1x32x32xf32, #tpu.memory_space<vmem>>, vector<1x32x32xf32>
    %149 = vector.shape_cast %148 : vector<1x32x32xf32> to vector<32x32xf32>
    %cst_66 = arith.constant dense<0.000000e+00> : vector<16x32xf32>
    %150 = tpu.matmul %147, %149, %cst_66 {dimension_numbers = #tpu.dot_dimension_numbers<[1], [0], [0], [1], [0, 0, 1, 1], [], []>} : vector<16x32xf32>, vector<32x32xf32>, vector<16x32xf32> -> vector<16x32xf32>
    %c0_67 = arith.constant 0 : index
    %c0_68 = arith.constant 0 : index
    %c0_69 = arith.constant 0 : index
    %151 = vector.load %arg8[%c0_67, %c0_68, %c0_69] : memref<1x1x32xf32, #tpu.memory_space<vmem>>, vector<1x1x32xf32>
    %152 = vector.shape_cast %151 : vector<1x1x32xf32> to vector<1x32xf32>
    %153 = vector.broadcast %152 : vector<1x32xf32> to vector<16x32xf32>
    %154 = arith.addf %150, %153 : vector<16x32xf32>
    %155 = arith.addf %3, %154 : vector<16x32xf32>
    %c0_70 = arith.constant 0 : index
    %c0_71 = arith.constant 0 : index
    %c0_72 = arith.constant 0 : index
    %156 = vector.load %arg9[%c0_70, %c0_71, %c0_72] : memref<1x1x32xf32, #tpu.memory_space<vmem>>, vector<1x1x32xf32>
    %157 = vector.shape_cast %156 : vector<1x1x32xf32> to vector<1x32xf32>
    %c0_73 = arith.constant 0 : index
    %c0_74 = arith.constant 0 : index
    %c0_75 = arith.constant 0 : index
    %158 = vector.load %arg10[%c0_73, %c0_74, %c0_75] : memref<1x1x32xf32, #tpu.memory_space<vmem>>, vector<1x1x32xf32>
    %159 = vector.shape_cast %158 : vector<1x1x32xf32> to vector<1x32xf32>
    %cst_76 = arith.constant dense<0.000000e+00> : vector<16xf32>
    %160 = vector.multi_reduction <add>, %155, %cst_76 [1] : vector<16x32xf32> to vector<16xf32>
    %161 = vector.shape_cast %160 : vector<16xf32> to vector<16x1xf32>
    %cst_77 = arith.constant 3.200000e+01 : f32
    %162 = vector.broadcast %cst_77 : f32 to vector<16x1xf32>
    %163 = arith.divf %161, %162 : vector<16x1xf32>
    %164 = vector.broadcast %163 : vector<16x1xf32> to vector<16x32xf32>
    %165 = arith.subf %155, %164 : vector<16x32xf32>
    %166 = arith.mulf %165, %165 : vector<16x32xf32>
    %cst_78 = arith.constant dense<0.000000e+00> : vector<16xf32>
    %167 = vector.multi_reduction <add>, %166, %cst_78 [1] : vector<16x32xf32> to vector<16xf32>
    %168 = vector.shape_cast %167 : vector<16xf32> to vector<16x1xf32>
    %cst_79 = arith.constant 3.200000e+01 : f32
    %169 = vector.broadcast %cst_79 : f32 to vector<16x1xf32>
    %170 = arith.divf %168, %169 : vector<16x1xf32>
    %171 = vector.broadcast %163 : vector<16x1xf32> to vector<16x32xf32>
    %172 = arith.subf %155, %171 : vector<16x32xf32>
    %cst_80 = arith.constant 9.99999996E-13 : f32
    %173 = vector.broadcast %cst_80 : f32 to vector<16x1xf32>
    %174 = arith.addf %170, %173 : vector<16x1xf32>
    %175 = math.rsqrt %174 : vector<16x1xf32>
    %176 = vector.broadcast %175 : vector<16x1xf32> to vector<16x32xf32>
    %177 = arith.mulf %172, %176 : vector<16x32xf32>
    %178 = vector.broadcast %157 : vector<1x32xf32> to vector<16x32xf32>
    %179 = arith.mulf %177, %178 : vector<16x32xf32>
    %180 = vector.broadcast %159 : vector<1x32xf32> to vector<16x32xf32>
    %181 = arith.addf %179, %180 : vector<16x32xf32>
    %c0_81 = arith.constant 0 : index
    %c0_82 = arith.constant 0 : index
    %c0_83 = arith.constant 0 : index
    %182 = vector.load %arg11[%c0_81, %c0_82, %c0_83] : memref<1x32x32xf32, #tpu.memory_space<vmem>>, vector<1x32x32xf32>
    %183 = vector.shape_cast %182 : vector<1x32x32xf32> to vector<32x32xf32>
    %cst_84 = arith.constant dense<0.000000e+00> : vector<16x32xf32>
    %184 = tpu.matmul %181, %183, %cst_84 {dimension_numbers = #tpu.dot_dimension_numbers<[1], [0], [0], [1], [0, 0, 1, 1], [], []>} : vector<16x32xf32>, vector<32x32xf32>, vector<16x32xf32> -> vector<16x32xf32>
    %c0_85 = arith.constant 0 : index
    %c0_86 = arith.constant 0 : index
    %c0_87 = arith.constant 0 : index
    %185 = vector.load %arg12[%c0_85, %c0_86, %c0_87] : memref<1x1x32xf32, #tpu.memory_space<vmem>>, vector<1x1x32xf32>
    %186 = vector.shape_cast %185 : vector<1x1x32xf32> to vector<1x32xf32>
    %187 = vector.broadcast %186 : vector<1x32xf32> to vector<16x32xf32>
    %188 = arith.addf %184, %187 : vector<16x32xf32>
    %c0_88 = arith.constant 0 : index
    %c0_89 = arith.constant 0 : index
    %189 = vector.load %arg4[%c0_88, %c0_89] : memref<32x32xf32, #tpu.memory_space<vmem>>, vector<32x32xf32>
    %c0_90 = arith.constant 0 : index
    %c0_91 = arith.constant 0 : index
    %c0_92 = arith.constant 0 : index
    %190 = vector.load %arg13[%c0_90, %c0_91, %c0_92] : memref<1x32x64xf32, #tpu.memory_space<vmem>>, vector<1x32x64xf32>
    %191 = vector.shape_cast %190 : vector<1x32x64xf32> to vector<32x64xf32>
    %cst_93 = arith.constant dense<0.000000e+00> : vector<32x64xf32>
    %192 = tpu.matmul %189, %191, %cst_93 {dimension_numbers = #tpu.dot_dimension_numbers<[1], [0], [0], [1], [0, 0, 1, 1], [], []>} : vector<32x32xf32>, vector<32x64xf32>, vector<32x64xf32> -> vector<32x64xf32>
    %c0_94 = arith.constant 0 : index
    %c0_95 = arith.constant 0 : index
    %c0_96 = arith.constant 0 : index
    %193 = vector.load %arg14[%c0_94, %c0_95, %c0_96] : memref<1x1x64xf32, #tpu.memory_space<vmem>>, vector<1x1x64xf32>
    %194 = vector.shape_cast %193 : vector<1x1x64xf32> to vector<1x64xf32>
    %195 = vector.broadcast %194 : vector<1x64xf32> to vector<32x64xf32>
    %196 = arith.addf %192, %195 : vector<32x64xf32>
    %197 = vector.extract_strided_slice %188 {offsets = [0, 0], sizes = [8, 8], strides = [1, 1]} : vector<16x32xf32> to vector<8x8xf32>
    %198 = vector.extract_strided_slice %196 {offsets = [0, 0], sizes = [16, 8], strides = [1, 1]} : vector<32x64xf32> to vector<16x8xf32>
    %cst_97 = arith.constant dense<0.000000e+00> : vector<8x16xf32>
    %199 = tpu.matmul %197, %198, %cst_97 {dimension_numbers = #tpu.dot_dimension_numbers<[1], [1], [0], [0], [0, 0, 1, 0], [], []>} : vector<8x8xf32>, vector<16x8xf32>, vector<8x16xf32> -> vector<8x16xf32>
    %cst_98 = arith.constant 0.353553385 : f32
    %200 = vector.broadcast %cst_98 : f32 to vector<8x16xf32>
    %201 = arith.mulf %199, %200 : vector<8x16xf32>
    %cst_99 = arith.constant dense<0xFF800000> : vector<8xf32>
    %202 = vector.multi_reduction <maximumf>, %201, %cst_99 [1] : vector<8x16xf32> to vector<8xf32>
    %203 = vector.shape_cast %202 : vector<8xf32> to vector<8x1xf32>
    %204 = vector.broadcast %203 : vector<8x1xf32> to vector<8x16xf32>
    %205 = arith.subf %201, %204 : vector<8x16xf32>
    %206 = math.exp %205 : vector<8x16xf32>
    %cst_100 = arith.constant dense<0.000000e+00> : vector<8xf32>
    %207 = vector.multi_reduction <add>, %206, %cst_100 [1] : vector<8x16xf32> to vector<8xf32>
    %208 = vector.shape_cast %207 : vector<8xf32> to vector<8x1xf32>
    %209 = vector.broadcast %208 : vector<8x1xf32> to vector<8x16xf32>
    %210 = arith.divf %206, %209 : vector<8x16xf32>
    %c0_101 = arith.constant 0 : index
    %c0_102 = arith.constant 0 : index
    %c0_103 = arith.constant 0 : index
    %c0_104 = arith.constant 0 : index
    %c0_105 = arith.constant 0 : index
    %211 = vector.load %arg26[%c0_101, %c0_102, %c0_103, %c0_104, %c0_105] : memref<1x2x4x8x16xf32, #tpu.memory_space<vmem>>, vector<1x1x1x8x16xf32>
    %212 = vector.shape_cast %211 : vector<1x1x1x8x16xf32> to vector<8x16xf32>
    %213 = vector.shape_cast %210 : vector<8x16xf32> to vector<1x1x1x8x16xf32>
    tpu.vector_store %arg26[%c0_101, %c0_102, %c0_103, %c0_104, %c0_105], %213 {strides = array<i32>} : memref<1x2x4x8x16xf32, #tpu.memory_space<vmem>>, vector<1x1x1x8x16xf32>,
    %214 = vector.extract_strided_slice %196 {offsets = [0, 32], sizes = [16, 8], strides = [1, 1]} : vector<32x64xf32> to vector<16x8xf32>
    %cst_106 = arith.constant dense<0.000000e+00> : vector<8x8xf32>
    %215 = tpu.matmul %210, %214, %cst_106 {dimension_numbers = #tpu.dot_dimension_numbers<[1], [0], [0], [1], [0, 0, 1, 1], [], []>} : vector<8x16xf32>, vector<16x8xf32>, vector<8x8xf32> -> vector<8x8xf32>
    %c0_107 = arith.constant 0 : index
    %c0_108 = arith.constant 0 : index
    %216 = vector.load %arg27[%c0_107, %c0_108] : memref<16x32xf32, #tpu.memory_space<vmem>>, vector<8x8xf32>
    tpu.vector_store %arg27[%c0_107, %c0_108], %215 {strides = array<i32>} : memref<16x32xf32, #tpu.memory_space<vmem>>, vector<8x8xf32>,
    %217 = vector.extract_strided_slice %188 {offsets = [0, 8], sizes = [8, 8], strides = [1, 1]} : vector<16x32xf32> to vector<8x8xf32>
    %218 = vector.extract_strided_slice %196 {offsets = [0, 8], sizes = [16, 8], strides = [1, 1]} : vector<32x64xf32> to vector<16x8xf32>
    %cst_109 = arith.constant dense<0.000000e+00> : vector<8x16xf32>
    %219 = tpu.matmul %217, %218, %cst_109 {dimension_numbers = #tpu.dot_dimension_numbers<[1], [1], [0], [0], [0, 0, 1, 0], [], []>} : vector<8x8xf32>, vector<16x8xf32>, vector<8x16xf32> -> vector<8x16xf32>
    %cst_110 = arith.constant 0.353553385 : f32
    %220 = vector.broadcast %cst_110 : f32 to vector<8x16xf32>
    %221 = arith.mulf %219, %220 : vector<8x16xf32>
    %cst_111 = arith.constant dense<0xFF800000> : vector<8xf32>
    %222 = vector.multi_reduction <maximumf>, %221, %cst_111 [1] : vector<8x16xf32> to vector<8xf32>
    %223 = vector.shape_cast %222 : vector<8xf32> to vector<8x1xf32>
    %224 = vector.broadcast %223 : vector<8x1xf32> to vector<8x16xf32>
    %225 = arith.subf %221, %224 : vector<8x16xf32>
    %226 = math.exp %225 : vector<8x16xf32>
    %cst_112 = arith.constant dense<0.000000e+00> : vector<8xf32>
    %227 = vector.multi_reduction <add>, %226, %cst_112 [1] : vector<8x16xf32> to vector<8xf32>
    %228 = vector.shape_cast %227 : vector<8xf32> to vector<8x1xf32>
    %229 = vector.broadcast %228 : vector<8x1xf32> to vector<8x16xf32>
    %230 = arith.divf %226, %229 : vector<8x16xf32>
    %c0_113 = arith.constant 0 : index
    %c0_114 = arith.constant 0 : index
    %c1 = arith.constant 1 : index
    %c0_115 = arith.constant 0 : index
    %c0_116 = arith.constant 0 : index
    %231 = vector.load %arg26[%c0_113, %c0_114, %c1, %c0_115, %c0_116] : memref<1x2x4x8x16xf32, #tpu.memory_space<vmem>>, vector<1x1x1x8x16xf32>
    %232 = vector.shape_cast %231 : vector<1x1x1x8x16xf32> to vector<8x16xf32>
    %233 = vector.shape_cast %230 : vector<8x16xf32> to vector<1x1x1x8x16xf32>
    tpu.vector_store %arg26[%c0_113, %c0_114, %c1, %c0_115, %c0_116], %233 {strides = array<i32>} : memref<1x2x4x8x16xf32, #tpu.memory_space<vmem>>, vector<1x1x1x8x16xf32>,
    %234 = vector.extract_strided_slice %196 {offsets = [0, 40], sizes = [16, 8], strides = [1, 1]} : vector<32x64xf32> to vector<16x8xf32>
    %cst_117 = arith.constant dense<0.000000e+00> : vector<8x8xf32>
    %235 = tpu.matmul %230, %234, %cst_117 {dimension_numbers = #tpu.dot_dimension_numbers<[1], [0], [0], [1], [0, 0, 1, 1], [], []>} : vector<8x16xf32>, vector<16x8xf32>, vector<8x8xf32> -> vector<8x8xf32>
    %c0_118 = arith.constant 0 : index
    %c8_119 = arith.constant 8 : index
    %236 = vector.load %arg27[%c0_118, %c8_119] : memref<16x32xf32, #tpu.memory_space<vmem>>, vector<8x8xf32>
    tpu.vector_store %arg27[%c0_118, %c8_119], %235 {strides = array<i32>} : memref<16x32xf32, #tpu.memory_space<vmem>>, vector<8x8xf32>,
    %237 = vector.extract_strided_slice %188 {offsets = [0, 16], sizes = [8, 8], strides = [1, 1]} : vector<16x32xf32> to vector<8x8xf32>
    %238 = vector.extract_strided_slice %196 {offsets = [0, 16], sizes = [16, 8], strides = [1, 1]} : vector<32x64xf32> to vector<16x8xf32>
    %cst_120 = arith.constant dense<0.000000e+00> : vector<8x16xf32>
    %239 = tpu.matmul %237, %238, %cst_120 {dimension_numbers = #tpu.dot_dimension_numbers<[1], [1], [0], [0], [0, 0, 1, 0], [], []>} : vector<8x8xf32>, vector<16x8xf32>, vector<8x16xf32> -> vector<8x16xf32>
    %cst_121 = arith.constant 0.353553385 : f32
    %240 = vector.broadcast %cst_121 : f32 to vector<8x16xf32>
    %241 = arith.mulf %239, %240 : vector<8x16xf32>
    %cst_122 = arith.constant dense<0xFF800000> : vector<8xf32>
    %242 = vector.multi_reduction <maximumf>, %241, %cst_122 [1] : vector<8x16xf32> to vector<8xf32>
    %243 = vector.shape_cast %242 : vector<8xf32> to vector<8x1xf32>
    %244 = vector.broadcast %243 : vector<8x1xf32> to vector<8x16xf32>
    %245 = arith.subf %241, %244 : vector<8x16xf32>
    %246 = math.exp %245 : vector<8x16xf32>
    %cst_123 = arith.constant dense<0.000000e+00> : vector<8xf32>
    %247 = vector.multi_reduction <add>, %246, %cst_123 [1] : vector<8x16xf32> to vector<8xf32>
    %248 = vector.shape_cast %247 : vector<8xf32> to vector<8x1xf32>
    %249 = vector.broadcast %248 : vector<8x1xf32> to vector<8x16xf32>
    %250 = arith.divf %246, %249 : vector<8x16xf32>
    %c0_124 = arith.constant 0 : index
    %c0_125 = arith.constant 0 : index
    %c2 = arith.constant 2 : index
    %c0_126 = arith.constant 0 : index
    %c0_127 = arith.constant 0 : index
    %251 = vector.load %arg26[%c0_124, %c0_125, %c2, %c0_126, %c0_127] : memref<1x2x4x8x16xf32, #tpu.memory_space<vmem>>, vector<1x1x1x8x16xf32>
    %252 = vector.shape_cast %251 : vector<1x1x1x8x16xf32> to vector<8x16xf32>
    %253 = vector.shape_cast %250 : vector<8x16xf32> to vector<1x1x1x8x16xf32>
    tpu.vector_store %arg26[%c0_124, %c0_125, %c2, %c0_126, %c0_127], %253 {strides = array<i32>} : memref<1x2x4x8x16xf32, #tpu.memory_space<vmem>>, vector<1x1x1x8x16xf32>,
    %254 = vector.extract_strided_slice %196 {offsets = [0, 48], sizes = [16, 8], strides = [1, 1]} : vector<32x64xf32> to vector<16x8xf32>
    %cst_128 = arith.constant dense<0.000000e+00> : vector<8x8xf32>
    %255 = tpu.matmul %250, %254, %cst_128 {dimension_numbers = #tpu.dot_dimension_numbers<[1], [0], [0], [1], [0, 0, 1, 1], [], []>} : vector<8x16xf32>, vector<16x8xf32>, vector<8x8xf32> -> vector<8x8xf32>
    %c0_129 = arith.constant 0 : index
    %c16_130 = arith.constant 16 : index
    %256 = vector.load %arg27[%c0_129, %c16_130] : memref<16x32xf32, #tpu.memory_space<vmem>>, vector<8x8xf32>
    tpu.vector_store %arg27[%c0_129, %c16_130], %255 {strides = array<i32>} : memref<16x32xf32, #tpu.memory_space<vmem>>, vector<8x8xf32>,
    %257 = vector.extract_strided_slice %188 {offsets = [0, 24], sizes = [8, 8], strides = [1, 1]} : vector<16x32xf32> to vector<8x8xf32>
    %258 = vector.extract_strided_slice %196 {offsets = [0, 24], sizes = [16, 8], strides = [1, 1]} : vector<32x64xf32> to vector<16x8xf32>
    %cst_131 = arith.constant dense<0.000000e+00> : vector<8x16xf32>
    %259 = tpu.matmul %257, %258, %cst_131 {dimension_numbers = #tpu.dot_dimension_numbers<[1], [1], [0], [0], [0, 0, 1, 0], [], []>} : vector<8x8xf32>, vector<16x8xf32>, vector<8x16xf32> -> vector<8x16xf32>
    %cst_132 = arith.constant 0.353553385 : f32
    %260 = vector.broadcast %cst_132 : f32 to vector<8x16xf32>
    %261 = arith.mulf %259, %260 : vector<8x16xf32>
    %cst_133 = arith.constant dense<0xFF800000> : vector<8xf32>
    %262 = vector.multi_reduction <maximumf>, %261, %cst_133 [1] : vector<8x16xf32> to vector<8xf32>
    %263 = vector.shape_cast %262 : vector<8xf32> to vector<8x1xf32>
    %264 = vector.broadcast %263 : vector<8x1xf32> to vector<8x16xf32>
    %265 = arith.subf %261, %264 : vector<8x16xf32>
    %266 = math.exp %265 : vector<8x16xf32>
    %cst_134 = arith.constant dense<0.000000e+00> : vector<8xf32>
    %267 = vector.multi_reduction <add>, %266, %cst_134 [1] : vector<8x16xf32> to vector<8xf32>
    %268 = vector.shape_cast %267 : vector<8xf32> to vector<8x1xf32>
    %269 = vector.broadcast %268 : vector<8x1xf32> to vector<8x16xf32>
    %270 = arith.divf %266, %269 : vector<8x16xf32>
    %c0_135 = arith.constant 0 : index
    %c0_136 = arith.constant 0 : index
    %c3 = arith.constant 3 : index
    %c0_137 = arith.constant 0 : index
    %c0_138 = arith.constant 0 : index
    %271 = vector.load %arg26[%c0_135, %c0_136, %c3, %c0_137, %c0_138] : memref<1x2x4x8x16xf32, #tpu.memory_space<vmem>>, vector<1x1x1x8x16xf32>
    %272 = vector.shape_cast %271 : vector<1x1x1x8x16xf32> to vector<8x16xf32>
    %273 = vector.shape_cast %270 : vector<8x16xf32> to vector<1x1x1x8x16xf32>
    tpu.vector_store %arg26[%c0_135, %c0_136, %c3, %c0_137, %c0_138], %273 {strides = array<i32>} : memref<1x2x4x8x16xf32, #tpu.memory_space<vmem>>, vector<1x1x1x8x16xf32>,
    %274 = vector.extract_strided_slice %196 {offsets = [0, 56], sizes = [16, 8], strides = [1, 1]} : vector<32x64xf32> to vector<16x8xf32>
    %cst_139 = arith.constant dense<0.000000e+00> : vector<8x8xf32>
    %275 = tpu.matmul %270, %274, %cst_139 {dimension_numbers = #tpu.dot_dimension_numbers<[1], [0], [0], [1], [0, 0, 1, 1], [], []>} : vector<8x16xf32>, vector<16x8xf32>, vector<8x8xf32> -> vector<8x8xf32>
    %c0_140 = arith.constant 0 : index
    %c24_141 = arith.constant 24 : index
    %276 = vector.load %arg27[%c0_140, %c24_141] : memref<16x32xf32, #tpu.memory_space<vmem>>, vector<8x8xf32>
    tpu.vector_store %arg27[%c0_140, %c24_141], %275 {strides = array<i32>} : memref<16x32xf32, #tpu.memory_space<vmem>>, vector<8x8xf32>,
    %277 = vector.extract_strided_slice %188 {offsets = [8, 0], sizes = [8, 8], strides = [1, 1]} : vector<16x32xf32> to vector<8x8xf32>
    %278 = vector.extract_strided_slice %196 {offsets = [16, 0], sizes = [16, 8], strides = [1, 1]} : vector<32x64xf32> to vector<16x8xf32>
    %cst_142 = arith.constant dense<0.000000e+00> : vector<8x16xf32>
    %279 = tpu.matmul %277, %278, %cst_142 {dimension_numbers = #tpu.dot_dimension_numbers<[1], [1], [0], [0], [0, 0, 1, 0], [], []>} : vector<8x8xf32>, vector<16x8xf32>, vector<8x16xf32> -> vector<8x16xf32>
    %cst_143 = arith.constant 0.353553385 : f32
    %280 = vector.broadcast %cst_143 : f32 to vector<8x16xf32>
    %281 = arith.mulf %279, %280 : vector<8x16xf32>
    %cst_144 = arith.constant dense<0xFF800000> : vector<8xf32>
    %282 = vector.multi_reduction <maximumf>, %281, %cst_144 [1] : vector<8x16xf32> to vector<8xf32>
    %283 = vector.shape_cast %282 : vector<8xf32> to vector<8x1xf32>
    %284 = vector.broadcast %283 : vector<8x1xf32> to vector<8x16xf32>
    %285 = arith.subf %281, %284 : vector<8x16xf32>
    %286 = math.exp %285 : vector<8x16xf32>
    %cst_145 = arith.constant dense<0.000000e+00> : vector<8xf32>
    %287 = vector.multi_reduction <add>, %286, %cst_145 [1] : vector<8x16xf32> to vector<8xf32>
    %288 = vector.shape_cast %287 : vector<8xf32> to vector<8x1xf32>
    %289 = vector.broadcast %288 : vector<8x1xf32> to vector<8x16xf32>
    %290 = arith.divf %286, %289 : vector<8x16xf32>
    %c0_146 = arith.constant 0 : index
    %c1_147 = arith.constant 1 : index
    %c0_148 = arith.constant 0 : index
    %c0_149 = arith.constant 0 : index
    %c0_150 = arith.constant 0 : index
    %291 = vector.load %arg26[%c0_146, %c1_147, %c0_148, %c0_149, %c0_150] : memref<1x2x4x8x16xf32, #tpu.memory_space<vmem>>, vector<1x1x1x8x16xf32>
    %292 = vector.shape_cast %291 : vector<1x1x1x8x16xf32> to vector<8x16xf32>
    %293 = vector.shape_cast %290 : vector<8x16xf32> to vector<1x1x1x8x16xf32>
    tpu.vector_store %arg26[%c0_146, %c1_147, %c0_148, %c0_149, %c0_150], %293 {strides = array<i32>} : memref<1x2x4x8x16xf32, #tpu.memory_space<vmem>>, vector<1x1x1x8x16xf32>,
    %294 = vector.extract_strided_slice %196 {offsets = [16, 32], sizes = [16, 8], strides = [1, 1]} : vector<32x64xf32> to vector<16x8xf32>
    %cst_151 = arith.constant dense<0.000000e+00> : vector<8x8xf32>
    %295 = tpu.matmul %290, %294, %cst_151 {dimension_numbers = #tpu.dot_dimension_numbers<[1], [0], [0], [1], [0, 0, 1, 1], [], []>} : vector<8x16xf32>, vector<16x8xf32>, vector<8x8xf32> -> vector<8x8xf32>
    %c8_152 = arith.constant 8 : index
    %c0_153 = arith.constant 0 : index
    %296 = vector.load %arg27[%c8_152, %c0_153] : memref<16x32xf32, #tpu.memory_space<vmem>>, vector<8x8xf32>
    tpu.vector_store %arg27[%c8_152, %c0_153], %295 {strides = array<i32>} : memref<16x32xf32, #tpu.memory_space<vmem>>, vector<8x8xf32>,
    %297 = vector.extract_strided_slice %188 {offsets = [8, 8], sizes = [8, 8], strides = [1, 1]} : vector<16x32xf32> to vector<8x8xf32>
    %298 = vector.extract_strided_slice %196 {offsets = [16, 8], sizes = [16, 8], strides = [1, 1]} : vector<32x64xf32> to vector<16x8xf32>
    %cst_154 = arith.constant dense<0.000000e+00> : vector<8x16xf32>
    %299 = tpu.matmul %297, %298, %cst_154 {dimension_numbers = #tpu.dot_dimension_numbers<[1], [1], [0], [0], [0, 0, 1, 0], [], []>} : vector<8x8xf32>, vector<16x8xf32>, vector<8x16xf32> -> vector<8x16xf32>
    %cst_155 = arith.constant 0.353553385 : f32
    %300 = vector.broadcast %cst_155 : f32 to vector<8x16xf32>
    %301 = arith.mulf %299, %300 : vector<8x16xf32>
    %cst_156 = arith.constant dense<0xFF800000> : vector<8xf32>
    %302 = vector.multi_reduction <maximumf>, %301, %cst_156 [1] : vector<8x16xf32> to vector<8xf32>
    %303 = vector.shape_cast %302 : vector<8xf32> to vector<8x1xf32>
    %304 = vector.broadcast %303 : vector<8x1xf32> to vector<8x16xf32>
    %305 = arith.subf %301, %304 : vector<8x16xf32>
    %306 = math.exp %305 : vector<8x16xf32>
    %cst_157 = arith.constant dense<0.000000e+00> : vector<8xf32>
    %307 = vector.multi_reduction <add>, %306, %cst_157 [1] : vector<8x16xf32> to vector<8xf32>
    %308 = vector.shape_cast %307 : vector<8xf32> to vector<8x1xf32>
    %309 = vector.broadcast %308 : vector<8x1xf32> to vector<8x16xf32>
    %310 = arith.divf %306, %309 : vector<8x16xf32>
    %c0_158 = arith.constant 0 : index
    %c1_159 = arith.constant 1 : index
    %c1_160 = arith.constant 1 : index
    %c0_161 = arith.constant 0 : index
    %c0_162 = arith.constant 0 : index
    %311 = vector.load %arg26[%c0_158, %c1_159, %c1_160, %c0_161, %c0_162] : memref<1x2x4x8x16xf32, #tpu.memory_space<vmem>>, vector<1x1x1x8x16xf32>
    %312 = vector.shape_cast %311 : vector<1x1x1x8x16xf32> to vector<8x16xf32>
    %313 = vector.shape_cast %310 : vector<8x16xf32> to vector<1x1x1x8x16xf32>
    tpu.vector_store %arg26[%c0_158, %c1_159, %c1_160, %c0_161, %c0_162], %313 {strides = array<i32>} : memref<1x2x4x8x16xf32, #tpu.memory_space<vmem>>, vector<1x1x1x8x16xf32>,
    %314 = vector.extract_strided_slice %196 {offsets = [16, 40], sizes = [16, 8], strides = [1, 1]} : vector<32x64xf32> to vector<16x8xf32>
    %cst_163 = arith.constant dense<0.000000e+00> : vector<8x8xf32>
    %315 = tpu.matmul %310, %314, %cst_163 {dimension_numbers = #tpu.dot_dimension_numbers<[1], [0], [0], [1], [0, 0, 1, 1], [], []>} : vector<8x16xf32>, vector<16x8xf32>, vector<8x8xf32> -> vector<8x8xf32>
    %c8_164 = arith.constant 8 : index
    %c8_165 = arith.constant 8 : index
    %316 = vector.load %arg27[%c8_164, %c8_165] : memref<16x32xf32, #tpu.memory_space<vmem>>, vector<8x8xf32>
    tpu.vector_store %arg27[%c8_164, %c8_165], %315 {strides = array<i32>} : memref<16x32xf32, #tpu.memory_space<vmem>>, vector<8x8xf32>,
    %317 = vector.extract_strided_slice %188 {offsets = [8, 16], sizes = [8, 8], strides = [1, 1]} : vector<16x32xf32> to vector<8x8xf32>
    %318 = vector.extract_strided_slice %196 {offsets = [16, 16], sizes = [16, 8], strides = [1, 1]} : vector<32x64xf32> to vector<16x8xf32>
    %cst_166 = arith.constant dense<0.000000e+00> : vector<8x16xf32>
    %319 = tpu.matmul %317, %318, %cst_166 {dimension_numbers = #tpu.dot_dimension_numbers<[1], [1], [0], [0], [0, 0, 1, 0], [], []>} : vector<8x8xf32>, vector<16x8xf32>, vector<8x16xf32> -> vector<8x16xf32>
    %cst_167 = arith.constant 0.353553385 : f32
    %320 = vector.broadcast %cst_167 : f32 to vector<8x16xf32>
    %321 = arith.mulf %319, %320 : vector<8x16xf32>
    %cst_168 = arith.constant dense<0xFF800000> : vector<8xf32>
    %322 = vector.multi_reduction <maximumf>, %321, %cst_168 [1] : vector<8x16xf32> to vector<8xf32>
    %323 = vector.shape_cast %322 : vector<8xf32> to vector<8x1xf32>
    %324 = vector.broadcast %323 : vector<8x1xf32> to vector<8x16xf32>
    %325 = arith.subf %321, %324 : vector<8x16xf32>
    %326 = math.exp %325 : vector<8x16xf32>
    %cst_169 = arith.constant dense<0.000000e+00> : vector<8xf32>
    %327 = vector.multi_reduction <add>, %326, %cst_169 [1] : vector<8x16xf32> to vector<8xf32>
    %328 = vector.shape_cast %327 : vector<8xf32> to vector<8x1xf32>
    %329 = vector.broadcast %328 : vector<8x1xf32> to vector<8x16xf32>
    %330 = arith.divf %326, %329 : vector<8x16xf32>
    %c0_170 = arith.constant 0 : index
    %c1_171 = arith.constant 1 : index
    %c2_172 = arith.constant 2 : index
    %c0_173 = arith.constant 0 : index
    %c0_174 = arith.constant 0 : index
    %331 = vector.load %arg26[%c0_170, %c1_171, %c2_172, %c0_173, %c0_174] : memref<1x2x4x8x16xf32, #tpu.memory_space<vmem>>, vector<1x1x1x8x16xf32>
    %332 = vector.shape_cast %331 : vector<1x1x1x8x16xf32> to vector<8x16xf32>
    %333 = vector.shape_cast %330 : vector<8x16xf32> to vector<1x1x1x8x16xf32>
    tpu.vector_store %arg26[%c0_170, %c1_171, %c2_172, %c0_173, %c0_174], %333 {strides = array<i32>} : memref<1x2x4x8x16xf32, #tpu.memory_space<vmem>>, vector<1x1x1x8x16xf32>,
    %334 = vector.extract_strided_slice %196 {offsets = [16, 48], sizes = [16, 8], strides = [1, 1]} : vector<32x64xf32> to vector<16x8xf32>
    %cst_175 = arith.constant dense<0.000000e+00> : vector<8x8xf32>
    %335 = tpu.matmul %330, %334, %cst_175 {dimension_numbers = #tpu.dot_dimension_numbers<[1], [0], [0], [1], [0, 0, 1, 1], [], []>} : vector<8x16xf32>, vector<16x8xf32>, vector<8x8xf32> -> vector<8x8xf32>
    %c8_176 = arith.constant 8 : index
    %c16_177 = arith.constant 16 : index
    %336 = vector.load %arg27[%c8_176, %c16_177] : memref<16x32xf32, #tpu.memory_space<vmem>>, vector<8x8xf32>
    tpu.vector_store %arg27[%c8_176, %c16_177], %335 {strides = array<i32>} : memref<16x32xf32, #tpu.memory_space<vmem>>, vector<8x8xf32>,
    %337 = vector.extract_strided_slice %188 {offsets = [8, 24], sizes = [8, 8], strides = [1, 1]} : vector<16x32xf32> to vector<8x8xf32>
    %338 = vector.extract_strided_slice %196 {offsets = [16, 24], sizes = [16, 8], strides = [1, 1]} : vector<32x64xf32> to vector<16x8xf32>
    %cst_178 = arith.constant dense<0.000000e+00> : vector<8x16xf32>
    %339 = tpu.matmul %337, %338, %cst_178 {dimension_numbers = #tpu.dot_dimension_numbers<[1], [1], [0], [0], [0, 0, 1, 0], [], []>} : vector<8x8xf32>, vector<16x8xf32>, vector<8x16xf32> -> vector<8x16xf32>
    %cst_179 = arith.constant 0.353553385 : f32
    %340 = vector.broadcast %cst_179 : f32 to vector<8x16xf32>
    %341 = arith.mulf %339, %340 : vector<8x16xf32>
    %cst_180 = arith.constant dense<0xFF800000> : vector<8xf32>
    %342 = vector.multi_reduction <maximumf>, %341, %cst_180 [1] : vector<8x16xf32> to vector<8xf32>
    %343 = vector.shape_cast %342 : vector<8xf32> to vector<8x1xf32>
    %344 = vector.broadcast %343 : vector<8x1xf32> to vector<8x16xf32>
    %345 = arith.subf %341, %344 : vector<8x16xf32>
    %346 = math.exp %345 : vector<8x16xf32>
    %cst_181 = arith.constant dense<0.000000e+00> : vector<8xf32>
    %347 = vector.multi_reduction <add>, %346, %cst_181 [1] : vector<8x16xf32> to vector<8xf32>
    %348 = vector.shape_cast %347 : vector<8xf32> to vector<8x1xf32>
    %349 = vector.broadcast %348 : vector<8x1xf32> to vector<8x16xf32>
    %350 = arith.divf %346, %349 : vector<8x16xf32>
    %c0_182 = arith.constant 0 : index
    %c1_183 = arith.constant 1 : index
    %c3_184 = arith.constant 3 : index
    %c0_185 = arith.constant 0 : index
    %c0_186 = arith.constant 0 : index
    %351 = vector.load %arg26[%c0_182, %c1_183, %c3_184, %c0_185, %c0_186] : memref<1x2x4x8x16xf32, #tpu.memory_space<vmem>>, vector<1x1x1x8x16xf32>
    %352 = vector.shape_cast %351 : vector<1x1x1x8x16xf32> to vector<8x16xf32>
    %353 = vector.shape_cast %350 : vector<8x16xf32> to vector<1x1x1x8x16xf32>
    tpu.vector_store %arg26[%c0_182, %c1_183, %c3_184, %c0_185, %c0_186], %353 {strides = array<i32>} : memref<1x2x4x8x16xf32, #tpu.memory_space<vmem>>, vector<1x1x1x8x16xf32>,
    %354 = vector.extract_strided_slice %196 {offsets = [16, 56], sizes = [16, 8], strides = [1, 1]} : vector<32x64xf32> to vector<16x8xf32>
    %cst_187 = arith.constant dense<0.000000e+00> : vector<8x8xf32>
    %355 = tpu.matmul %350, %354, %cst_187 {dimension_numbers = #tpu.dot_dimension_numbers<[1], [0], [0], [1], [0, 0, 1, 1], [], []>} : vector<8x16xf32>, vector<16x8xf32>, vector<8x8xf32> -> vector<8x8xf32>
    %c8_188 = arith.constant 8 : index
    %c24_189 = arith.constant 24 : index
    %356 = vector.load %arg27[%c8_188, %c24_189] : memref<16x32xf32, #tpu.memory_space<vmem>>, vector<8x8xf32>
    tpu.vector_store %arg27[%c8_188, %c24_189], %355 {strides = array<i32>} : memref<16x32xf32, #tpu.memory_space<vmem>>, vector<8x8xf32>,
    %c0_190 = arith.constant 0 : index
    %c0_191 = arith.constant 0 : index
    %357 = vector.load %arg27[%c0_190, %c0_191] : memref<16x32xf32, #tpu.memory_space<vmem>>, vector<16x32xf32>
    %c0_192 = arith.constant 0 : index
    %c0_193 = arith.constant 0 : index
    %c0_194 = arith.constant 0 : index
    %358 = vector.load %arg15[%c0_192, %c0_193, %c0_194] : memref<1x32x32xf32, #tpu.memory_space<vmem>>, vector<1x32x32xf32>
    %359 = vector.shape_cast %358 : vector<1x32x32xf32> to vector<32x32xf32>
    %cst_195 = arith.constant dense<0.000000e+00> : vector<16x32xf32>
    %360 = tpu.matmul %357, %359, %cst_195 {dimension_numbers = #tpu.dot_dimension_numbers<[1], [0], [0], [1], [0, 0, 1, 1], [], []>} : vector<16x32xf32>, vector<32x32xf32>, vector<16x32xf32> -> vector<16x32xf32>
    %c0_196 = arith.constant 0 : index
    %c0_197 = arith.constant 0 : index
    %c0_198 = arith.constant 0 : index
    %361 = vector.load %arg16[%c0_196, %c0_197, %c0_198] : memref<1x1x32xf32, #tpu.memory_space<vmem>>, vector<1x1x32xf32>
    %362 = vector.shape_cast %361 : vector<1x1x32xf32> to vector<1x32xf32>
    %363 = vector.broadcast %362 : vector<1x32xf32> to vector<16x32xf32>
    %364 = arith.addf %360, %363 : vector<16x32xf32>
    %365 = arith.addf %181, %364 : vector<16x32xf32>
    %c0_199 = arith.constant 0 : index
    %c0_200 = arith.constant 0 : index
    %c0_201 = arith.constant 0 : index
    %366 = vector.load %arg17[%c0_199, %c0_200, %c0_201] : memref<1x1x32xf32, #tpu.memory_space<vmem>>, vector<1x1x32xf32>
    %367 = vector.shape_cast %366 : vector<1x1x32xf32> to vector<1x32xf32>
    %c0_202 = arith.constant 0 : index
    %c0_203 = arith.constant 0 : index
    %c0_204 = arith.constant 0 : index
    %368 = vector.load %arg18[%c0_202, %c0_203, %c0_204] : memref<1x1x32xf32, #tpu.memory_space<vmem>>, vector<1x1x32xf32>
    %369 = vector.shape_cast %368 : vector<1x1x32xf32> to vector<1x32xf32>
    %cst_205 = arith.constant dense<0.000000e+00> : vector<16xf32>
    %370 = vector.multi_reduction <add>, %365, %cst_205 [1] : vector<16x32xf32> to vector<16xf32>
    %371 = vector.shape_cast %370 : vector<16xf32> to vector<16x1xf32>
    %cst_206 = arith.constant 3.200000e+01 : f32
    %372 = vector.broadcast %cst_206 : f32 to vector<16x1xf32>
    %373 = arith.divf %371, %372 : vector<16x1xf32>
    %374 = vector.broadcast %373 : vector<16x1xf32> to vector<16x32xf32>
    %375 = arith.subf %365, %374 : vector<16x32xf32>
    %376 = arith.mulf %375, %375 : vector<16x32xf32>
    %cst_207 = arith.constant dense<0.000000e+00> : vector<16xf32>
    %377 = vector.multi_reduction <add>, %376, %cst_207 [1] : vector<16x32xf32> to vector<16xf32>
    %378 = vector.shape_cast %377 : vector<16xf32> to vector<16x1xf32>
    %cst_208 = arith.constant 3.200000e+01 : f32
    %379 = vector.broadcast %cst_208 : f32 to vector<16x1xf32>
    %380 = arith.divf %378, %379 : vector<16x1xf32>
    %381 = vector.broadcast %373 : vector<16x1xf32> to vector<16x32xf32>
    %382 = arith.subf %365, %381 : vector<16x32xf32>
    %cst_209 = arith.constant 9.99999996E-13 : f32
    %383 = vector.broadcast %cst_209 : f32 to vector<16x1xf32>
    %384 = arith.addf %380, %383 : vector<16x1xf32>
    %385 = math.rsqrt %384 : vector<16x1xf32>
    %386 = vector.broadcast %385 : vector<16x1xf32> to vector<16x32xf32>
    %387 = arith.mulf %382, %386 : vector<16x32xf32>
    %388 = vector.broadcast %367 : vector<1x32xf32> to vector<16x32xf32>
    %389 = arith.mulf %387, %388 : vector<16x32xf32>
    %390 = vector.broadcast %369 : vector<1x32xf32> to vector<16x32xf32>
    %391 = arith.addf %389, %390 : vector<16x32xf32>
    %c0_210 = arith.constant 0 : index
    %c0_211 = arith.constant 0 : index
    %c0_212 = arith.constant 0 : index
    %392 = vector.load %arg19[%c0_210, %c0_211, %c0_212] : memref<1x32x64xf32, #tpu.memory_space<vmem>>, vector<1x32x64xf32>
    %393 = vector.shape_cast %392 : vector<1x32x64xf32> to vector<32x64xf32>
    %cst_213 = arith.constant dense<0.000000e+00> : vector<16x64xf32>
    %394 = tpu.matmul %391, %393, %cst_213 {dimension_numbers = #tpu.dot_dimension_numbers<[1], [0], [0], [1], [0, 0, 1, 1], [], []>} : vector<16x32xf32>, vector<32x64xf32>, vector<16x64xf32> -> vector<16x64xf32>
    %c0_214 = arith.constant 0 : index
    %c0_215 = arith.constant 0 : index
    %c0_216 = arith.constant 0 : index
    %395 = vector.load %arg20[%c0_214, %c0_215, %c0_216] : memref<1x1x64xf32, #tpu.memory_space<vmem>>, vector<1x1x64xf32>
    %396 = vector.shape_cast %395 : vector<1x1x64xf32> to vector<1x64xf32>
    %397 = vector.broadcast %396 : vector<1x64xf32> to vector<16x64xf32>
    %398 = arith.addf %394, %397 : vector<16x64xf32>
    %399 = arith.mulf %398, %398 : vector<16x64xf32>
    %400 = arith.mulf %398, %399 : vector<16x64xf32>
    %cst_217 = arith.constant 4.471500e-02 : f32
    %401 = vector.broadcast %cst_217 : f32 to vector<16x64xf32>
    %402 = arith.mulf %401, %400 : vector<16x64xf32>
    %403 = arith.addf %398, %402 : vector<16x64xf32>
    %cst_218 = arith.constant 0.797884583 : f32
    %404 = vector.broadcast %cst_218 : f32 to vector<16x64xf32>
    %405 = arith.mulf %404, %403 : vector<16x64xf32>
    %406 = math.tanh %405 : vector<16x64xf32>
    %cst_219 = arith.constant 1.000000e+00 : f32
    %407 = vector.broadcast %cst_219 : f32 to vector<16x64xf32>
    %408 = arith.addf %407, %406 : vector<16x64xf32>
    %cst_220 = arith.constant 5.000000e-01 : f32
    %409 = vector.broadcast %cst_220 : f32 to vector<16x64xf32>
    %410 = arith.mulf %409, %408 : vector<16x64xf32>
    %411 = arith.mulf %398, %410 : vector<16x64xf32>
    %c0_221 = arith.constant 0 : index
    %c0_222 = arith.constant 0 : index
    %c0_223 = arith.constant 0 : index
    %412 = vector.load %arg21[%c0_221, %c0_222, %c0_223] : memref<1x64x32xf32, #tpu.memory_space<vmem>>, vector<1x64x32xf32>
    %413 = vector.shape_cast %412 : vector<1x64x32xf32> to vector<64x32xf32>
    %cst_224 = arith.constant dense<0.000000e+00> : vector<16x32xf32>
    %414 = tpu.matmul %411, %413, %cst_224 {dimension_numbers = #tpu.dot_dimension_numbers<[1], [0], [0], [1], [0, 0, 1, 1], [], []>} : vector<16x64xf32>, vector<64x32xf32>, vector<16x32xf32> -> vector<16x32xf32>
    %c0_225 = arith.constant 0 : index
    %c0_226 = arith.constant 0 : index
    %c0_227 = arith.constant 0 : index
    %415 = vector.load %arg22[%c0_225, %c0_226, %c0_227] : memref<1x1x32xf32, #tpu.memory_space<vmem>>, vector<1x1x32xf32>
    %416 = vector.shape_cast %415 : vector<1x1x32xf32> to vector<1x32xf32>
    %417 = vector.broadcast %416 : vector<1x32xf32> to vector<16x32xf32>
    %418 = arith.addf %414, %417 : vector<16x32xf32>
    %419 = arith.addf %391, %418 : vector<16x32xf32>
    %c0_228 = arith.constant 0 : index
    %c0_229 = arith.constant 0 : index
    %c0_230 = arith.constant 0 : index
    %420 = vector.load %arg23[%c0_228, %c0_229, %c0_230] : memref<1x1x32xf32, #tpu.memory_space<vmem>>, vector<1x1x32xf32>
    %421 = vector.shape_cast %420 : vector<1x1x32xf32> to vector<1x32xf32>
    %c0_231 = arith.constant 0 : index
    %c0_232 = arith.constant 0 : index
    %c0_233 = arith.constant 0 : index
    %422 = vector.load %arg24[%c0_231, %c0_232, %c0_233] : memref<1x1x32xf32, #tpu.memory_space<vmem>>, vector<1x1x32xf32>
    %423 = vector.shape_cast %422 : vector<1x1x32xf32> to vector<1x32xf32>
    %cst_234 = arith.constant dense<0.000000e+00> : vector<16xf32>
    %424 = vector.multi_reduction <add>, %419, %cst_234 [1] : vector<16x32xf32> to vector<16xf32>
    %425 = vector.shape_cast %424 : vector<16xf32> to vector<16x1xf32>
    %cst_235 = arith.constant 3.200000e+01 : f32
    %426 = vector.broadcast %cst_235 : f32 to vector<16x1xf32>
    %427 = arith.divf %425, %426 : vector<16x1xf32>
    %428 = vector.broadcast %427 : vector<16x1xf32> to vector<16x32xf32>
    %429 = arith.subf %419, %428 : vector<16x32xf32>
    %430 = arith.mulf %429, %429 : vector<16x32xf32>
    %cst_236 = arith.constant dense<0.000000e+00> : vector<16xf32>
    %431 = vector.multi_reduction <add>, %430, %cst_236 [1] : vector<16x32xf32> to vector<16xf32>
    %432 = vector.shape_cast %431 : vector<16xf32> to vector<16x1xf32>
    %cst_237 = arith.constant 3.200000e+01 : f32
    %433 = vector.broadcast %cst_237 : f32 to vector<16x1xf32>
    %434 = arith.divf %432, %433 : vector<16x1xf32>
    %435 = vector.broadcast %427 : vector<16x1xf32> to vector<16x32xf32>
    %436 = arith.subf %419, %435 : vector<16x32xf32>
    %cst_238 = arith.constant 9.99999996E-13 : f32
    %437 = vector.broadcast %cst_238 : f32 to vector<16x1xf32>
    %438 = arith.addf %434, %437 : vector<16x1xf32>
    %439 = math.rsqrt %438 : vector<16x1xf32>
    %440 = vector.broadcast %439 : vector<16x1xf32> to vector<16x32xf32>
    %441 = arith.mulf %436, %440 : vector<16x32xf32>
    %442 = vector.broadcast %421 : vector<1x32xf32> to vector<16x32xf32>
    %443 = arith.mulf %441, %442 : vector<16x32xf32>
    %444 = vector.broadcast %423 : vector<1x32xf32> to vector<16x32xf32>
    %445 = arith.addf %443, %444 : vector<16x32xf32>
    %c0_239 = arith.constant 0 : index
    %c0_240 = arith.constant 0 : index
    %446 = vector.load %arg25[%c0_239, %c0_240] : memref<16x32xf32, #tpu.memory_space<vmem>>, vector<16x32xf32>
    tpu.vector_store %arg25[%c0_239, %c0_240], %445 {strides = array<i32>} : memref<16x32xf32, #tpu.memory_space<vmem>>, vector<16x32xf32>,
    return
  }
  func.func @transform_0(%arg0: i32) -> (i32, i32) {
    %c0_i32 = arith.constant 0 : i32
    %c0_i32_0 = arith.constant 0 : i32
    %c0_i32_1 = arith.constant 0 : i32
    return %c0_i32, %c0_i32_0 : i32, i32
  }
  func.func @transform_1(%arg0: i32) -> (i32, i32) {
    %c0_i32 = arith.constant 0 : i32
    %c0_i32_0 = arith.constant 0 : i32
    %c0_i32_1 = arith.constant 0 : i32
    return %c0_i32, %c0_i32_0 : i32, i32
  }
  func.func @transform_2(%arg0: i32) -> (i32, i32) {
    %c0_i32 = arith.constant 0 : i32
    %c0_i32_0 = arith.constant 0 : i32
    %c0_i32_1 = arith.constant 0 : i32
    return %c0_i32, %c0_i32_0 : i32, i32
  }
  func.func @transform_3(%arg0: i32) -> (i32, i32) {
    %c0_i32 = arith.constant 0 : i32
    %c0_i32_0 = arith.constant 0 : i32
    %c0_i32_1 = arith.constant 0 : i32
    return %c0_i32, %c0_i32_0 : i32, i32
  }
  func.func @transform_4(%arg0: i32) -> (i32, i32, i32) {
    %c0_i32 = arith.constant 0 : i32
    %c0_i32_0 = arith.constant 0 : i32
    %c0_i32_1 = arith.constant 0 : i32
    return %arg0, %c0_i32, %c0_i32_0 : i32, i32, i32
  }
  func.func @transform_5(%arg0: i32) -> (i32, i32, i32) {
    %c0_i32 = arith.constant 0 : i32
    %c0_i32_0 = arith.constant 0 : i32
    %c0_i32_1 = arith.constant 0 : i32
    return %arg0, %c0_i32, %c0_i32_0 : i32, i32, i32
  }
  func.func @transform_6(%arg0: i32) -> (i32, i32, i32) {
    %c0_i32 = arith.constant 0 : i32
    %c0_i32_0 = arith.constant 0 : i32
    %c0_i32_1 = arith.constant 0 : i32
    return %arg0, %c0_i32, %c0_i32_0 : i32, i32, i32
  }
  func.func @transform_7(%arg0: i32) -> (i32, i32, i32) {
    %c0_i32 = arith.constant 0 : i32
    %c0_i32_0 = arith.constant 0 : i32
    %c0_i32_1 = arith.constant 0 : i32
    return %arg0, %c0_i32, %c0_i32_0 : i32, i32, i32
  }
  func.func @transform_8(%arg0: i32) -> (i32, i32, i32) {
    %c0_i32 = arith.constant 0 : i32
    %c0_i32_0 = arith.constant 0 : i32
    %c0_i32_1 = arith.constant 0 : i32
    return %arg0, %c0_i32, %c0_i32_0 : i32, i32, i32
  }
  func.func @transform_9(%arg0: i32) -> (i32, i32, i32) {
    %c0_i32 = arith.constant 0 : i32
    %c0_i32_0 = arith.constant 0 : i32
    %c0_i32_1 = arith.constant 0 : i32
    return %arg0, %c0_i32, %c0_i32_0 : i32, i32, i32
  }
  func.func @transform_10(%arg0: i32) -> (i32, i32, i32) {
    %c0_i32 = arith.constant 0 : i32
    %c0_i32_0 = arith.constant 0 : i32
    %c0_i32_1 = arith.constant 0 : i32
    return %arg0, %c0_i32, %c0_i32_0 : i32, i32, i32
  }
  func.func @transform_11(%arg0: i32) -> (i32, i32, i32) {
    %c0_i32 = arith.constant 0 : i32
    %c0_i32_0 = arith.constant 0 : i32
    %c0_i32_1 = arith.constant 0 : i32
    return %arg0, %c0_i32, %c0_i32_0 : i32, i32, i32
  }
  func.func @transform_12(%arg0: i32) -> (i32, i32, i32) {
    %c0_i32 = arith.constant 0 : i32
    %c0_i32_0 = arith.constant 0 : i32
    %c0_i32_1 = arith.constant 0 : i32
    return %arg0, %c0_i32, %c0_i32_0 : i32, i32, i32
  }
  func.func @transform_13(%arg0: i32) -> (i32, i32, i32) {
    %c0_i32 = arith.constant 0 : i32
    %c0_i32_0 = arith.constant 0 : i32
    %c0_i32_1 = arith.constant 0 : i32
    return %arg0, %c0_i32, %c0_i32_0 : i32, i32, i32
  }
  func.func @transform_14(%arg0: i32) -> (i32, i32, i32) {
    %c0_i32 = arith.constant 0 : i32
    %c0_i32_0 = arith.constant 0 : i32
    %c0_i32_1 = arith.constant 0 : i32
    return %arg0, %c0_i32, %c0_i32_0 : i32, i32, i32
  }
  func.func @transform_15(%arg0: i32) -> (i32, i32, i32) {
    %c0_i32 = arith.constant 0 : i32
    %c0_i32_0 = arith.constant 0 : i32
    %c0_i32_1 = arith.constant 0 : i32
    return %arg0, %c0_i32, %c0_i32_0 : i32, i32, i32
  }
  func.func @transform_16(%arg0: i32) -> (i32, i32, i32) {
    %c0_i32 = arith.constant 0 : i32
    %c0_i32_0 = arith.constant 0 : i32
    %c0_i32_1 = arith.constant 0 : i32
    return %arg0, %c0_i32, %c0_i32_0 : i32, i32, i32
  }
  func.func @transform_17(%arg0: i32) -> (i32, i32, i32) {
    %c0_i32 = arith.constant 0 : i32
    %c0_i32_0 = arith.constant 0 : i32
    %c0_i32_1 = arith.constant 0 : i32
    return %arg0, %c0_i32, %c0_i32_0 : i32, i32, i32
  }
  func.func @transform_18(%arg0: i32) -> (i32, i32, i32) {
    %c0_i32 = arith.constant 0 : i32
    %c0_i32_0 = arith.constant 0 : i32
    %c0_i32_1 = arith.constant 0 : i32
    return %arg0, %c0_i32, %c0_i32_0 : i32, i32, i32
  }
  func.func @transform_19(%arg0: i32) -> (i32, i32, i32) {
    %c0_i32 = arith.constant 0 : i32
    %c0_i32_0 = arith.constant 0 : i32
    %c0_i32_1 = arith.constant 0 : i32
    return %arg0, %c0_i32, %c0_i32_0 : i32, i32, i32
  }
  func.func @transform_20(%arg0: i32) -> (i32, i32, i32) {
    %c0_i32 = arith.constant 0 : i32
    %c0_i32_0 = arith.constant 0 : i32
    %c0_i32_1 = arith.constant 0 : i32
    return %arg0, %c0_i32, %c0_i32_0 : i32, i32, i32
  }
  func.func @transform_21(%arg0: i32) -> (i32, i32, i32) {
    %c0_i32 = arith.constant 0 : i32
    %c0_i32_0 = arith.constant 0 : i32
    %c0_i32_1 = arith.constant 0 : i32
    return %arg0, %c0_i32, %c0_i32_0 : i32, i32, i32
  }
  func.func @transform_22(%arg0: i32) -> (i32, i32, i32) {
    %c0_i32 = arith.constant 0 : i32
    %c0_i32_0 = arith.constant 0 : i32
    %c0_i32_1 = arith.constant 0 : i32
    return %arg0, %c0_i32, %c0_i32_0 : i32, i32, i32
  }
  func.func @transform_23(%arg0: i32) -> (i32, i32, i32) {
    %c0_i32 = arith.constant 0 : i32
    %c0_i32_0 = arith.constant 0 : i32
    %c0_i32_1 = arith.constant 0 : i32
    return %arg0, %c0_i32, %c0_i32_0 : i32, i32, i32
  }
  func.func @transform_24(%arg0: i32) -> (i32, i32) {
    %c0_i32 = arith.constant 0 : i32
    %c0_i32_0 = arith.constant 0 : i32
    %c0_i32_1 = arith.constant 0 : i32
    return %c0_i32, %c0_i32_0 : i32, i32
  }
  func.func @transform_25(%arg0: i32) -> (i32, i32, i32, i32, i32) {
    %c0_i32 = arith.constant 0 : i32
    %c0_i32_0 = arith.constant 0 : i32
    %c0_i32_1 = arith.constant 0 : i32
    %c0_i32_2 = arith.constant 0 : i32
    %c0_i32_3 = arith.constant 0 : i32
    return %arg0, %c0_i32, %c0_i32_0, %c0_i32_1, %c0_i32_2 : i32, i32, i32, i32, i32
  }
}

</mosaic_0001>

<bundles_post_ra>
// kernel: qks_forward.3
= control target key start
LH: loop header
LB: loop body
LE: loop exit
PB: predicated region body
PF: predicated region fallthrough
CT: control target
= control target key end

     0   :  { %s477_s0 = inlined_call_operand.vmem [shape: f32[32,48], index: 0, kind: input, shape index: {}]   ;;  %s478_s1 = inlined_call_operand.vmem [shape: f32[48,32], index: 1, kind: input, shape index: {}]   ;;  %s479_s2 = inlined_call_operand.vmem [shape: f32[32,32], index: 2, kind: input, shape index: {}]   ;;  %s480_s3 = inlined_call_operand.vmem [shape: f32[1,32], index: 3, kind: input, shape index: {}]   ;;  %s481_s4 = inlined_call_operand.vmem [shape: f32[1,32], index: 4, kind: input, shape index: {}]   ;;  %s482_s5 = inlined_call_operand.vmem [shape: f32[1,32], index: 5, kind: input, shape index: {}]   ;;  %s483_s6 = inlined_call_operand.vmem [shape: f32[32,32], index: 6, kind: output, shape index: {0}]   ;;  %s484_s7 = inlined_call_operand.hbm [shape: f32[1,32], index: 7, kind: output, shape index: {1}]  }
   0x1   :  { %v35_v0 = vld [vmem:[%s478_s1 + $0x28] sm:$0xff]  ;;  %v34_v1 = vld [vmem:[%s478_s1 + $0x20] sm:$0xff]  ;;  %v33_v2 = vld [vmem:[%s478_s1 + $0x18] sm:$0xff] }
   0x2   :  { %272 = vmatprep.subr.mxu0 %v35_v0  ;;  %290 = vmatprep.subr.mxu1 %v35_v0  ;;  %v32_v3 = vld [vmem:[%s478_s1 + $0x10] sm:$0xff] }
   0x3   :  { %273 = vmatpush3.msra.mxu0 %v35_v0  ;;  %296 = vmatpush3.msra.mxu1 %v35_v0 }
   0x4   :  { %274 = vmatprep.subr.mxu0 %v34_v1  ;;  %291 = vmatprep.subr.mxu1 %v34_v1 }
   0x5   :  { %275 = vmatpush3.msra.mxu0 %v34_v1  ;;  %297 = vmatpush3.msra.mxu1 %v34_v1 }
   0x6   :  { %13 = vsyncpa [#allocation3], 0  ;;  %276 = vmatprep.subr.mxu0 %v33_v2  ;;  %292 = vmatprep.subr.mxu1 %v33_v2  ;;  %v31_v4 = vld [vmem:[%s478_s1 + $0x8] sm:$0xff]  ;;  %v30_v5 = vld [vmem:[%s478_s1] sm:$0xff]  ;;  %vm40_vm0 = vcmask 392192   ;;  %vm219_vm1 = vcmask 253952  }
   0x7   :  { %277 = vmatpush3.msra.mxu0 %v33_v2  ;;  %298 = vmatpush3.msra.mxu1 %v33_v2  ;;  %v26_v6 = vld [vmem:[%s477_s0] sm:$0xff]  ;;  %v27_v8 = vld [vmem:[%s477_s0 + $0x8] sm:$0xff]  ;;  %v28_v9 = vld [vmem:[%s477_s0 + $0x10] sm:$0xff]  ;;  %vm138_vm2 = vcmask 261120   ;;  %s335_s8 = smov [#allocation2]  }
   0x8   :  { %278 = vmatprep.subr.mxu0 %v32_v3  ;;  %293 = vmatprep.subr.mxu1 %v32_v3  ;;  %v218_v7 = vld [vmem:[%s480_s3] sm:$0x1]  ;;  %v29_v11 = vld [vmem:[%s477_s0 + $0x18] sm:$0xff]  ;;  %v37_v14 = vld [vmem:[%s479_s2 + $0x8] sm:$0xff]  ;;  %s246_s9 = sshll.u32 %s335_s8, 4  ;;  %s247_s9 = int_to_ptr.vmem [resolvable:$true] %s246_s9 }
   0x9   :  { %279 = vmatpush3.msra.mxu0 %v32_v3  ;;  %299 = vmatpush3.msra.mxu1 %v32_v3  ;;  %v220_v10 = vsel %vm219_vm1, %v218_v7, 0.0  ;;  %v36_v16 = vld [vmem:[%s479_s2] sm:$0xff]  ;;  %v39_v20 = vld [vmem:[%s479_s2 + $0x18] sm:$0xff]  ;;  %v38_v22 = vld [vmem:[%s479_s2 + $0x10] sm:$0xff]  ;;  %s313_s10 = scalar_lea.vmem %s247_s9, 16  ;;  %s317_s11 = scalar_lea.vmem %s247_s9, 32 }
   0xa   :  { %280 = vmatprep.subr.mxu0 %v31_v4  ;;  %294 = vmatprep.subr.mxu1 %v31_v4  ;;  %v233_v57 = vld [vmem:[%s481_s4] sm:$0x1]  ;;  %p314_p0 = scmp.ne.s32.totalorder %s247_s9, %s313_s10  ;;  %p318_p1 = scmp.lt.s32.totalorder %s247_s9, %s247_s9 }
   0xb   :  { %281 = vmatpush3.msra.mxu0 %v31_v4  ;;  %300 = vmatpush3.msra.mxu1 %v31_v4  ;;  %v235_v59 = vld [vmem:[%s482_s5] sm:$0x1]  ;;  %p319_p2 = scmp.lt.s32.totalorder %s317_s11, %s313_s10 }
   0xc   :  { %282 = vmatprep.subr.mxu0 %v30_v5  ;;  %284 = vmatprep.mubr.msk.f32.mxu0 %vm40_vm0, %v26_v6 }
   0xd   :  { %283 = vmatpush3.msra.mxu0 %v30_v5  ;;  %295 = vmatprep.subr.mxu1 %v30_v5  ;;  %p320_p3 = por %p319_p2, %p318_p1 }
   0xe   :  { %285 = vmatmul.mubr.msk.f32.vlgmr.msra.gmra.mxu0 %vm40_vm0, %v27_v8  ;;  %301 = vmatpush3.msra.mxu1 %v30_v5 }
   0xf   :  { %287 = vmatprep.mubr.msk.f32.mxu1 %vm40_vm0, %v28_v9  ;;  %221 = vadd.xlane.f32.xlu0 %v220_v10  ;;  %p321_p4 = pnand %p320_p3, %p314_p0 }
  0x10   :  { %288 = vmatmul.mubr.msk.f32.vlgmr.msra.gmra.mxu1 %vm40_vm0, %v29_v11 }
  0x98   :  { %v222_v12 = vpop.xlane.xlu0 %221 }
  0x99   :  { %v223_v13 = vmul.f32 0.03125, %v222_v12 }
  0x9b   :  { %v224_v18 = vsub.f32 %v218_v7, %v223_v13 }
  0x9d   :  { %v225_v29 = vmul.f32 %v224_v18, %v224_v18 }
  0x9f   :  { %v226_v32 = vsel %vm219_vm1, %v225_v29, 0.0 }
  0xce   :  { %v286_v15 = vpop.f32.mrf.mxu0 }
  0xcf   :  { %v125_v17 = vadd.f32 %v286_v15, %v37_v14 }
  0xd0   :  { %v119_v19 = vpop.f32.mrf.mxu0  ;;  %v289_v21 = vpop.f32.mrf.mxu1 }
  0xd1   :  { %v120_v23 = vadd.f32 %v119_v19, %v36_v16  ;;  %v142_v24 = vsel %vm138_vm2, %v125_v17, 0.0  ;;  %v135_v26 = vadd.f32 %v289_v21, %v39_v20 }
  0xd2   :  { %v129_v25 = vpop.f32.mrf.mxu1  ;;  %143 = vadd.xlane.f32.xlu1 %v142_v24 }
  0xd3   :  { %v130_v27 = vadd.f32 %v129_v25, %v38_v22  ;;  %v139_v28 = vsel %vm138_vm2, %v120_v23, 0.0  ;;  %v148_v31 = vsel %vm138_vm2, %v135_v26, 0.0 }
  0xd4   :  { %140 = vadd.xlane.f32.xlu0 %v139_v28 }
  0xd5   :  { %v145_v30 = vsel %vm138_vm2, %v130_v27, 0.0 }
  0xd6   :  { %146 = vadd.xlane.f32.xlu1 %v145_v30 }
  0xd8   :  { %149 = vadd.xlane.f32.xlu0 %v148_v31 }
  0xda   :  { %227 = vadd.xlane.f32.xlu1 %v226_v32 }
 0x15b   :  { %v144_v33 = vpop.xlane.xlu1 %143 }
 0x15c   :  { %v153_v34 = vmul.f32 0.03125, %v144_v33 }
 0x15d   :  { %v141_v35 = vpop.xlane.xlu0 %140 }
 0x15e   :  { %v157_v36 = vsub.f32 %v125_v17, %v153_v34  ;;  %v152_v37 = vmul.f32 0.03125, %v141_v35 }
 0x15f   :  { %v147_v38 = vpop.xlane.xlu1 %146 }
 0x160   :  { %v431_v39 = vsub.f32 %v120_v23, %v152_v37  ;;  %v154_v40 = vmul.f32 0.03125, %v147_v38  ;;  %v161_v41 = vmul.f32 %v157_v36, %v157_v36 }
 0x161   :  { %v150_v42 = vpop.xlane.xlu0 %149 }
 0x162   :  { %v433_v43 = vsub.f32 %v130_v27, %v154_v40  ;;  %v155_v44 = vmul.f32 0.03125, %v150_v42  ;;  %v167_v45 = vsel %vm138_vm2, %v161_v41, 0.0  ;;  %v160_v46 = vmul.f32 %v431_v39, %v431_v39 }
 0x163   :  { %168 = vadd.xlane.f32.xlu1 %v167_v45  ;;  %v228_v47 = vpop.xlane.xlu1 %227 }
 0x164   :  { %v159_v48 = vsub.f32 %v135_v26, %v155_v44  ;;  %v229_v49 = vmul.f32 0.03125, %v228_v47  ;;  %v164_v50 = vsel %vm138_vm2, %v160_v46, 0.0  ;;  %v162_v51 = vmul.f32 %v433_v43, %v433_v43 }
 0x165   :  { %165 = vadd.xlane.f32.xlu0 %v164_v50 }
 0x166   :  { %v230_v52 = vadd.f32 1e-05, %v229_v49  ;;  %v163_v53 = vmul.f32 %v159_v48, %v159_v48  ;;  %v170_v54 = vsel %vm138_vm2, %v162_v51, 0.0 }
 0x168   :  { %303 = vrsqrt.f32 %v230_v52  ;;  %v173_v55 = vsel %vm138_vm2, %v163_v53, 0.0 }
 0x169   :  { %171 = vadd.xlane.f32.xlu0 %v170_v54  ;;  %174 = vadd.xlane.f32.xlu1 %v173_v55 }
 0x175   :  { %v304_v56 = vpop.eup %303 }
 0x176   :  { %v232_v58 = vmul.f32 %v304_v56, %v224_v18 }
 0x178   :  { %v234_v60 = vmul.f32 %v233_v57, %v232_v58 }
 0x17a   :  { %v236_v61 = vadd.f32 %v235_v59, %v234_v60 }
 0x17c   :  { %237 = vst.msk [vmem:[#allocation2] sm:$0x1] %vm219_vm1, %v236_v61 }
 0x17d   :  { %324 = shalt.err (!%p321_p4)
}
 0x17e   :  { %249 = dma.vmem_to_hbm [thread:$0]  %s247_s9, 16, %s484_s7, [#allocation3]   ;;  %v260_v11 = vld [vmem:[%s481_s4] ss:$0 sm:$0xff] }
 0x17f   :  { %v261_v14 = vld [vmem:[%s482_s5] ss:$0 sm:$0xff] }
 0x1ec   :  { %v169_v62 = vpop.xlane.xlu1 %168 }
 0x1ed   :  { %v177_v63 = vmul.f32 0.03125, %v169_v62 }
 0x1ee   :  { %v166_v0 = vpop.xlane.xlu0 %165 }
 0x1ef   :  { %v181_v1 = vadd.f32 1e-05, %v177_v63  ;;  %v176_v2 = vmul.f32 0.03125, %v166_v0 }
 0x1f1   :  { %305 = vrsqrt.f32 %v181_v1  ;;  %v180_v3 = vadd.f32 1e-05, %v176_v2 }
 0x1f2   :  { %v175_v4 = vpop.xlane.xlu1 %174  ;;  %v172_v5 = vpop.xlane.xlu0 %171 }
 0x1f3   :  { %307 = vrsqrt.f32 %v180_v3  ;;  %v179_v6 = vmul.f32 0.03125, %v175_v4  ;;  %v178_v7 = vmul.f32 0.03125, %v172_v5 }
 0x1f5   :  { %v183_v8 = vadd.f32 1e-05, %v179_v6  ;;  %v182_v9 = vadd.f32 1e-05, %v178_v7 }
 0x1f7   :  { %309 = vrsqrt.f32 %v183_v8 }
 0x1f8   :  { %311 = vrsqrt.f32 %v182_v9 }
 0x1fe   :  { %v306_v10 = vpop.eup %305 }
 0x1ff   :  { %v189_v12 = vmul.f32 %v306_v10, %v157_v36 }
 0x200   :  { %v308_v13 = vpop.eup %307 }
 0x201   :  { %v200_v15 = vmul.f32 %v260_v11, %v189_v12  ;;  %v188_v16 = vmul.f32 %v308_v13, %v431_v39 }
 0x203   :  { %v211_v17 = vadd.f32 %v261_v14, %v200_v15  ;;  %v199_v18 = vmul.f32 %v260_v11, %v188_v16 }
 0x204   :  { %v310_v19 = vpop.eup %309 }
 0x205   :  { %v312_v20 = vpop.eup %311  ;;  %215 = vst.msk [vmem:[%s483_s6 + $0x8] sm:$0xff] %vm138_vm2, %v211_v17  ;;  %v210_v21 = vadd.f32 %v261_v14, %v199_v18  ;;  %v191_v22 = vmul.f32 %v310_v19, %v159_v48 }
 0x206   :  { %v190_v23 = vmul.f32 %v312_v20, %v433_v43 }
 0x207   :  { %214 = vst.msk [vmem:[%s483_s6] sm:$0xff] %vm138_vm2, %v210_v21  ;;  %v202_v24 = vmul.f32 %v260_v11, %v191_v22 }
 0x208   :  { %v201_v25 = vmul.f32 %v260_v11, %v190_v23 }
 0x209   :  { %v213_v26 = vadd.f32 %v261_v14, %v202_v24 }
 0x20a   :  { %v212_v27 = vadd.f32 %v261_v14, %v201_v25 }
 0x20b   :  { %217 = vst.msk [vmem:[%s483_s6 + $0x18] sm:$0xff] %vm138_vm2, %v213_v26 }
 0x20c   :  { %216 = vst.msk [vmem:[%s483_s6 + $0x10] sm:$0xff] %vm138_vm2, %v212_v27 }
 0x20d   :  { %333 = dma.done.wait [#allocation3], 16  }
 0x20e   :  { %334 = vsyncadd [#allocation3], 4294967280 }
 0x20f   :  { %255 = vsyncpa [#allocation3], 1 }

// kernel: qks_forward.5
= control target key start
LH: loop header
LB: loop body
LE: loop exit
PB: predicated region body
PF: predicated region fallthrough
CT: control target
= control target key end

     0   :  { %11 = vsyncpa [#allocation3], 0  ;;  %vm25_vm0 = vcmask 261120   ;;  %vm109_vm1 = vcmask 130048   ;;  %s515_s0 = inlined_call_operand.vmem [shape: f32[16,32], index: 0, kind: input, shape index: {}]   ;;  %s516_s1 = inlined_call_operand.vmem [shape: f32[32,16], index: 1, kind: input, shape index: {}]   ;;  %s517_s2 = inlined_call_operand.vmem [shape: f32[10,16], index: 2, kind: input, shape index: {}]   ;;  %s518_s3 = inlined_call_operand.hbm [shape: f32[2,10], index: 3, kind: output, shape index: {0}]   ;;  %s519_s4 = inlined_call_operand.hbm [shape: s32[2,10], index: 4, kind: output, shape index: {1}]   ;;  %s520_s5 = inlined_call_operand.hbm [shape: f32[2,8,10], index: 5, kind: output, shape index: {2}]  }
   0x1   :  { %v24_v0 = vld [vmem:[%s516_s1 + $0x18] sm:$0xff]  ;;  %v23_v1 = vld [vmem:[%s516_s1 + $0x10] sm:$0xff]  ;;  %v19_v2 = vld [vmem:[%s515_s0] sm:$0xff] }
   0x2   :  { %332 = vmatprep.subr.mxu0 %v24_v0  ;;  %v22_v3 = vld [vmem:[%s516_s1 + $0x8] sm:$0xff]  ;;  %340 = vmatprep.mubr.msk.f32.mxu0 %vm25_vm0, %v19_v2 }
   0x3   :  { %333 = vmatpush3.msra.mxu0 %v24_v0  ;;  %v108_v4 = vld [vmem:[%s517_s2 + $0x8] sm:$0x3] }
   0x4   :  { %12 = vsyncpa [#allocation5], 0  ;;  %334 = vmatprep.subr.mxu0 %v23_v1  ;;  %343 = vmatprep.subr.msk.mxu1 %vm109_vm1, %v108_v4  ;;  %v21_v5 = vld [vmem:[%s516_s1] sm:$0xff]  ;;  %v20_v6 = vld [vmem:[%s515_s0 + $0x8] sm:$0xff]  ;;  %vm197_vm2 = vcmask 80896   ;;  %v245_v19 = vlaneseq  ;;  %s427_s0 = smov [#allocation2]  }
   0x5   :  { %335 = vmatpush3.msra.mxu0 %v23_v1  ;;  %344 = vmatpush3.xpose.msk.msra.mxu1 %vm109_vm1, %v108_v4  ;;  %v107_v7 = vld [vmem:[%s517_s2] sm:$0xff]  ;;  %s279_s1 = sshll.u32 %s427_s0, 4  ;;  %vm240_vm4 = vcmask 1041409   ;;  %vm243_vm5 = vcmask 74752   ;;  %s280_s1 = int_to_ptr.vmem [resolvable:$true] %s279_s1 }
   0x6   :  { %336 = vmatprep.subr.mxu0 %v22_v3  ;;  %345 = vmatprep.subr.msk.mxu1 %vm109_vm1, %v107_v7  ;;  %v246_v24 = vshrl.u32 %v245_v19, 7  ;;  %s363_s2 = scalar_lea.vmem %s280_s1, 32  ;;  %p368_p1 = scmp.lt.s32.totalorder %s280_s1, %s280_s1 }
   0x7   :  { %337 = vmatpush3.msra.mxu0 %v22_v3  ;;  %p364_p0 = scmp.ne.s32.totalorder %s280_s1, %s363_s2  ;;  %p369_p2 = scmp.lt.s32.totalorder %s363_s2, %s363_s2 }
   0x8   :  { %338 = vmatprep.subr.mxu0 %v21_v5 }
   0x9   :  { %339 = vmatpush3.msra.mxu0 %v21_v5  ;;  %346 = vmatpush3.xpose.msk.msra.mxu1 %vm109_vm1, %v107_v7  ;;  %p370_p3 = por %p369_p2, %p368_p1 }
   0xa   :  { %341 = vmatmul.mubr.msk.f32.vlgmr.msra.gmra.mxu0 %vm25_vm0, %v20_v6 }
   0xb   :  { %p371_p4 = pnand %p370_p3, %p364_p0 }
  0xca   :  { %v342_v8 = vpop.f32.mrf.mxu0 }
  0xcc   :  { %v98_v9 = vpop.f32.mrf.mxu0 }
  0xcd   :  { %347 = vmatprep.mubr.msk.f32.mxu1 %vm109_vm1, %v98_v9 }
  0xce   :  { %348 = vmatmul.mubr.msk.f32.vlgmr.msra.gmra.mxu1 %vm109_vm1, %v342_v8 }
 0x18e   :  { %v349_v10 = vpop.f32.mrf.mxu1 }
 0x18f   :  { %v205_v11 = vsel %vm197_vm2, %v349_v10, -inf }
 0x190   :  { %v206_v12 = vrot.slane %v205_v11, 4  ;;  %v188_v13 = vpop.f32.mrf.mxu1 }
 0x191   :  { %v198_v14 = vsel %vm197_vm2, %v188_v13, -inf }
 0x192   :  { %v207_v15 = vmax.f32 %v205_v11, %v206_v12  ;;  %v199_v16 = vrot.slane %v198_v14, 4 }
 0x194   :  { %v208_v17 = vrot.slane %v207_v15, 2  ;;  %v200_v18 = vmax.f32 %v198_v14, %v199_v16 }
 0x196   :  { %v209_v20 = vmax.f32 %v207_v15, %v208_v17  ;;  %v201_v21 = vrot.slane %v200_v18, 2 }
 0x198   :  { %v210_v22 = vrot.slane %v209_v20, 1  ;;  %v202_v23 = vmax.f32 %v200_v18, %v201_v21 }
 0x19a   :  { %v211_v25 = vmax.f32 %v209_v20, %v210_v22  ;;  %v203_v26 = vrot.slane %v202_v23, 1 }
 0x19c   :  { %v213_v27 = vsub.f32 %v349_v10, %v211_v25  ;;  %vm248_vm3 = vcmp.eq.f32.partialorder %v349_v10, %v211_v25  ;;  %v204_v28 = vmax.f32 %v202_v23, %v203_v26 }
 0x19d   :  { %v250_v29 = vsel %vm248_vm3, %v246_v24, 8 }
 0x19e   :  { %v216_v30 = vmul.f32 1.442695, %v213_v27  ;;  %v261_v31 = vsel %vm197_vm2, %v250_v29, 2147483647  ;;  %v212_v32 = vsub.f32 %v188_v13, %v204_v28  ;;  %vm247_vm6 = vcmp.eq.f32.partialorder %v188_v13, %v204_v28 }
 0x19f   :  { %v262_v33 = vrot.slane %v261_v31, 4  ;;  %v249_v34 = vsel %vm247_vm6, %v246_v24, 8  ;;  %v241_v35 = vsel %vm240_vm4, %v211_v25, %v204_v28 }
 0x1a0   :  { %355 = vpow2.f32 %v216_v30  ;;  %v214_v36 = vmul.f32 1.442695, %v212_v32  ;;  %v251_v37 = vsel %vm197_vm2, %v249_v34, 2147483647  ;;  %244 = vst.msk [vmem:[#allocation2] sm:$0x3] %vm243_vm5, %v241_v35 }
 0x1a1   :  { %vm263_vm7 = vcmp.lt.s32.totalorder %v261_v31, %v262_v33  ;;  %v252_v38 = vrot.slane %v251_v37, 4 }
 0x1a2   :  { %374 = shalt.err (!%p371_p4)
}
 0x1a3   :  { %282 = dma.vmem_to_hbm [thread:$0]  %s280_s1, 32, %s518_s3, [#allocation3]   ;;  %v264_v39 = vsel %vm263_vm7, %v261_v31, %v262_v33  ;;  %357 = vpow2.f32 %v214_v36  ;;  %vm253_vm8 = vcmp.lt.s32.totalorder %v251_v37, %v252_v38 }
 0x1a4   :  { %v265_v40 = vrot.slane %v264_v39, 2  ;;  %v254_v41 = vsel %vm253_vm8, %v251_v37, %v252_v38  ;;  %s428_s11 = smov [#allocation4]  }
 0x1a5   :  { %v255_v42 = vrot.slane %v254_v41, 2  ;;  %s289_s12 = sshll.u32 %s428_s11, 4  ;;  %s290_s12 = int_to_ptr.vmem [resolvable:$true] %s289_s12 }
 0x1a6   :  { %vm266_vm9 = vcmp.lt.s32.totalorder %v264_v39, %v265_v40  ;;  %s383_s3 = scalar_lea.vmem %s290_s12, 32  ;;  %p388_p6 = scmp.lt.s32.totalorder %s290_s12, %s290_s12 }
 0x1a7   :  { %v267_v43 = vsel %vm266_vm9, %v264_v39, %v265_v40  ;;  %vm256_vm10 = vcmp.lt.s32.totalorder %v254_v41, %v255_v42  ;;  %p384_p5 = scmp.ne.s32.totalorder %s290_s12, %s383_s3  ;;  %p389_p7 = scmp.lt.s32.totalorder %s383_s3, %s383_s3 }
 0x1a8   :  { %v268_v44 = vrot.slane %v267_v43, 1  ;;  %v257_v45 = vsel %vm256_vm10, %v254_v41, %v255_v42 }
 0x1a9   :  { %v258_v46 = vrot.slane %v257_v45, 1  ;;  %p390_p8 = por %p389_p7, %p388_p6 }
 0x1aa   :  { %vm269_vm11 = vcmp.lt.s32.totalorder %v267_v43, %v268_v44 }
 0x1ab   :  { %vm259_vm12 = vcmp.lt.s32.totalorder %v257_v45, %v258_v46  ;;  %v270_v48 = vsel %vm269_vm11, %v267_v43, %v268_v44  ;;  %p391_p9 = pnand %p390_p8, %p384_p5 }
 0x1ac   :  { %v260_v47 = vsel %vm259_vm12, %v257_v45, %v258_v46 }
 0x1ad   :  { %v356_v49 = vpop.eup %355  ;;  %v271_v50 = vsel %vm240_vm4, %v270_v48, %v260_v47 }
 0x1ae   :  { %v225_v51 = vsel %vm197_vm2, %v356_v49, 0.0  ;;  %272 = vst.msk [vmem:[#allocation4] sm:$0x3] %vm243_vm5, %v271_v50 }
 0x1af   :  { %v226_v53 = vrot.slane %v225_v51, 4 }
 0x1b0   :  { %v358_v52 = vpop.eup %357 }
 0x1b1   :  { %394 = shalt.err (!%p391_p9)
}
 0x1b2   :  { %292 = dma.vmem_to_hbm [thread:$0]  %s290_s12, 32, %s519_s4, [#allocation5]   ;;  %v218_v54 = vsel %vm197_vm2, %v358_v52, 0.0  ;;  %v227_v55 = vadd.f32 %v226_v53, %v225_v51 }
 0x1b3   :  { %v219_v56 = vrot.slane %v218_v54, 4  ;;  %s429_s15 = smov [#allocation6]  }
 0x1b4   :  { %v228_v57 = vrot.slane %v227_v55, 2  ;;  %s298_s16 = sshll.u32 %s429_s15, 4  ;;  %s299_s16 = int_to_ptr.vmem [resolvable:$true] %s298_s16 }
 0x1b5   :  { %v220_v58 = vadd.f32 %v219_v56, %v218_v54  ;;  %s403_s4 = scalar_lea.vmem %s299_s16, 256  ;;  %p408_p11 = scmp.lt.s32.totalorder %s299_s16, %s299_s16 }
 0x1b6   :  { %v229_v59 = vadd.f32 %v228_v57, %v227_v55  ;;  %p404_p10 = scmp.ne.s32.totalorder %s299_s16, %s403_s4  ;;  %p409_p12 = scmp.lt.s32.totalorder %s403_s4, %s403_s4 }
 0x1b7   :  { %v221_v60 = vrot.slane %v220_v58, 2 }
 0x1b8   :  { %v230_v61 = vrot.slane %v229_v59, 1  ;;  %p410_p13 = por %p409_p12, %p408_p11 }
 0x1b9   :  { %v222_v62 = vadd.f32 %v221_v60, %v220_v58 }
 0x1ba   :  { %v231_v63 = vadd.f32 %v230_v61, %v229_v59  ;;  %p411_p0 = pnand %p410_p13, %p404_p10 }
 0x1bb   :  { %v223_v0 = vrot.slane %v222_v62, 1 }
 0x1bc   :  { %359 = vrcp.f32 %v231_v63 }
 0x1bd   :  { %v224_v1 = vadd.f32 %v223_v0, %v222_v62 }
 0x1bf   :  { %361 = vrcp.f32 %v224_v1 }
 0x1c9   :  { %v360_v2 = vpop.eup %359 }
 0x1ca   :  { %v235_v3 = vmul.f32 %v360_v2, %v356_v49 }
 0x1cc   :  { %v362_v4 = vpop.eup %361  ;;  %237 = vst.msk [vmem:[#allocation6 + $0x8] sm:$0xff] %vm197_vm2, %v235_v3 }
 0x1cd   :  { %v233_v5 = vmul.f32 %v362_v4, %v358_v52 }
 0x1cf   :  { %236 = vst.msk [vmem:[#allocation6] sm:$0xff] %vm197_vm2, %v233_v5 }
 0x1d0   :  { %414 = shalt.err (!%p411_p0)
}
 0x1d1   :  { %s430_s17 = smov 128   ;;  %s431_s18 = smov 8  }
 0x1d2   :  { %304 = dma.vmem_to_hbm [thread:$0]  %s299_s16, 256, %s520_s5, [#allocation5], %s430_s17, %s430_s17, %s431_s18  }
 0x1d3   :  { %423 = dma.done.wait [#allocation3], 32  }
 0x1d4   :  { %424 = vsyncadd [#allocation3], 4294967264 }
 0x1d5   :  { %425 = dma.done.wait [#allocation5], 288  }
 0x1d6   :  { %426 = vsyncadd [#allocation5], 4294967008 }
 0x1d7   :  { %314 = vsyncpa [#allocation3], 1 }
 0x1d8   :  { %315 = vsyncpa [#allocation5], 1 }

// kernel: qks_forward.4
= control target key start
LH: loop header
LB: loop body
LE: loop exit
PB: predicated region body
PF: predicated region fallthrough
CT: control target
= control target key end

     0   :  { %s5788_s29 = smov 0   ;;  %s6513_s0 = inlined_call_operand.vmem [shape: f32[16,32], index: 0, kind: input, shape index: {}]   ;;  %s6514_s1 = inlined_call_operand.vmem [shape: f32[1,32], index: 1, kind: input, shape index: {}]   ;;  %s6515_s2 = inlined_call_operand.vmem [shape: f32[1,32], index: 2, kind: input, shape index: {}]   ;;  %s6516_s3 = inlined_call_operand.vmem [shape: f32[32,32], index: 3, kind: input, shape index: {}]   ;;  %s6517_s4 = inlined_call_operand.vmem [shape: f32[2,32,96], index: 4, kind: input, shape index: {}]   ;;  %s6518_s5 = inlined_call_operand.vmem [shape: f32[2,1,96], index: 5, kind: input, shape index: {}]   ;;  %s6519_s6 = inlined_call_operand.vmem [shape: f32[2,32,32], index: 6, kind: input, shape index: {}]   ;;  %s6520_s7 = inlined_call_operand.vmem [shape: f32[2,1,32], index: 7, kind: input, shape index: {}]   ;;  %s6521_s8 = inlined_call_operand.vmem [shape: f32[2,1,32], index: 8, kind: input, shape index: {}]   ;;  %s6522_s9 = inlined_call_operand.vmem [shape: f32[2,1,32], index: 9, kind: input, shape index: {}]   ;;  %s6523_s10 = inlined_call_operand.vmem [shape: f32[2,32,32], index: 10, kind: input, shape index: {}]   ;;  %s6524_s11 = inlined_call_operand.vmem [shape: f32[2,1,32], index: 11, kind: input, shape index: {}]   ;;  %s6525_s12 = inlined_call_operand.vmem [shape: f32[2,32,64], index: 12, kind: input, shape index: {}]   ;;  %s6526_s13 = inlined_call_operand.vmem [shape: f32[2,1,64], index: 13, kind: input, shape index: {}]   ;;  %s6527_s14 = inlined_call_operand.vmem [shape: f32[2,32,32], index: 14, kind: input, shape index: {}]   ;;  %s6528_s15 = inlined_call_operand.vmem [shape: f32[2,1,32], index: 15, kind: input, shape index: {}]   ;;  %s6529_s16 = inlined_call_operand.vmem [shape: f32[2,1,32], index: 16, kind: input, shape index: {}]   ;;  %s6530_s17 = inlined_call_operand.vmem [shape: f32[2,1,32], index: 17, kind: input, shape index: {}]   ;;  %s6531_s18 = inlined_call_operand.vmem [shape: f32[2,32,64], index: 18, kind: input, shape index: {}]   ;;  %s6532_s19 = inlined_call_operand.vmem [shape: f32[2,1,64], index: 19, kind: input, shape index: {}]   ;;  %s6533_s20 = inlined_call_operand.vmem [shape: f32[2,64,32], index: 20, kind: input, shape index: {}]   ;;  %s6534_s21 = inlined_call_operand.vmem [shape: f32[2,1,32], index: 21, kind: input, shape index: {}]   ;;  %s6535_s22 = inlined_call_operand.vmem [shape: f32[2,1,32], index: 22, kind: input, shape index: {}]   ;;  %s6536_s23 = inlined_call_operand.vmem [shape: f32[2,1,32], index: 23, kind: input, shape index: {}]   ;;  %s6537_s24 = inlined_call_operand.vmem [shape: f32[16,32], index: 24, kind: output, shape index: {0}]   ;;  %s6538_s25 = inlined_call_operand.vmem [shape: f32[2,2,4,8,16], index: 25, kind: output, shape index: {1}]  }
   0x1   :  { %6546 = sst [smem:[#allocation6_spill]] %s6513_s0 }
   0x2   :  { %6547 = sst [smem:[#allocation7_spill]] %s6514_s1 }
   0x3   :  { %6548 = sst [smem:[#allocation8_spill]] %s6515_s2 }
   0x4   :  { %6549 = sst [smem:[#allocation9_spill]] %s6516_s3 }
   0x5   :  { %6550 = sst [smem:[#allocation10_spill]] %s6517_s4 }
   0x6   :  { %6551 = sst [smem:[#allocation11_spill]] %s6518_s5 }
   0x7   :  { %6552 = sst [smem:[#allocation12_spill]] %s6519_s6 }
   0x8   :  { %6553 = sst [smem:[#allocation13_spill]] %s6520_s7 }
   0x9   :  { %6554 = sst [smem:[#allocation14_spill]] %s6521_s8 }
   0xa   :  { %6555 = sst [smem:[#allocation15_spill]] %s6522_s9 }
   0xb   :  { %6556 = sst [smem:[#allocation16_spill]] %s6523_s10 }
   0xc   :  { %6557 = sst [smem:[#allocation17_spill]] %s6525_s12 }
   0xd   :  { %6558 = sst [smem:[#allocation18_spill]] %s6527_s14 }
   0xe   :  { %6559 = sst [smem:[#allocation19_spill]] %s6530_s17 }
   0xf   :  { %6560 = sst [smem:[#allocation20_spill]] %s6531_s18 }
  0x10   :  { %6561 = sst [smem:[#allocation21_spill]] %s6532_s19 }
  0x11   :  { %6562 = sst [smem:[#allocation22_spill]] %s6533_s20 }
  0x12   :  { %6563 = sst [smem:[#allocation23_spill]] %s6534_s21 }
  0x13   :  { %6564 = sst [smem:[#allocation24_spill]] %s6535_s22 }
  0x14   :  { %6565 = sst [smem:[#allocation25_spill]] %s6536_s23 }
  0x15   :  { %6566 = sst [smem:[#allocation26_spill]] %s6537_s24 }
  0x16   :  { %6567 = sst [smem:[#allocation27_spill]] %s6538_s25 }
  0x17 LB: > { %6568 = sst [smem:[#allocation3_spill]] %s5640_s29  ;;  %s5794_s2 = sadd.s32 4294967295, %s5640_s29   ;;  %s5640_s29 = sphi %s5788_s29, %s36_s29  }
  0x18   : > { %6569 = sst [smem:[#allocation4_spill]] %s5794_s2  ;;  %p4996_p0 = scmp.ge.s32.totalorder %s5640_s29, 1 }
  0x19   : > { %p849_p1 = scmp.lt.s32.totalorder %s5640_s29, 3 }
  0x1b   : > { %p850_p2 = pnand %p4996_p0, %p849_p1 }
  0x1d   : > { %853 = sbr.rel (%p850_p2) target bundleno = 7078 (0x1ba6), region = 116 }
  0x22   : > { %p986_p3 = scmp.lt.s32.totalorder %s5794_s2, 1  ;;  %s6571_s4 = sld [smem:[#allocation10_spill]] }
  0x23   : > { %s6573_s0 = sld [smem:[#allocation12_spill]] }
  0x24   : > { %s5800_s6 = scalar_select %p986_p3, %s5794_s2, 1 }
  0x25   : > { %s6577_s10 = sld [smem:[#allocation16_spill]] }
  0x26   : > { %s5110_s30 = sshll.u32 %s5800_s6, 5  ;;  %s6578_s12 = sld [smem:[#allocation17_spill]] }
  0x27   : > { %s6579_s14 = sld [smem:[#allocation18_spill]] }
  0x28   : > { %s5810_s28 = scalar_lea.vmem %s6571_s4, %s5110_s30  ;;  %s6581_s18 = sld [smem:[#allocation20_spill]] }
  0x29   : > { %6572 = sst [smem:[#allocation5_spill]] %s5810_s28  ;;  %s5815_s29 = scalar_lea.vmem %s6573_s0, %s5110_s30 }
  0x2a   : > { %s6583_s20 = sld [smem:[#allocation22_spill]] }
  0x2b   : > { %s5832_s9 = scalar_lea.vmem %s6577_s10, %s5110_s30  ;;  %s6584_s24 = sld [smem:[#allocation23_spill]] }
  0x2c   : > { %s5841_s22 = scalar_lea.vmem %s6578_s12, %s5110_s30  ;;  %s5116_s12 = sshll.u32 %s5800_s6, 6 }
  0x2d   : > { %s5850_s4 = scalar_lea.vmem %s6579_s14, %s5110_s30  ;;  %s6587_s1 = sld [smem:[#allocation27_spill]] }
  0x2e   : > { %s5867_s3 = scalar_lea.vmem %s6581_s18, %s5110_s30  ;;  %s6588_s21 = sld [smem:[#allocation4_spill]] }
  0x30   : > { %s5877_s26 = scalar_lea.vmem %s6583_s20, %s5116_s12 }
  0x31   : > { %s1053_s25 = scalar_lea.vmem %s6584_s24, %s5800_s6 }
  0x33   : > { %s5894_s19 = scalar_lea.vmem %s6587_s1, %s5116_s12 }
  0x34   : > { %p5013_p4 = scmp.ne.s32.totalorder %s6588_s21, 0 }
  0x35   : > { %s6589_s5 = sld [smem:[#allocation6_spill]] (!%p5013_p4) }
  0x36   : > { %1068 = sbr.rel (%p5013_p4) target bundleno = 373 (0x175), region = 120  ;;  %s6590_s18 = sld [smem:[#allocation7_spill]] (!%p5013_p4) }
  0x37   : > { %s6591_s0 = sld [smem:[#allocation8_spill]] (!%p5013_p4) }
  0x38   : > { %s6592_s7 = sld [smem:[#allocation26_spill]] (!%p5013_p4) }
  0x3b   : > { %v1069_v0 = vld [vmem:[%s6589_s5] sm:$0xff]  ;;  %vm1073_vm0 = vcmask 261120   ;;  %v1070_v1 = vld [vmem:[%s6589_s5 + $0x8] sm:$0xff] }
  0x3c   : > { %v1074_v2 = vsel %vm1073_vm0, %v1069_v0, 0.0  ;;  %v1077_v3 = vsel %vm1073_vm0, %v1070_v1, 0.0  ;;  %v5014_v21 = vld [vmem:[%s6590_s18] ss:$0 sm:$0xff] }
  0x3d   : > { %1075 = vadd.xlane.f32.xlu0 %v1074_v2  ;;  %v5015_v23 = vld [vmem:[%s6591_s0] ss:$0 sm:$0xff] }
  0x41   : > { %1078 = vadd.xlane.f32.xlu0 %v1077_v3 }
  0xc6   : > { %v1076_v4 = vpop.xlane.xlu0 %1075 }
  0xc7   : > { %v1081_v5 = vmul.f32 0.03125, %v1076_v4 }
  0xc9   : > { %v1083_v6 = vsub.f32 %v1069_v0, %v1081_v5 }
  0xca   : > { %v1079_v7 = vpop.xlane.xlu0 %1078 }
  0xcb   : > { %v1082_v8 = vmul.f32 0.03125, %v1079_v7  ;;  %v1085_v9 = vmul.f32 %v1083_v6, %v1083_v6 }
  0xcd   : > { %v1084_v10 = vsub.f32 %v1070_v1, %v1082_v8  ;;  %v1087_v11 = vsel %vm1073_vm0, %v1085_v9, 0.0 }
  0xce   : > { %1088 = vadd.xlane.f32.xlu1 %v1087_v11 }
  0xcf   : > { %v1086_v12 = vmul.f32 %v1084_v10, %v1084_v10 }
  0xd1   : > { %v1090_v13 = vsel %vm1073_vm0, %v1086_v12, 0.0 }
  0xd2   : > { %1091 = vadd.xlane.f32.xlu1 %v1090_v13 }
 0x157   : > { %v1089_v14 = vpop.xlane.xlu1 %1088 }
 0x158   : > { %v1093_v15 = vmul.f32 0.03125, %v1089_v14 }
 0x15a   : > { %v1095_v16 = vadd.f32 1e-12, %v1093_v15 }
 0x15b   : > { %v1092_v17 = vpop.xlane.xlu1 %1091 }
 0x15c   : > { %5550 = vrsqrt.f32 %v1095_v16  ;;  %v1094_v18 = vmul.f32 0.03125, %v1092_v17 }
 0x15e   : > { %v1096_v19 = vadd.f32 1e-12, %v1094_v18 }
 0x160   : > { %5552 = vrsqrt.f32 %v1096_v19 }
 0x169   : > { %v5551_v20 = vpop.eup %5550 }
 0x16a   : > { %v1099_v22 = vmul.f32 %v5551_v20, %v1083_v6 }
 0x16c   : > { %v1107_v24 = vmul.f32 %v5014_v21, %v1099_v22 }
 0x16d   : > { %v5553_v25 = vpop.eup %5552 }
 0x16e   : > { %v1115_v26 = vadd.f32 %v5015_v23, %v1107_v24  ;;  %v1100_v27 = vmul.f32 %v5553_v25, %v1084_v10 }
 0x170   : > { %1117 = vst.msk [vmem:[%s6592_s7] sm:$0xff] %vm1073_vm0, %v1115_v26  ;;  %v1108_v28 = vmul.f32 %v5014_v21, %v1100_v27 }
 0x172   : > { %v1116_v29 = vadd.f32 %v5015_v23, %v1108_v28 }
 0x174   : > { %1118 = vst.msk [vmem:[%s6592_s7 + $0x8] sm:$0xff] %vm1073_vm0, %v1116_v29 }
 0x175 PF: > { %s6593_s21 = sld [smem:[#allocation5_spill]]  ;;  %vm1132_vm1 = vcmask 261120   ;;  %v5642_v36 = vmov 0.0   ;;  %vm5643_vm2 = vmmov 0   ;;  %s5644_s2 = smov 120   ;;  %vm1217_vm3 = vcmask 64512  }
 0x176   : > { %s6594_s23 = sld [smem:[#allocation26_spill]]  ;;  %5267 = vmatprep.subr.mxu0 %v5642_v36  ;;  %5269 = vmatprep.mubr.msk.f32.mxu0 %vm5643_vm2, %v5642_v36  ;;  %s5645_s30 = smov 96   ;;  %vm1551_vm4 = vcmask 130112   ;;  %vm1723_vm5 = vcmask 195712   ;;  %vm1895_vm6 = vcmask 261312   ;;  %vm3001_vm7 = vcmask 130048  }
 0x177   : > { %s6595_s1 = sld [smem:[#allocation11_spill]]  ;;  %s5646_s7 = smov 80   ;;  %vm4612_vm8 = vcmask 523264  }
 0x178   : > { %s5647_s8 = smov 88   ;;  %s5648_s27 = smov 72  }
 0x179   : > { %s5650_s28 = smov 104   ;;  %s5651_s24 = smov 56  }
 0x17a   : > { %s5652_s12 = smov 64   ;;  %s5653_s14 = smov 40  }
 0x17b   : > { %v1124_v30 = vld [vmem:[%s6593_s21 + $0x18] sm:$0xff]  ;;  %v1123_v31 = vld [vmem:[%s6593_s21 + $0x10] sm:$0xff]  ;;  %v1122_v33 = vld [vmem:[%s6593_s21 + $0x8] sm:$0xff]  ;;  %s5654_s18 = smov 48   ;;  %s5655_s20 = smov 8  }
 0x17c   : > { %5246 = vmatprep.subr.mxu1 %v1124_v30  ;;  %v5926_v32 = vld [vmem:[%s6594_s23] sm:$0xff]  ;;  %v5935_v35 = vld [vmem:[%s6594_s23 + $0x8] sm:$0xff]  ;;  %s6602_s17 = sld [smem:[#allocation15_spill]] }
 0x17d   : > { %5247 = vmatpush3.msra.mxu1 %v1124_v30  ;;  %5254 = vmatprep.mubr.msk.f32.mxu1 %vm1132_vm1, %v5926_v32  ;;  %v1121_v34 = vld [vmem:[%s6593_s21] sm:$0xff]  ;;  %s6596_s0 = scalar_lea.vmem %s6595_s1, %s5800_s6  ;;  %s5649_s21 = smov 112  }
 0x17e   : > { %5248 = vmatprep.subr.mxu1 %v1123_v31  ;;  %v5016_v38 = vld [vmem:[%s6596_s0] ss:$0 sm:$0xff]  ;;  %s5656_s1 = smov 16   ;;  %s5657_s0 = smov 24  }
 0x17f   : > { %5249 = vmatpush3.msra.mxu1 %v1123_v31 }
 0x180   : > { %5250 = vmatprep.subr.mxu1 %v1122_v33 }
 0x181   : > { %5251 = vmatpush3.msra.mxu1 %v1122_v33 }
 0x182   : > { %5252 = vmatprep.subr.mxu1 %v1121_v34  ;;  %s6603_s10 = scalar_lea.vmem %s6602_s17, %s5800_s6  ;;  %s6605_s17 = scalar_lea.vmem %s6524_s11, %s5800_s6 }
 0x183   : > { %5253 = vmatpush3.msra.mxu1 %v1121_v34 }
 0x184   : > { %5255 = vmatmul.mubr.msk.f32.vlgmr.msra.gmra.mxu1 %vm1132_vm1, %v5935_v35  ;;  %5257 = vmatprep.subr.mxu1 %v5642_v36 }
 0x185   : > { %5259 = vmatprep.mubr.msk.f32.mxu1 %vm5643_vm2, %v5642_v36 }
 0x244   : > { %v5256_v37 = vpop.f32.mrf.mxu1 }
 0x245   : > { %v5964_v41 = vadd.f32 %v5256_v37, %v5016_v38 }
 0x246   : > { %v1205_v39 = vpop.f32.mrf.mxu1 }
 0x247   : > { %v5950_v40 = vadd.f32 %v5016_v38, %v1205_v39 }
 0x249   : > { %1381 = vrot.lane.b32.xlu1 %v5950_v40, %s5644_s2  ;;  %1215 = vrot.lane.b32.xlu0 %v5950_v40, %s5645_s30 }
 0x24d   : > { %1555 = vrot.lane.b32.xlu1 %v5950_v40, %s5646_s7  ;;  %1383 = vrot.lane.b32.xlu0 %v5950_v40, %s5647_s8 }
 0x251   : > { %1727 = vrot.lane.b32.xlu1 %v5950_v40, %s5648_s27  ;;  %1553 = vrot.lane.b32.xlu0 %v5950_v40, %s5649_s21 }
 0x255   : > { %1898 = vrot.lane.b32.xlu1 %v5964_v41, %s5645_s30  ;;  %1725 = vrot.lane.b32.xlu0 %v5950_v40, %s5650_s28 }
 0x259   : > { %2063 = vrot.lane.b32.xlu1 %v5964_v41, %s5644_s2  ;;  %2065 = vrot.lane.b32.xlu0 %v5964_v41, %s5647_s8 }
 0x25d   : > { %2234 = vrot.lane.b32.xlu1 %v5964_v41, %s5649_s21  ;;  %2236 = vrot.lane.b32.xlu0 %v5964_v41, %s5646_s7 }
 0x261   : > { %2405 = vrot.lane.b32.xlu1 %v5964_v41, %s5650_s28  ;;  %2407 = vrot.lane.b32.xlu0 %v5964_v41, %s5648_s27 }
 0x265   : > { %1471 = vrot.lane.b32.xlu1 %v5950_v40, %s5651_s24  ;;  %1304 = vrot.lane.b32.xlu0 %v5950_v40, %s5652_s12 }
 0x2bb   : > { %v1382_v42 = vpop.permute.xlu1 %1381  ;;  %v1216_v43 = vpop.permute.xlu0 %1215 }
 0x2bc   : > { %5258 = vmatpush3.xpose.msk.msra.mxu1 %vm1217_vm3, %v1216_v43 }
 0x2bd   : > { %5262 = vmatprep.subr.mxu1 %v5642_v36 }
 0x2bf   : > { %v1556_v44 = vpop.permute.xlu1 %1555  ;;  %5260 = vmatmul.mubr.msk.f32.vlgmr.msra.gmra.mxu1 %vm1217_vm3, %v5950_v40  ;;  %v1384_v45 = vpop.permute.xlu0 %1383 }
 0x2c0   : > { %5268 = vmatpush3.xpose.msk.msra.mxu0 %vm1217_vm3, %v1384_v45  ;;  %5264 = vmatprep.mubr.msk.f32.mxu1 %vm5643_vm2, %v5642_v36 }
 0x2c1   : > { %5277 = vmatprep.subr.mxu0 %v5642_v36 }
 0x2c3   : > { %v1728_v46 = vpop.permute.xlu1 %1727  ;;  %5270 = vmatmul.mubr.msk.f32.vlgmr.msra.gmra.mxu0 %vm1217_vm3, %v1382_v42  ;;  %v1554_v47 = vpop.permute.xlu0 %1553 }
 0x2c4   : > { %5278 = vmatpush3.xpose.msk.msra.mxu0 %vm1217_vm3, %v1556_v44  ;;  %5279 = vmatprep.mubr.msk.f32.mxu0 %vm5643_vm2, %v5642_v36 }
 0x2c5   : > { %5287 = vmatprep.subr.mxu0 %v5642_v36 }
 0x2c7   : > { %5280 = vmatmul.mubr.msk.f32.vlgmr.msra.gmra.mxu0 %vm1217_vm3, %v1554_v47  ;;  %v1726_v48 = vpop.permute.xlu0 %1725  ;;  %v1899_v49 = vpop.permute.xlu1 %1898 }
 0x2c8   : > { %5288 = vmatpush3.xpose.msk.msra.mxu0 %vm1217_vm3, %v1728_v46  ;;  %5289 = vmatprep.mubr.msk.f32.mxu0 %vm5643_vm2, %v5642_v36 }
 0x2c9   : > { %5297 = vmatprep.subr.mxu0 %v5642_v36 }
 0x2cb   : > { %5290 = vmatmul.mubr.msk.f32.vlgmr.msra.gmra.mxu0 %vm1217_vm3, %v1726_v48  ;;  %v2066_v50 = vpop.permute.xlu0 %2065  ;;  %v2064_v51 = vpop.permute.xlu1 %2063 }
 0x2cc   : > { %5298 = vmatpush3.xpose.msk.msra.mxu0 %vm1217_vm3, %v1899_v49  ;;  %5299 = vmatprep.mubr.msk.f32.mxu0 %vm5643_vm2, %v5642_v36 }
 0x2cd   : > { %5307 = vmatprep.subr.mxu0 %v5642_v36 }
 0x2cf   : > { %5300 = vmatmul.mubr.msk.f32.vlgmr.msra.gmra.mxu0 %vm1217_vm3, %v5964_v41  ;;  %v2237_v52 = vpop.permute.xlu0 %2236  ;;  %v2235_v54 = vpop.permute.xlu1 %2234 }
 0x2d0   : > { %5308 = vmatpush3.xpose.msk.msra.mxu0 %vm1217_vm3, %v2066_v50  ;;  %5309 = vmatprep.mubr.msk.f32.mxu0 %vm5643_vm2, %v5642_v36 }
 0x2d1   : > { %5317 = vmatprep.subr.mxu0 %v5642_v36 }
 0x2d3   : > { %5310 = vmatmul.mubr.msk.f32.vlgmr.msra.gmra.mxu0 %vm1217_vm3, %v2064_v51  ;;  %v2408_v53 = vpop.permute.xlu0 %2407  ;;  %v2406_v56 = vpop.permute.xlu1 %2405 }
 0x2d4   : > { %5318 = vmatpush3.xpose.msk.msra.mxu0 %vm1217_vm3, %v2237_v52  ;;  %5319 = vmatprep.mubr.msk.f32.mxu0 %vm5643_vm2, %v5642_v36 }
 0x2d5   : > { %5327 = vmatprep.subr.mxu0 %v5642_v36 }
 0x2d7   : > { %5320 = vmatmul.mubr.msk.f32.vlgmr.msra.gmra.mxu0 %vm1217_vm3, %v2235_v54  ;;  %v1305_v55 = vpop.permute.xlu0 %1304  ;;  %v6038_v25 = vpop.permute.xlu1 %1471 }
 0x2d8   : > { %5263 = vmatpush3.msra.mxu1 %v1305_v55  ;;  %5328 = vmatpush3.xpose.msk.msra.mxu0 %vm1217_vm3, %v2408_v53 }
 0x2d9   : > { %5329 = vmatprep.mubr.msk.f32.mxu0 %vm5643_vm2, %v5642_v36  ;;  %5272 = vmatprep.subr.mxu1 %v5642_v36 }
 0x2db   : > { %5330 = vmatmul.mubr.msk.f32.vlgmr.msra.gmra.mxu0 %vm1217_vm3, %v2406_v56 }
 0x37f   : > { %v1288_v57 = vpop.f32.mrf.mxu1 }
 0x380   : > { %v1292_v58 = vmul.f32 0.35355338, %v1288_v57 }
 0x381   : > { %v5261_v59 = vpop.f32.mrf.mxu1 }
 0x382   : > { %v1293_v60 = vsel %vm1217_vm3, %v1292_v58, -inf }
 0x383   : > { %1294 = vmax.xlane.f32.xlu0 %v1293_v60  ;;  %v1455_v61 = vpop.f32.mrf.mxu0 }
 0x384   : > { %v1459_v62 = vmul.f32 0.35355338, %v1455_v61 }
 0x385   : > { %v5271_v63 = vpop.f32.mrf.mxu0 }
 0x386   : > { %v1460_v0 = vsel %vm1217_vm3, %v1459_v62, -inf }
 0x387   : > { %1461 = vmax.xlane.f32.xlu1 %v1460_v0  ;;  %v1627_v1 = vpop.f32.mrf.mxu0 }
 0x388   : > { %v1631_v2 = vmul.f32 0.35355338, %v1627_v1 }
 0x389   : > { %v5281_v3 = vpop.f32.mrf.mxu0 }
 0x38a   : > { %v1632_v4 = vsel %vm1217_vm3, %v1631_v2, -inf }
 0x38b   : > { %1633 = vmax.xlane.f32.xlu0 %v1632_v4  ;;  %v1799_v5 = vpop.f32.mrf.mxu0 }
 0x38c   : > { %v1803_v6 = vmul.f32 0.35355338, %v1799_v5 }
 0x38d   : > { %v5291_v7 = vpop.f32.mrf.mxu0 }
 0x38e   : > { %v1804_v8 = vsel %vm1217_vm3, %v1803_v6, -inf }
 0x38f   : > { %1805 = vmax.xlane.f32.xlu0 %v1804_v8  ;;  %v1970_v9 = vpop.f32.mrf.mxu0 }
 0x390   : > { %v1974_v10 = vmul.f32 0.35355338, %v1970_v9 }
 0x391   : > { %v5301_v11 = vpop.f32.mrf.mxu0 }
 0x392   : > { %v1975_v12 = vsel %vm1217_vm3, %v1974_v10, -inf }
 0x393   : > { %1976 = vmax.xlane.f32.xlu1 %v1975_v12  ;;  %v2137_v13 = vpop.f32.mrf.mxu0 }
 0x394   : > { %v2141_v14 = vmul.f32 0.35355338, %v2137_v13 }
 0x395   : > { %v5311_v15 = vpop.f32.mrf.mxu0 }
 0x396   : > { %v2142_v16 = vsel %vm1217_vm3, %v2141_v14, -inf }
 0x397   : > { %2143 = vmax.xlane.f32.xlu0 %v2142_v16  ;;  %v2308_v17 = vpop.f32.mrf.mxu0 }
 0x398   : > { %v2312_v18 = vmul.f32 0.35355338, %v2308_v17 }
 0x399   : > { %v5321_v19 = vpop.f32.mrf.mxu0 }
 0x39a   : > { %v2313_v20 = vsel %vm1217_vm3, %v2312_v18, -inf }
 0x39b   : > { %2314 = vmax.xlane.f32.xlu1 %v2313_v20  ;;  %v2479_v21 = vpop.f32.mrf.mxu0 }
 0x39c   : > { %v2483_v22 = vmul.f32 0.35355338, %v2479_v21 }
 0x39d   : > { %v5331_v23 = vpop.f32.mrf.mxu0 }
 0x39e   : > { %v2484_v24 = vsel %vm1217_vm3, %v2483_v22, -inf }
 0x39f   : > { %2485 = vmax.xlane.f32.xlu0 %v2484_v24 }
 0x3ac   : > { %1815 = vrot.lane.b32.xlu1 %v5950_v40, %s5653_s14 }
 0x3b5   : > { %1643 = vrot.lane.b32.xlu0 %v5950_v40, %s5654_s18 }
 0x40c   : > { %v1295_v26 = vpop.xlane.xlu0 %1294 }
 0x40d   : > { %v1296_v27 = vsub.f32 %v1292_v58, %v1295_v26 }
 0x40f   : > { %v1297_v28 = vmul.f32 1.442695, %v1296_v27 }
 0x410   : > { %v1462_v29 = vpop.xlane.xlu1 %1461 }
 0x411   : > { %5554 = vpow2.f32 %v1297_v28  ;;  %v1463_v30 = vsub.f32 %v1459_v62, %v1462_v29 }
 0x413   : > { %v1464_v31 = vmul.f32 1.442695, %v1463_v30 }
 0x414   : > { %v1634_v33 = vpop.xlane.xlu0 %1633 }
 0x415   : > { %5556 = vpow2.f32 %v1464_v31  ;;  %v1635_v34 = vsub.f32 %v1631_v2, %v1634_v33 }
 0x417   : > { %v1636_v37 = vmul.f32 1.442695, %v1635_v34 }
 0x418   : > { %v1806_v38 = vpop.xlane.xlu0 %1805 }
 0x419   : > { %5558 = vpow2.f32 %v1636_v37  ;;  %v1807_v39 = vsub.f32 %v1803_v6, %v1806_v38 }
 0x41b   : > { %v1808_v42 = vmul.f32 1.442695, %v1807_v39 }
 0x41c   : > { %v1977_v50 = vpop.xlane.xlu1 %1976 }
 0x41d   : > { %5560 = vpow2.f32 %v1808_v42  ;;  %v1978_v51 = vsub.f32 %v1974_v10, %v1977_v50 }
 0x41e   : > { %v5555_v43 = vpop.eup %5554 }
 0x41f   : > { %v1299_v40 = vsel %vm1217_vm3, %v5555_v43, 0.0  ;;  %v1979_v55 = vmul.f32 1.442695, %v1978_v51  ;;  %v2579_v51 = vld [vmem:[%s5815_s29 + $0x8] sm:$0xff] }
 0x420   : > { %1300 = vadd.xlane.f32.xlu1 %v1299_v40  ;;  %v2144_v52 = vpop.xlane.xlu0 %2143 }
 0x421   : > { %v2145_v54 = vsub.f32 %v2141_v14, %v2144_v52  ;;  %5562 = vpow2.f32 %v1979_v55 }
 0x422   : > { %v5557_v44 = vpop.eup %5556 }
 0x423   : > { %v1466_v45 = vsel %vm1217_vm3, %v5557_v44, 0.0  ;;  %v2146_v58 = vmul.f32 1.442695, %v2145_v54 }
 0x424   : > { %1467 = vadd.xlane.f32.xlu0 %v1466_v45  ;;  %v2315_v53 = vpop.xlane.xlu1 %2314 }
 0x425   : > { %v2316_v56 = vsub.f32 %v2312_v18, %v2315_v53  ;;  %5564 = vpow2.f32 %v2146_v58  ;;  %v2578_v53 = vld [vmem:[%s5815_s29] sm:$0xff] }
 0x426   : > { %v5559_v46 = vpop.eup %5558 }
 0x427   : > { %v1638_v47 = vsel %vm1217_vm3, %v5559_v46, 0.0  ;;  %v2317_v59 = vmul.f32 1.442695, %v2316_v56 }
 0x428   : > { %1639 = vadd.xlane.f32.xlu1 %v1638_v47  ;;  %v2486_v57 = vpop.xlane.xlu0 %2485  ;;  %v1816_v6 = vpop.permute.xlu1 %1815 }
 0x429   : > { %v2487_v60 = vsub.f32 %v2483_v22, %v2486_v57  ;;  %5566 = vpow2.f32 %v2317_v59 }
 0x42a   : > { %v6043_v48 = vpop.eup %5560 }
 0x42b   : > { %v1810_v49 = vsel %vm1217_vm3, %v6043_v48, 0.0  ;;  %v2488_v61 = vmul.f32 1.442695, %v2487_v60 }
 0x42c   : > { %1811 = vadd.xlane.f32.xlu0 %v1810_v49  ;;  %v1644_v7 = vpop.permute.xlu0 %1643  ;;  %v2580_v49 = vld [vmem:[%s5815_s29 + $0x10] sm:$0xff] }
 0x42d   : > { %5568 = vpow2.f32 %v2488_v61 }
 0x42e   : > { %v5563_v62 = vpop.eup %5562 }
 0x42f   : > { %v1981_v0 = vsel %vm1217_vm3, %v5563_v62, 0.0 }
 0x432   : > { %v6051_v63 = vpop.eup %5564 }
 0x433   : > { %v2148_v3 = vsel %vm1217_vm3, %v6051_v63, 0.0 }
 0x436   : > { %v6054_v1 = vpop.eup %5566 }
 0x437   : > { %v2319_v2 = vsel %vm1217_vm3, %v6054_v1, 0.0 }
 0x439   : > { %2153 = vrot.lane.b32.xlu1 %v5964_v41, %s5651_s24  ;;  %s6599_s24 = sld [smem:[#allocation9_spill]] }
 0x43a   : > { %v6060_v4 = vpop.eup %5568 }
 0x43b   : > { %v2490_v5 = vsel %vm1217_vm3, %v6060_v4, 0.0 }
 0x442   : > { %1986 = vrot.lane.b32.xlu0 %v5964_v41, %s5652_s12  ;;  %s6597_s12 = sld [smem:[#allocation13_spill]] }
 0x45d   : > { %1982 = vadd.xlane.f32.xlu1 %v1981_v0 }
 0x461   : > { %2320 = vadd.xlane.f32.xlu1 %v2319_v2  ;;  %2149 = vadd.xlane.f32.xlu0 %v2148_v3 }
 0x465   : > { %2491 = vadd.xlane.f32.xlu1 %v2490_v5 }
 0x476   : > { %2495 = vrot.lane.b32.xlu1 %v5964_v41, %s5653_s14  ;;  %s6598_s14 = scalar_lea.vmem %s6597_s12, %s5800_s6 }
 0x477   : > { %2324 = vrot.lane.b32.xlu0 %v5964_v41, %s5654_s18  ;;  %v5043_v3 = vld [vmem:[%s6598_s14] ss:$0 sm:$0xff] }
 0x4a9   : > { %v1301_v8 = vpop.xlane.xlu1 %1300 }
 0x4aa   : > { %5570 = vrcp.f32 %v1301_v8 }
 0x4ad   : > { %v1468_v9 = vpop.xlane.xlu0 %1467 }
 0x4ae   : > { %5572 = vrcp.f32 %v1468_v9 }
 0x4b1   : > { %v1640_v10 = vpop.xlane.xlu1 %1639 }
 0x4b2   : > { %5574 = vrcp.f32 %v1640_v10 }
 0x4b5   : > { %v1812_v11 = vpop.xlane.xlu0 %1811  ;;  %v2154_v20 = vpop.permute.xlu1 %2153 }
 0x4b6   : > { %5576 = vrcp.f32 %v1812_v11 }
 0x4b7   : > { %v5571_v12 = vpop.eup %5570 }
 0x4b8   : > { %v1303_v13 = vmul.f32 %v5571_v12, %v5555_v43 }
 0x4b9   : > { %v1987_v19 = vpop.permute.xlu0 %1986 }
 0x4ba   : > { %5265 = vmatmul.mubr.msk.f32.vlgmr.msra.gmra.mxu1 %vm1217_vm3, %v1303_v13 }
 0x4bb   : > { %v5573_v14 = vpop.eup %5572  ;;  %5273 = vmatpush3.msra.mxu1 %v6038_v25  ;;  %5274 = vmatprep.mubr.msk.f32.mxu1 %vm5643_vm2, %v5642_v36 }
 0x4bc   : > { %5282 = vmatprep.subr.mxu1 %v5642_v36  ;;  %v1470_v41 = vmul.f32 %v5573_v14, %v5557_v44 }
 0x4be   : > { %5275 = vmatmul.mubr.msk.f32.vlgmr.msra.gmra.mxu1 %vm1217_vm3, %v1470_v41 }
 0x4bf   : > { %v5575_v15 = vpop.eup %5574  ;;  %5283 = vmatpush3.msra.mxu1 %v1644_v7  ;;  %5284 = vmatprep.mubr.msk.f32.mxu1 %vm5643_vm2, %v5642_v36 }
 0x4c0   : > { %5292 = vmatprep.subr.mxu1 %v5642_v36  ;;  %v1642_v16 = vmul.f32 %v5575_v15, %v5559_v46 }
 0x4c2   : > { %5285 = vmatmul.mubr.msk.f32.vlgmr.msra.gmra.mxu1 %vm1217_vm3, %v1642_v16 }
 0x4c3   : > { %v5577_v17 = vpop.eup %5576  ;;  %5293 = vmatpush3.msra.mxu1 %v1816_v6  ;;  %5294 = vmatprep.mubr.msk.f32.mxu1 %vm5643_vm2, %v5642_v36 }
 0x4c4   : > { %5302 = vmatprep.subr.mxu1 %v5642_v36  ;;  %v1814_v18 = vmul.f32 %v5577_v17, %v6043_v48  ;;  %v2581_v48 = vld [vmem:[%s5815_s29 + $0x18] sm:$0xff]  ;;  %s6600_s29 = sld [smem:[#allocation14_spill]] }
 0x4c5   : > { %5337 = vmatprep.subr.mxu0 %v2581_v48 }
 0x4c6   : > { %5295 = vmatmul.mubr.msk.f32.vlgmr.msra.gmra.mxu1 %vm1217_vm3, %v1814_v18  ;;  %5338 = vmatpush3.msra.mxu0 %v2581_v48 }
 0x4c7   : > { %5303 = vmatpush3.msra.mxu1 %v1987_v19  ;;  %5304 = vmatprep.mubr.msk.f32.mxu1 %vm5643_vm2, %v5642_v36  ;;  %v2816_v19 = vld [vmem:[%s5841_s22 + $0x18] sm:$0xff] }
 0x4c8   : > { %5312 = vmatprep.subr.mxu1 %v5642_v36  ;;  %5339 = vmatprep.subr.mxu0 %v2580_v49 }
 0x4c9   : > { %5340 = vmatpush3.msra.mxu0 %v2580_v49 }
 0x4ca   : > { %5341 = vmatprep.subr.mxu0 %v2579_v51  ;;  %s6601_s12 = scalar_lea.vmem %s6600_s29, %s5800_s6 }
 0x4cb   : > { %5342 = vmatpush3.msra.mxu0 %v2579_v51 }
 0x4cc   : > { %5343 = vmatprep.subr.mxu0 %v2578_v53 }
 0x4cd   : > { %5344 = vmatpush3.msra.mxu0 %v2578_v53 }
 0x4ce   : > { %5359 = vmatprep.subr.mxu0 %v2816_v19 }
 0x4e6   : > { %v1983_v21 = vpop.xlane.xlu1 %1982 }
 0x4e7   : > { %5578 = vrcp.f32 %v1983_v21  ;;  %v2720_v21 = vld [vmem:[%s5832_s9 + $0x18] sm:$0xff] }
 0x4ea   : > { %v2321_v22 = vpop.xlane.xlu1 %2320  ;;  %v2150_v23 = vpop.xlane.xlu0 %2149 }
 0x4eb   : > { %5580 = vrcp.f32 %v2150_v23  ;;  %v2814_v23 = vld [vmem:[%s5841_s22 + $0x8] sm:$0xff] }
 0x4ec   : > { %5582 = vrcp.f32 %v2321_v22  ;;  %v2809_v22 = vld [vmem:[%s6599_s24] sm:$0xff] }
 0x4ee   : > { %v2492_v24 = vpop.xlane.xlu1 %2491  ;;  %v2325_v30 = vpop.permute.xlu0 %2324 }
 0x4ef   : > { %5584 = vrcp.f32 %v2492_v24  ;;  %v2719_v24 = vld [vmem:[%s5832_s9 + $0x10] sm:$0xff] }
 0x4f2   : > { %v2496_v34 = vpop.permute.xlu1 %2495 }
 0x4f4   : > { %v5579_v25 = vpop.eup %5578 }
 0x4f5   : > { %v1985_v26 = vmul.f32 %v5579_v25, %v5563_v62  ;;  %v2813_v25 = vld [vmem:[%s5841_s22] sm:$0xff] }
 0x4f7   : > { %5305 = vmatmul.mubr.msk.f32.vlgmr.msra.gmra.mxu1 %vm1217_vm3, %v1985_v26  ;;  %v2718_v26 = vld [vmem:[%s5832_s9 + $0x8] sm:$0xff] }
 0x4f8   : > { %5313 = vmatpush3.msra.mxu1 %v2154_v20  ;;  %5314 = vmatprep.mubr.msk.f32.mxu1 %vm5643_vm2, %v5642_v36  ;;  %v5581_v27 = vpop.eup %5580  ;;  %v2815_v20 = vld [vmem:[%s5841_s22 + $0x10] sm:$0xff] }
 0x4f9   : > { %5322 = vmatprep.subr.mxu1 %v5642_v36  ;;  %v2152_v28 = vmul.f32 %v5581_v27, %v6051_v63  ;;  %v5583_v29 = vpop.eup %5582  ;;  %v2810_v27 = vld [vmem:[%s6599_s24 + $0x8] sm:$0xff] }
 0x4fa   : > { %v2323_v31 = vmul.f32 %v5583_v29, %v6054_v1 }
 0x4fb   : > { %5315 = vmatmul.mubr.msk.f32.vlgmr.msra.gmra.mxu1 %vm1217_vm3, %v2152_v28  ;;  %v2717_v28 = vld [vmem:[%s5832_s9] sm:$0xff]  ;;  %s6613_s9 = sld [smem:[#allocation24_spill]] }
 0x4fc   : > { %5323 = vmatpush3.msra.mxu1 %v2325_v30  ;;  %5324 = vmatprep.mubr.msk.f32.mxu1 %vm5643_vm2, %v5642_v36  ;;  %v5585_v33 = vpop.eup %5584 }
 0x4fd   : > { %5332 = vmatprep.subr.mxu1 %v5642_v36  ;;  %v2494_v37 = vmul.f32 %v5585_v33, %v6060_v4 }
 0x4ff   : > { %5325 = vmatmul.mubr.msk.f32.vlgmr.msra.gmra.mxu1 %vm1217_vm3, %v2323_v31 }
 0x500   : > { %5333 = vmatpush3.msra.mxu1 %v2496_v34  ;;  %5334 = vmatprep.mubr.msk.f32.mxu1 %vm5643_vm2, %v5642_v36 }
 0x501   : > { %5348 = vmatprep.subr.mxu1 %v2720_v21  ;;  %s6614_s14 = scalar_lea.vmem %s6613_s9, %s5800_s6 }
 0x503   : > { %5335 = vmatmul.mubr.msk.f32.vlgmr.msra.gmra.mxu1 %vm1217_vm3, %v2494_v37 }
 0x504   : > { %5349 = vmatpush3.msra.mxu1 %v2720_v21 }
 0x505   : > { %5350 = vmatprep.subr.mxu1 %v2719_v24 }
 0x506   : > { %5351 = vmatpush3.msra.mxu1 %v2719_v24 }
 0x507   : > { %5352 = vmatprep.subr.mxu1 %v2718_v26 }
 0x508   : > { %5353 = vmatpush3.msra.mxu1 %v2718_v26 }
 0x509   : > { %5354 = vmatprep.subr.mxu1 %v2717_v28 }
 0x50a   : > { %5355 = vmatpush3.msra.mxu1 %v2717_v28 }
 0x50b   : > { %5373 = vmatprep.subr.mxu1 %v5642_v36 }
 0x57a   : > { %v1376_v38 = vpop.f32.mrf.mxu1 }
 0x57b   : > { %1380 = vst.msk [vmem:[#allocation2] sm:$0xff] %vm1217_vm3, %v1376_v38 }
 0x57c   : > { %v5266_v39 = vpop.f32.mrf.mxu1 }
 0x57d   : > { %v5046_v39 = vld [vmem:[%s6601_s12] ss:$0 sm:$0xff] }
 0x57e   : > { %v1543_v42 = vpop.f32.mrf.mxu1 }
 0x57f   : > { %1548 = vrot.lane.b32.xlu0 %v1543_v42, %s5655_s20 }
 0x580   : > { %v5276_v43 = vpop.f32.mrf.mxu1 }
 0x581   : > { %v5047_v43 = vld [vmem:[%s6603_s10] ss:$0 sm:$0xff]  ;;  %s6604_s10 = scalar_lea.vmem %s6526_s13, %s5800_s6 }
 0x582   : > { %v1715_v40 = vpop.f32.mrf.mxu1  ;;  %v6175_v49 = vld [vmem:[%s6604_s10] ss:$0 sm:$0xff] }
 0x583   : > { %1720 = vrot.lane.b32.xlu1 %v1715_v40, %s5656_s1 }
 0x584   : > { %v5286_v44 = vpop.f32.mrf.mxu1 }
 0x586   : > { %v1887_v45 = vpop.f32.mrf.mxu1 }
 0x587   : > { %1892 = vrot.lane.b32.xlu1 %v1887_v45, %s5657_s0 }
 0x588   : > { %v5296_v46 = vpop.f32.mrf.mxu1 }
 0x5b7   : > { %v2058_v47 = vpop.f32.mrf.mxu1 }
 0x5b8   : > { %2062 = vst.msk [vmem:[#allocation2 + $0x8] sm:$0xff] %vm1217_vm3, %v2058_v47 }
 0x5b9   : > { %v5306_v50 = vpop.f32.mrf.mxu1 }
 0x5bb   : > { %v2225_v52 = vpop.f32.mrf.mxu1 }
 0x5bc   : > { %2230 = vrot.lane.b32.xlu0 %v2225_v52, %s5655_s20 }
 0x5bd   : > { %v5316_v54 = vpop.f32.mrf.mxu1 }
 0x5be   : > { %v2811_v54 = vld [vmem:[%s6599_s24 + $0x10] sm:$0xff] }
 0x5bf   : > { %v2396_v55 = vpop.f32.mrf.mxu1 }
 0x5c0   : > { %2401 = vrot.lane.b32.xlu0 %v2396_v55, %s5656_s1  ;;  %v2812_v55 = vld [vmem:[%s6599_s24 + $0x18] sm:$0xff] }
 0x5c1   : > { %v5326_v56 = vpop.f32.mrf.mxu1 }
 0x5c3   : > { %v2567_v57 = vpop.f32.mrf.mxu1 }
 0x5c4   : > { %2572 = vrot.lane.b32.xlu1 %v2567_v57, %s5657_s0 }
 0x5c5   : > { %v5336_v58 = vpop.f32.mrf.mxu1 }
 0x5c6   : > { %v5048_v58 = vld [vmem:[%s6605_s17] ss:$0 sm:$0xff] }
 0x5f1   : > { %v1549_v59 = vpop.permute.xlu0 %1548 }
 0x5f2   : > { %1552 = vst.msk [vmem:[#allocation2] sm:$0xff] %vm1551_vm4, %v1549_v59 }
 0x5f5   : > { %v1721_v60 = vpop.permute.xlu1 %1720 }
 0x5f6   : > { %1724 = vst.msk [vmem:[#allocation2] sm:$0xff] %vm1723_vm5, %v1721_v60 }
 0x5f9   : > { %v1893_v61 = vpop.permute.xlu1 %1892 }
 0x5fa   : > { %1896 = vst.msk [vmem:[#allocation2] sm:$0xff] %vm1895_vm6, %v1893_v61 }
 0x601   : > { %v2576_v62 = vld [vmem:[#allocation2] sm:$0xff] }
 0x602   : > { %5345 = vmatprep.mubr.msk.f32.mxu0 %vm1132_vm1, %v2576_v62 }
 0x62e   : > { %v2231_v63 = vpop.permute.xlu0 %2230 }
 0x62f   : > { %2233 = vst.msk [vmem:[#allocation2 + $0x8] sm:$0xff] %vm1551_vm4, %v2231_v63 }
 0x632   : > { %v2402_v0 = vpop.permute.xlu0 %2401 }
 0x633   : > { %2404 = vst.msk [vmem:[#allocation2 + $0x8] sm:$0xff] %vm1723_vm5, %v2402_v0 }
 0x636   : > { %v2573_v1 = vpop.permute.xlu1 %2572 }
 0x637   : > { %2575 = vst.msk [vmem:[#allocation2 + $0x8] sm:$0xff] %vm1895_vm6, %v2573_v1 }
 0x63e   : > { %v2577_v2 = vld [vmem:[#allocation2 + $0x8] sm:$0xff] }
 0x63f   : > { %5346 = vmatmul.mubr.msk.f32.vlgmr.msra.gmra.mxu0 %vm1132_vm1, %v2577_v2 }
 0x640   : > { %5360 = vmatpush3.msra.mxu0 %v2816_v19  ;;  %5367 = vmatprep.mubr.msk.f32.mxu0 %vm1132_vm1, %v2809_v22 }
 0x641   : > { %5361 = vmatprep.subr.mxu0 %v2815_v20 }
 0x642   : > { %5362 = vmatpush3.msra.mxu0 %v2815_v20 }
 0x643   : > { %5363 = vmatprep.subr.mxu0 %v2814_v23 }
 0x644   : > { %5364 = vmatpush3.msra.mxu0 %v2814_v23 }
 0x645   : > { %5365 = vmatprep.subr.mxu0 %v2813_v25 }
 0x646   : > { %5366 = vmatpush3.msra.mxu0 %v2813_v25 }
 0x647   : > { %5368 = vmatmul.mubr.msk.f32.vlgmr.msra.gmra.mxu0 %vm1132_vm1, %v2810_v27  ;;  %5387 = vmatprep.subr.mxu0 %v5642_v36 }
 0x648   : > { %5370 = vmatprep.mubr.msk.f32.mxu0 %vm1132_vm1, %v2811_v54 }
 0x64b   : > { %5371 = vmatmul.mubr.msk.f32.gmra.mxu0 %vm1132_vm1, %v2812_v55 }
 0x64c   : > { %5391 = vmatprep.mubr.msk.f32.mxu0 %vm5643_vm2, %v5642_v36 }
 0x6ff   : > { %v5347_v4 = vpop.f32.mrf.mxu0 }
 0x700   : > { %v2667_v5 = vadd.f32 %v5347_v4, %v5043_v3 }
 0x701   : > { %v2661_v6 = vpop.f32.mrf.mxu0 }
 0x702   : > { %v2662_v7 = vadd.f32 %v5043_v3, %v2661_v6  ;;  %v2671_v8 = vadd.f32 %v2667_v5, %v5935_v35 }
 0x704   : > { %v2677_v9 = vsel %vm1132_vm1, %v2671_v8, 0.0  ;;  %v2670_v10 = vadd.f32 %v2662_v7, %v5926_v32 }
 0x705   : > { %2678 = vadd.xlane.f32.xlu1 %v2677_v9 }
 0x706   : > { %v2674_v11 = vsel %vm1132_vm1, %v2670_v10, 0.0 }
 0x707   : > { %2675 = vadd.xlane.f32.xlu0 %v2674_v11  ;;  %v5369_v50 = vpop.f32.mrf.mxu0 }
 0x708   : > { %v6178_v51 = vadd.f32 %v5369_v50, %v6175_v49 }
 0x709   : > { %v2902_v52 = vpop.f32.mrf.mxu0 }
 0x70a   : > { %v6181_v53 = vadd.f32 %v6175_v49, %v2902_v52 }
 0x70b   : > { %v6239_v7 = vpop.f32.mrf.mxu0 }
 0x716   : > { %3098 = vrot.lane.b32.xlu1 %v6178_v51, %s5644_s2 }
 0x78e   : > { %v2679_v12 = vpop.xlane.xlu1 %2678 }
 0x78f   : > { %v2682_v13 = vmul.f32 0.03125, %v2679_v12 }
 0x790   : > { %v2676_v14 = vpop.xlane.xlu0 %2675 }
 0x791   : > { %v2681_v41 = vmul.f32 0.03125, %v2676_v14  ;;  %v2684_v15 = vsub.f32 %v2671_v8, %v2682_v13  ;;  %v6241_v8 = vpop.f32.mrf.mxu0 }
 0x792   : > { %v3099_v56 = vpop.permute.xlu1 %3098 }
 0x793   : > { %v2683_v16 = vsub.f32 %v2670_v10, %v2681_v41  ;;  %v2686_v18 = vmul.f32 %v2684_v15, %v2684_v15  ;;  %5388 = vmatpush3.xpose.msk.msra.mxu0 %vm1217_vm3, %v3099_v56 }
 0x794   : > { %5389 = vmatprep.subr.mxu0 %v5642_v36 }
 0x795   : > { %v2685_v35 = vmul.f32 %v2683_v16, %v2683_v16  ;;  %v2690_v32 = vsel %vm1132_vm1, %v2686_v18, 0.0 }
 0x797   : > { %v2687_v17 = vsel %vm1132_vm1, %v2685_v35, 0.0 }
 0x798   : > { %2688 = vadd.xlane.f32.xlu0 %v2687_v17 }
 0x79c   : > { %2691 = vadd.xlane.f32.xlu0 %v2690_v32 }
 0x7b2   : > { %3096 = vrot.lane.b32.xlu0 %v6181_v53, %s5644_s2 }
 0x7b6   : > { %3276 = vrot.lane.b32.xlu0 %v6181_v53, %s5649_s21 }
 0x821   : > { %v2689_v29 = vpop.xlane.xlu0 %2688 }
 0x822   : > { %v2693_v30 = vmul.f32 0.03125, %v2689_v29 }
 0x824   : > { %v2695_v31 = vadd.f32 1e-12, %v2693_v30 }
 0x825   : > { %v2692_v33 = vpop.xlane.xlu0 %2691 }
 0x826   : > { %5586 = vrsqrt.f32 %v2695_v31  ;;  %v2694_v34 = vmul.f32 0.03125, %v2692_v33 }
 0x828   : > { %v2696_v37 = vadd.f32 1e-12, %v2694_v34 }
 0x829   : > { %v3097_v57 = vpop.permute.xlu0 %3096 }
 0x82a   : > { %5588 = vrsqrt.f32 %v2696_v37  ;;  %5390 = vmatpush3.xpose.msk.msra.mxu0 %vm1217_vm3, %v3097_v57 }
 0x82b   : > { %5401 = vmatprep.subr.mxu0 %v5642_v36 }
 0x82d   : > { %v3277_v1 = vpop.permute.xlu0 %3276 }
 0x833   : > { %v5587_v38 = vpop.eup %5586 }
 0x834   : > { %v2699_v42 = vmul.f32 %v5587_v38, %v2683_v16 }
 0x836   : > { %v2707_v40 = vmul.f32 %v5046_v39, %v2699_v42 }
 0x837   : > { %v5589_v44 = vpop.eup %5588 }
 0x838   : > { %v2700_v45 = vmul.f32 %v5589_v44, %v2684_v15  ;;  %v6160_v46 = vadd.f32 %v5047_v43, %v2707_v40 }
 0x83a   : > { %v2708_v47 = vmul.f32 %v5046_v39, %v2700_v45  ;;  %5356 = vmatprep.mubr.msk.f32.mxu1 %vm1132_vm1, %v6160_v46 }
 0x83c   : > { %v6164_v48 = vadd.f32 %v5047_v43, %v2708_v47 }
 0x83e   : > { %5357 = vmatmul.mubr.msk.f32.vlgmr.msra.gmra.mxu1 %vm1132_vm1, %v6164_v48 }
 0x83f   : > { %5377 = vmatprep.mubr.msk.f32.mxu1 %vm5643_vm2, %v5642_v36  ;;  %5374 = vmatpush3.xpose.msk.msra.mxu1 %vm1217_vm3, %v6178_v51 }
 0x840   : > { %5375 = vmatprep.subr.mxu1 %v5642_v36 }
 0x843   : > { %5376 = vmatpush3.xpose.msk.msra.mxu1 %vm1217_vm3, %v6181_v53 }
 0x844   : > { %5380 = vmatprep.subr.mxu1 %v5642_v36 }
 0x8fe   : > { %v5358_v59 = vpop.f32.mrf.mxu1 }
 0x8ff   : > { %v6214_v60 = vadd.f32 %v5358_v59, %v5048_v58 }
 0x900   : > { %v2800_v61 = vpop.f32.mrf.mxu1 }
 0x901   : > { %v6216_v62 = vadd.f32 %v5048_v58, %v2800_v61 }
 0x903   : > { %3094 = vrot.lane.b32.xlu1 %v6216_v62, %s5644_s2  ;;  %5378 = vmatmul.mubr.msk.f32.vlgmr.msra.gmra.mxu1 %vm1217_vm3, %v6216_v62 }
 0x904   : > { %5384 = vmatprep.mubr.msk.f32.mxu1 %vm5643_vm2, %v5642_v36 }
 0x907   : > { %3278 = vrot.lane.b32.xlu1 %v6178_v51, %s5649_s21 }
 0x90b   : > { %3274 = vrot.lane.b32.xlu1 %v6216_v62, %s5649_s21 }
 0x975   : > { %v3095_v63 = vpop.permute.xlu1 %3094 }
 0x976   : > { %5392 = vmatmul.mubr.msk.f32.vlgmr.msra.gmra.mxu0 %vm1217_vm3, %v3095_v63 }
 0x977   : > { %5405 = vmatprep.mubr.msk.f32.mxu0 %vm5643_vm2, %v5642_v36 }
 0x979   : > { %v3279_v0 = vpop.permute.xlu1 %3278 }
 0x97a   : > { %5402 = vmatpush3.xpose.msk.msra.mxu0 %vm1217_vm3, %v3279_v0 }
 0x97b   : > { %5403 = vmatprep.subr.mxu0 %v5642_v36 }
 0x97d   : > { %v3275_v2 = vpop.permute.xlu1 %3274 }
 0x97e   : > { %5404 = vmatpush3.xpose.msk.msra.mxu0 %vm1217_vm3, %v3277_v1 }
 0x97f   : > { %5422 = vmatprep.subr.mxu0 %v5642_v36 }
 0x981   : > { %5406 = vmatmul.mubr.msk.f32.vlgmr.msra.gmra.mxu0 %vm1217_vm3, %v3275_v2 }
 0x982   : > { %5426 = vmatprep.mubr.msk.f32.mxu0 %vm5643_vm2, %v5642_v36 }
 0x9c3   : > { %v2996_v3 = vpop.f32.mrf.mxu1 }
 0x9c4   : > { %v3000_v4 = vmul.f32 0.35355338, %v2996_v3 }
 0x9c5   : > { %v5379_v5 = vpop.f32.mrf.mxu1 }
 0x9c6   : > { %v3002_v6 = vsel %vm3001_vm7, %v3000_v4, -inf }
 0x9c7   : > { %3003 = vmax.xlane.f32.xlu0 %v3002_v6 }
 0xa36   : > { %v3172_v9 = vpop.f32.mrf.mxu0 }
 0xa37   : > { %v3176_v10 = vmul.f32 0.35355338, %v3172_v9 }
 0xa38   : > { %v5393_v11 = vpop.f32.mrf.mxu0 }
 0xa39   : > { %v3177_v12 = vsel %vm3001_vm7, %v3176_v10, -inf }
 0xa3a   : > { %3178 = vmax.xlane.f32.xlu1 %v3177_v12 }
 0xa41   : > { %v3352_v13 = vpop.f32.mrf.mxu0 }
 0xa42   : > { %v3356_v14 = vmul.f32 0.35355338, %v3352_v13 }
 0xa43   : > { %v5407_v41 = vpop.f32.mrf.mxu0 }
 0xa44   : > { %v3357_v15 = vsel %vm3001_vm7, %v3356_v14, -inf }
 0xa45   : > { %3358 = vmax.xlane.f32.xlu0 %v3357_v15 }
 0xa4b   : > { %3016 = vrot.lane.b32.xlu1 %v6178_v51, %s5645_s30 }
 0xa4f   : > { %3192 = vrot.lane.b32.xlu1 %v6178_v51, %s5647_s8 }
 0xa50   : > { %v3004_v16 = vpop.xlane.xlu0 %3003 }
 0xa51   : > { %v3005_v35 = vsub.f32 %v3000_v4, %v3004_v16 }
 0xa53   : > { %3190 = vrot.lane.b32.xlu1 %v6181_v53, %s5647_s8  ;;  %v3006_v17 = vmul.f32 1.442695, %v3005_v35 }
 0xa55   : > { %5590 = vpow2.f32 %v3006_v17 }
 0xa57   : > { %3370 = vrot.lane.b32.xlu1 %v6181_v53, %s5646_s7 }
 0xa5b   : > { %3014 = vrot.lane.b32.xlu0 %v6181_v53, %s5645_s30 }
 0xa62   : > { %v5591_v18 = vpop.eup %5590 }
 0xa63   : > { %v3008_v32 = vsel %vm3001_vm7, %v5591_v18, 0.0 }
 0xa7a   : > { %3009 = vadd.xlane.f32.xlu0 %v3008_v32 }
 0xa90   : > { %3372 = vrot.lane.b32.xlu0 %v6178_v51, %s5646_s7 }
 0xac3   : > { %v3179_v19 = vpop.xlane.xlu1 %3178 }
 0xac4   : > { %v3180_v20 = vsub.f32 %v3176_v10, %v3179_v19 }
 0xac6   : > { %v3181_v21 = vmul.f32 1.442695, %v3180_v20 }
 0xac7   : > { %v3017_v22 = vpop.permute.xlu1 %3016 }
 0xac8   : > { %5592 = vpow2.f32 %v3181_v21  ;;  %5381 = vmatpush3.msra.mxu1 %v3017_v22 }
 0xac9   : > { %5382 = vmatprep.subr.mxu1 %v5642_v36 }
 0xacb   : > { %v3193_v33 = vpop.permute.xlu1 %3192 }
 0xace   : > { %v3359_v23 = vpop.xlane.xlu0 %3358 }
 0xacf   : > { %v3360_v24 = vsub.f32 %v3356_v14, %v3359_v23  ;;  %v3191_v38 = vpop.permute.xlu1 %3190  ;;  %v6309_v14 = vadd.f32 %v6239_v7, %v6175_v49 }
 0xad1   : > { %v3361_v25 = vmul.f32 1.442695, %v3360_v24 }
 0xad2   : > { %v3015_v26 = vpop.permute.xlu0 %3014 }
 0xad3   : > { %5594 = vpow2.f32 %v3361_v25  ;;  %5383 = vmatpush3.msra.mxu1 %v3015_v26  ;;  %v3371_v39 = vpop.permute.xlu1 %3370 }
 0xad4   : > { %5394 = vmatprep.subr.mxu1 %v5642_v36 }
 0xad5   : > { %v5593_v27 = vpop.eup %5592 }
 0xad6   : > { %v3183_v28 = vsel %vm3001_vm7, %v5593_v27, 0.0 }
 0xad7   : > { %3184 = vadd.xlane.f32.xlu1 %v3183_v28 }
 0xae0   : > { %v5595_v29 = vpop.eup %5594 }
 0xae1   : > { %v3363_v30 = vsel %vm3001_vm7, %v5595_v29, 0.0 }
 0xae2   : > { %3364 = vadd.xlane.f32.xlu0 %v3363_v30 }
 0xae8   : > { %3456 = vrot.lane.b32.xlu1 %v6181_v53, %s5650_s28 }
 0xaf8   : > { %3458 = vrot.lane.b32.xlu0 %v6178_v51, %s5650_s28 }
 0xafc   : > { %3454 = vrot.lane.b32.xlu0 %v6216_v62, %s5650_s28 }
 0xb03   : > { %v3010_v31 = vpop.xlane.xlu0 %3009 }
 0xb04   : > { %5596 = vrcp.f32 %v3010_v31 }
 0xb07   : > { %v3373_v43 = vpop.permute.xlu0 %3372 }
 0xb11   : > { %v5597_v34 = vpop.eup %5596 }
 0xb12   : > { %v3012_v37 = vmul.f32 %v5597_v34, %v5591_v18 }
 0xb14   : > { %3013 = vst.msk [vmem:[%s5894_s19] sm:$0xff] %vm3001_vm7, %v3012_v37  ;;  %5385 = vmatmul.mubr.msk.f32.vlgmr.msra.gmra.mxu1 %vm3001_vm7, %v3012_v37 }
 0xb15   : > { %5395 = vmatpush3.msra.mxu1 %v3193_v33  ;;  %5398 = vmatprep.mubr.msk.f32.mxu1 %vm5643_vm2, %v5642_v36 }
 0xb16   : > { %5396 = vmatprep.subr.mxu1 %v5642_v36 }
 0xb17   : > { %5397 = vmatpush3.msra.mxu1 %v3191_v38 }
 0xb18   : > { %5408 = vmatprep.subr.mxu1 %v5642_v36 }
 0xb60   : > { %v3185_v42 = vpop.xlane.xlu1 %3184 }
 0xb61   : > { %5598 = vrcp.f32 %v3185_v42 }
 0xb64   : > { %v3457_v54 = vpop.permute.xlu1 %3456 }
 0xb6b   : > { %v3365_v40 = vpop.xlane.xlu0 %3364 }
 0xb6c   : > { %5600 = vrcp.f32 %v3365_v40 }
 0xb6e   : > { %v5599_v44 = vpop.eup %5598 }
 0xb6f   : > { %v3187_v45 = vmul.f32 %v5599_v44, %v5593_v27  ;;  %v3459_v52 = vpop.permute.xlu0 %3458 }
 0xb71   : > { %5063 = vst.msk [vmem:[%s5894_s19 + $0x8] sm:$0xff] %vm3001_vm7, %v3187_v45  ;;  %5399 = vmatmul.mubr.msk.f32.vlgmr.msra.gmra.mxu1 %vm3001_vm7, %v3187_v45 }
 0xb72   : > { %5409 = vmatpush3.msra.mxu1 %v3373_v43  ;;  %5412 = vmatprep.mubr.msk.f32.mxu1 %vm5643_vm2, %v5642_v36 }
 0xb73   : > { %5410 = vmatprep.subr.mxu1 %v5642_v36  ;;  %v3455_v55 = vpop.permute.xlu0 %3454 }
 0xb74   : > { %5411 = vmatpush3.msra.mxu1 %v3371_v39 }
 0xb75   : > { %5415 = vmatprep.subr.mxu1 %v5642_v36 }
 0xb79   : > { %v5601_v47 = vpop.eup %5600 }
 0xb7a   : > { %v3367_v50 = vmul.f32 %v5601_v47, %v5595_v29 }
 0xb7c   : > { %5068 = vst.msk [vmem:[%s5894_s19 + $0x10] sm:$0xff] %vm3001_vm7, %v3367_v50  ;;  %5413 = vmatmul.mubr.msk.f32.vlgmr.msra.gmra.mxu1 %vm3001_vm7, %v3367_v50 }
 0xb7d   : > { %5416 = vmatpush3.xpose.msk.msra.mxu1 %vm1217_vm3, %v3459_v52  ;;  %5419 = vmatprep.mubr.msk.f32.mxu1 %vm5643_vm2, %v5642_v36 }
 0xb7e   : > { %5417 = vmatprep.subr.mxu1 %v5642_v36 }
 0xb81   : > { %5418 = vmatpush3.xpose.msk.msra.mxu1 %vm1217_vm3, %v3457_v54 }
 0xb82   : > { %5436 = vmatprep.subr.mxu1 %v5642_v36 }
 0xb84   : > { %5420 = vmatmul.mubr.msk.f32.vlgmr.msra.gmra.mxu1 %vm1217_vm3, %v3455_v55 }
 0xb85   : > { %5440 = vmatprep.mubr.msk.f32.mxu1 %vm5643_vm2, %v5642_v36 }
 0xbd4   : > { %v3089_v56 = vpop.f32.mrf.mxu1 }
 0xbd5   : > { %3093 = vst.msk [vmem:[#allocation2] sm:$0xff] %vm1217_vm3, %v3089_v56 }
 0xbd6   : > { %v5386_v57 = vpop.f32.mrf.mxu1 }
 0xc31   : > { %v6295_v58 = vpop.f32.mrf.mxu1 }
 0xc33   : > { %v5400_v59 = vpop.f32.mrf.mxu1 }
 0xc3c   : > { %v6297_v61 = vpop.f32.mrf.mxu1 }
 0xc3e   : > { %v5414_v62 = vpop.f32.mrf.mxu1 }
 0xc44   : > { %v3532_v63 = vpop.f32.mrf.mxu1 }
 0xc45   : > { %v3536_v0 = vmul.f32 0.35355338, %v3532_v63 }
 0xc46   : > { %v5421_v1 = vpop.f32.mrf.mxu1 }
 0xc47   : > { %v3537_v2 = vsel %vm3001_vm7, %v3536_v0, -inf }
 0xc48   : > { %3538 = vmax.xlane.f32.xlu1 %v3537_v2 }
 0xc59   : > { %3550 = vrot.lane.b32.xlu1 %v6181_v53, %s5648_s27 }
 0xcd1   : > { %v3539_v3 = vpop.xlane.xlu1 %3538 }
 0xcd2   : > { %v3540_v4 = vsub.f32 %v3536_v0, %v3539_v3 }
 0xcd4   : > { %v3541_v5 = vmul.f32 1.442695, %v3540_v4 }
 0xcd5   : > { %v3551_v12 = vpop.permute.xlu1 %3550 }
 0xcd6   : > { %5602 = vpow2.f32 %v3541_v5 }
 0xce3   : > { %v5603_v6 = vpop.eup %5602 }
 0xce4   : > { %v3543_v9 = vsel %vm3001_vm7, %v5603_v6, 0.0 }
 0xce5   : > { %3544 = vadd.xlane.f32.xlu0 %v3543_v9 }
 0xcfb   : > { %3552 = vrot.lane.b32.xlu0 %v6178_v51, %s5648_s27  ;;  %v6321_v51 = vadd.f32 %v6175_v49, %v6241_v8 }
 0xd6e   : > { %v3545_v10 = vpop.xlane.xlu0 %3544 }
 0xd6f   : > { %5604 = vrcp.f32 %v3545_v10 }
 0xd72   : > { %v3553_v11 = vpop.permute.xlu0 %3552 }
 0xd73   : > { %5423 = vmatpush3.msra.mxu0 %v3553_v11 }
 0xd74   : > { %5424 = vmatprep.subr.mxu0 %v5642_v36 }
 0xd75   : > { %5425 = vmatpush3.msra.mxu0 %v3551_v12 }
 0xd76   : > { %5429 = vmatprep.subr.mxu0 %v5642_v36 }
 0xd7c   : > { %v5605_v53 = vpop.eup %5604 }
 0xd7d   : > { %v3547_v13 = vmul.f32 %v5605_v53, %v5603_v6 }
 0xd7f   : > { %5073 = vst.msk [vmem:[%s5894_s19 + $0x18] sm:$0xff] %vm3001_vm7, %v3547_v13  ;;  %5427 = vmatmul.mubr.msk.f32.vlgmr.msra.gmra.mxu0 %vm3001_vm7, %v3547_v13 }
 0xd80   : > { %5430 = vmatpush3.xpose.msk.msra.mxu0 %vm1217_vm3, %v6309_v14  ;;  %5433 = vmatprep.mubr.msk.f32.mxu0 %vm5643_vm2, %v5642_v36 }
 0xd81   : > { %5431 = vmatprep.subr.mxu0 %v5642_v36 }
 0xd84   : > { %5432 = vmatpush3.xpose.msk.msra.mxu0 %vm1217_vm3, %v6321_v51 }
 0xd85   : > { %5450 = vmatprep.subr.mxu0 %v5642_v36 }
 0xd87   : > { %5434 = vmatmul.mubr.msk.f32.vlgmr.msra.gmra.mxu0 %vm1217_vm3, %v6214_v60 }
 0xd88   : > { %5454 = vmatprep.mubr.msk.f32.mxu0 %vm5643_vm2, %v5642_v36 }
 0xe3f   : > { %v6330_v7 = vpop.f32.mrf.mxu0 }
 0xe41   : > { %v5428_v41 = vpop.f32.mrf.mxu0 }
 0xe47   : > { %v3709_v15 = vpop.f32.mrf.mxu0 }
 0xe48   : > { %v3713_v16 = vmul.f32 0.35355338, %v3709_v15 }
 0xe49   : > { %v5435_v35 = vpop.f32.mrf.mxu0 }
 0xe4a   : > { %v3714_v49 = vsel %vm3001_vm7, %v3713_v16, -inf }
 0xe4b   : > { %3715 = vmax.xlane.f32.xlu1 %v3714_v49 }
 0xe5c   : > { %3727 = vrot.lane.b32.xlu1 %v6321_v51, %s5645_s30 }
 0xe60   : > { %3811 = vrot.lane.b32.xlu1 %v6309_v14, %s5644_s2 }
 0xe64   : > { %3807 = vrot.lane.b32.xlu1 %v6214_v60, %s5644_s2 }
 0xe68   : > { %3903 = vrot.lane.b32.xlu1 %v6321_v51, %s5647_s8 }
 0xed4   : > { %v3716_v8 = vpop.xlane.xlu1 %3715 }
 0xed5   : > { %v3717_v17 = vsub.f32 %v3713_v16, %v3716_v8 }
 0xed7   : > { %v3718_v18 = vmul.f32 1.442695, %v3717_v17 }
 0xed8   : > { %v3728_v22 = vpop.permute.xlu1 %3727 }
 0xed9   : > { %5606 = vpow2.f32 %v3718_v18 }
 0xedc   : > { %v3812_v25 = vpop.permute.xlu1 %3811 }
 0xee0   : > { %v3808_v27 = vpop.permute.xlu1 %3807 }
 0xee4   : > { %v3904_v43 = vpop.permute.xlu1 %3903 }
 0xee6   : > { %v5607_v32 = vpop.eup %5606 }
 0xee7   : > { %v3720_v19 = vsel %vm3001_vm7, %v5607_v32, 0.0 }
 0xee8   : > { %3721 = vadd.xlane.f32.xlu0 %v3720_v19 }
 0xefe   : > { %3729 = vrot.lane.b32.xlu0 %v6309_v14, %s5645_s30  ;;  %s6606_s30 = scalar_lea.vmem %s6528_s15, %s5800_s6 }
 0xf02   : > { %3809 = vrot.lane.b32.xlu0 %v6321_v51, %s5644_s2 }
 0xf71   : > { %v3722_v20 = vpop.xlane.xlu0 %3721 }
 0xf72   : > { %5608 = vrcp.f32 %v3722_v20 }
 0xf75   : > { %v3730_v21 = vpop.permute.xlu0 %3729 }
 0xf76   : > { %5437 = vmatpush3.msra.mxu1 %v3730_v21 }
 0xf77   : > { %5438 = vmatprep.subr.mxu1 %v5642_v36 }
 0xf78   : > { %5439 = vmatpush3.msra.mxu1 %v3728_v22 }
 0xf79   : > { %5443 = vmatprep.subr.mxu1 %v5642_v36  ;;  %v3810_v26 = vpop.permute.xlu0 %3809 }
 0xf7f   : > { %v5609_v23 = vpop.eup %5608 }
 0xf80   : > { %v3724_v24 = vmul.f32 %v5609_v23, %v5607_v32 }
 0xf82   : > { %5078 = vst.msk [vmem:[%s5894_s19 + $0x20] sm:$0xff] %vm3001_vm7, %v3724_v24  ;;  %5441 = vmatmul.mubr.msk.f32.vlgmr.msra.gmra.mxu1 %vm3001_vm7, %v3724_v24 }
 0xf83   : > { %5444 = vmatpush3.xpose.msk.msra.mxu1 %vm1217_vm3, %v3812_v25  ;;  %5447 = vmatprep.mubr.msk.f32.mxu1 %vm5643_vm2, %v5642_v36 }
 0xf84   : > { %5445 = vmatprep.subr.mxu1 %v5642_v36 }
 0xf87   : > { %5446 = vmatpush3.xpose.msk.msra.mxu1 %vm1217_vm3, %v3810_v26 }
 0xf88   : > { %5464 = vmatprep.subr.mxu1 %v5642_v36 }
 0xf8a   : > { %5448 = vmatmul.mubr.msk.f32.vlgmr.msra.gmra.mxu1 %vm1217_vm3, %v3808_v27  ;;  %v4351_v27 = vld [vmem:[%s5850_s4 + $0x10] sm:$0xff] }
 0xf8b   : > { %5468 = vmatprep.mubr.msk.f32.mxu1 %vm5643_vm2, %v5642_v36 }
0x1042   : > { %v3802_v28 = vpop.f32.mrf.mxu1 }
0x1043   : > { %3806 = vst.msk [vmem:[#allocation2 + $0x8] sm:$0xff] %vm1217_vm3, %v3802_v28  ;;  %v4350_v28 = vld [vmem:[%s5850_s4 + $0x8] sm:$0xff] }
0x1044   : > { %v5442_v29 = vpop.f32.mrf.mxu1 }
0x1045   : > { %v4349_v29 = vld [vmem:[%s5850_s4] sm:$0xff] }
0x104a   : > { %v3885_v30 = vpop.f32.mrf.mxu1 }
0x104b   : > { %v3889_v31 = vmul.f32 0.35355338, %v3885_v30 }
0x104c   : > { %v5449_v33 = vpop.f32.mrf.mxu1 }
0x104d   : > { %v3890_v34 = vsel %vm3001_vm7, %v3889_v31, -inf }
0x104e   : > { %3891 = vmax.xlane.f32.xlu0 %v3890_v34 }
0x1064   : > { %3905 = vrot.lane.b32.xlu0 %v6309_v14, %s5647_s8  ;;  %s6607_s8 = scalar_lea.vmem %s6529_s16, %s5800_s6 }
0x1068   : > { %3991 = vrot.lane.b32.xlu0 %v6309_v14, %s5649_s21 }
0x106c   : > { %3987 = vrot.lane.b32.xlu0 %v6214_v60, %s5649_s21 }
0x10d7   : > { %v3892_v37 = vpop.xlane.xlu0 %3891 }
0x10d8   : > { %v3893_v38 = vsub.f32 %v3889_v31, %v3892_v37  ;;  %v5095_v37 = vld [vmem:[%s6606_s30] ss:$0 sm:$0xff] }
0x10da   : > { %v3894_v39 = vmul.f32 1.442695, %v3893_v38 }
0x10db   : > { %v3906_v42 = vpop.permute.xlu0 %3905 }
0x10dc   : > { %5610 = vpow2.f32 %v3894_v39  ;;  %5451 = vmatpush3.msra.mxu0 %v3906_v42 }
0x10dd   : > { %5452 = vmatprep.subr.mxu0 %v5642_v36 }
0x10de   : > { %5453 = vmatpush3.msra.mxu0 %v3904_v43 }
0x10df   : > { %5457 = vmatprep.subr.mxu0 %v5642_v36  ;;  %v3992_v52 = vpop.permute.xlu0 %3991 }
0x10e3   : > { %v3988_v55 = vpop.permute.xlu0 %3987 }
0x10e9   : > { %v5611_v40 = vpop.eup %5610 }
0x10ea   : > { %v3896_v44 = vsel %vm3001_vm7, %v5611_v40, 0.0 }
0x10eb   : > { %3897 = vadd.xlane.f32.xlu1 %v3896_v44 }
0x10fc   : > { %3989 = vrot.lane.b32.xlu1 %v6321_v51, %s5649_s21  ;;  %s6608_s21 = sld [smem:[#allocation19_spill]] }
0x1174   : > { %v3898_v45 = vpop.xlane.xlu1 %3897 }
0x1175   : > { %5612 = vrcp.f32 %v3898_v45 }
0x1178   : > { %v3990_v54 = vpop.permute.xlu1 %3989 }
0x1182   : > { %v5613_v47 = vpop.eup %5612 }
0x1183   : > { %v3900_v50 = vmul.f32 %v5613_v47, %v5611_v40 }
0x1185   : > { %5083 = vst.msk [vmem:[%s5894_s19 + $0x28] sm:$0xff] %vm3001_vm7, %v3900_v50  ;;  %5455 = vmatmul.mubr.msk.f32.vlgmr.msra.gmra.mxu0 %vm3001_vm7, %v3900_v50 }
0x1186   : > { %5458 = vmatpush3.xpose.msk.msra.mxu0 %vm1217_vm3, %v3992_v52  ;;  %5461 = vmatprep.mubr.msk.f32.mxu0 %vm5643_vm2, %v5642_v36 }
0x1187   : > { %5459 = vmatprep.subr.mxu0 %v5642_v36 }
0x118a   : > { %5460 = vmatpush3.xpose.msk.msra.mxu0 %vm1217_vm3, %v3990_v54 }
0x118b   : > { %5478 = vmatprep.subr.mxu0 %v5642_v36 }
0x118d   : > { %5462 = vmatmul.mubr.msk.f32.vlgmr.msra.gmra.mxu0 %vm1217_vm3, %v3988_v55 }
0x118e   : > { %5482 = vmatprep.mubr.msk.f32.mxu0 %vm5643_vm2, %v5642_v36 }
0x1245   : > { %v3978_v56 = vpop.f32.mrf.mxu0 }
0x1247   : > { %v5456_v57 = vpop.f32.mrf.mxu0 }
0x124d   : > { %v4065_v59 = vpop.f32.mrf.mxu0 }
0x124e   : > { %v4069_v62 = vmul.f32 0.35355338, %v4065_v59 }
0x124f   : > { %v5463_v63 = vpop.f32.mrf.mxu0 }
0x1250   : > { %v4070_v0 = vsel %vm3001_vm7, %v4069_v62, -inf  ;;  %v4490_v63 = vld [vmem:[%s5867_s3 + $0x18] sm:$0xff] }
0x1251   : > { %4071 = vmax.xlane.f32.xlu1 %v4070_v0  ;;  %v4489_v0 = vld [vmem:[%s5867_s3 + $0x10] sm:$0xff] }
0x1262   : > { %4083 = vrot.lane.b32.xlu1 %v6321_v51, %s5646_s7 }
0x1266   : > { %4171 = vrot.lane.b32.xlu1 %v6309_v14, %s5650_s28 }
0x126a   : > { %4167 = vrot.lane.b32.xlu1 %v6214_v60, %s5650_s28 }
0x12da   : > { %v4072_v1 = vpop.xlane.xlu1 %4071 }
0x12db   : > { %v4073_v2 = vsub.f32 %v4069_v62, %v4072_v1  ;;  %v4488_v1 = vld [vmem:[%s5867_s3 + $0x8] sm:$0xff] }
0x12dd   : > { %v4074_v3 = vmul.f32 1.442695, %v4073_v2  ;;  %v4487_v2 = vld [vmem:[%s5867_s3] sm:$0xff] }
0x12de   : > { %v4084_v60 = vpop.permute.xlu1 %4083 }
0x12df   : > { %5614 = vpow2.f32 %v4074_v3 }
0x12e2   : > { %v4172_v12 = vpop.permute.xlu1 %4171 }
0x12e6   : > { %v4168_v13 = vpop.permute.xlu1 %4167 }
0x12ec   : > { %v5615_v4 = vpop.eup %5614 }
0x12ed   : > { %v4076_v5 = vsel %vm3001_vm7, %v5615_v4, 0.0 }
0x12ee   : > { %4077 = vadd.xlane.f32.xlu0 %v4076_v5 }
0x1304   : > { %4085 = vrot.lane.b32.xlu0 %v6309_v14, %s5646_s7 }
0x1308   : > { %4169 = vrot.lane.b32.xlu0 %v6321_v51, %s5650_s28  ;;  %s6609_s28 = scalar_lea.vmem %s6608_s21, %s5800_s6 }
0x1377   : > { %v4078_v6 = vpop.xlane.xlu0 %4077 }
0x1378   : > { %5616 = vrcp.f32 %v4078_v6 }
0x137b   : > { %v4086_v9 = vpop.permute.xlu0 %4085 }
0x137c   : > { %5465 = vmatpush3.msra.mxu1 %v4086_v9 }
0x137d   : > { %5466 = vmatprep.subr.mxu1 %v5642_v36 }
0x137e   : > { %5467 = vmatpush3.msra.mxu1 %v4084_v60 }
0x137f   : > { %5471 = vmatprep.subr.mxu1 %v5642_v36  ;;  %v4170_v53 = vpop.permute.xlu0 %4169 }
0x1385   : > { %v5617_v10 = vpop.eup %5616 }
0x1386   : > { %v4080_v11 = vmul.f32 %v5617_v10, %v5615_v4 }
0x1388   : > { %5088 = vst.msk [vmem:[%s5894_s19 + $0x30] sm:$0xff] %vm3001_vm7, %v4080_v11  ;;  %5469 = vmatmul.mubr.msk.f32.vlgmr.msra.gmra.mxu1 %vm3001_vm7, %v4080_v11  ;;  %v5098_v11 = vld [vmem:[%s6607_s8] ss:$0 sm:$0xff] }
0x1389   : > { %5472 = vmatpush3.xpose.msk.msra.mxu1 %vm1217_vm3, %v4172_v12  ;;  %5475 = vmatprep.mubr.msk.f32.mxu1 %vm5643_vm2, %v5642_v36 }
0x138a   : > { %5473 = vmatprep.subr.mxu1 %v5642_v36 }
0x138d   : > { %5474 = vmatpush3.xpose.msk.msra.mxu1 %vm1217_vm3, %v4170_v53  ;;  %v5099_v53 = vld [vmem:[%s6609_s28] ss:$0 sm:$0xff] }
0x138e   : > { %5496 = vmatprep.subr.mxu1 %v4490_v63 }
0x1390   : > { %5476 = vmatmul.mubr.msk.f32.vlgmr.msra.gmra.mxu1 %vm1217_vm3, %v4168_v13 }
0x1391   : > { %5497 = vmatpush3.msra.mxu1 %v4490_v63 }
0x1392   : > { %5498 = vmatprep.subr.mxu1 %v4489_v0 }
0x1393   : > { %5499 = vmatpush3.msra.mxu1 %v4489_v0 }
0x1394   : > { %5500 = vmatprep.subr.mxu1 %v4488_v1 }
0x1395   : > { %5501 = vmatpush3.msra.mxu1 %v4488_v1 }
0x1396   : > { %5502 = vmatprep.subr.mxu1 %v4487_v2 }
0x1397   : > { %5503 = vmatpush3.msra.mxu1 %v4487_v2 }
0x1448   : > { %v4158_v41 = vpop.f32.mrf.mxu1 }
0x144a   : > { %v5470_v15 = vpop.f32.mrf.mxu1 }
0x1450   : > { %v4245_v16 = vpop.f32.mrf.mxu1 }
0x1451   : > { %v4249_v35 = vmul.f32 0.35355338, %v4245_v16 }
0x1452   : > { %v5477_v49 = vpop.f32.mrf.mxu1 }
0x1453   : > { %v4250_v8 = vsel %vm3001_vm7, %v4249_v35, -inf }
0x1454   : > { %4251 = vmax.xlane.f32.xlu0 %v4250_v8  ;;  %v4604_v8 = vld [vmem:[%s5877_s26 + $0x38] sm:$0xff] }
0x146a   : > { %4265 = vrot.lane.b32.xlu0 %v6309_v14, %s5648_s27 }
0x146e   : > { %3270 = vrot.lane.b32.xlu0 %v6295_v58, %s5655_s20 }
0x1472   : > { %3983 = vrot.lane.b32.xlu0 %v3978_v56, %s5655_s20 }
0x1476   : > { %4163 = vrot.lane.b32.xlu0 %v4158_v41, %s5656_s1 }
0x14dd   : > { %v4252_v17 = vpop.xlane.xlu0 %4251 }
0x14de   : > { %v4253_v18 = vsub.f32 %v4249_v35, %v4252_v17  ;;  %v4603_v17 = vld [vmem:[%s5877_s26 + $0x30] sm:$0xff] }
0x14e0   : > { %v4254_v32 = vmul.f32 1.442695, %v4253_v18  ;;  %v4602_v18 = vld [vmem:[%s5877_s26 + $0x28] sm:$0xff] }
0x14e1   : > { %v4266_v19 = vpop.permute.xlu0 %4265 }
0x14e2   : > { %5618 = vpow2.f32 %v4254_v32  ;;  %5479 = vmatpush3.msra.mxu0 %v4266_v19  ;;  %v4601_v32 = vld [vmem:[%s5877_s26 + $0x20] sm:$0xff]  ;;  %v4600_v19 = vld [vmem:[%s5877_s26 + $0x18] sm:$0xff] }
0x14e3   : > { %5480 = vmatprep.subr.mxu0 %v5642_v36 }
0x14e5   : > { %v3271_v20 = vpop.permute.xlu0 %3270 }
0x14e6   : > { %3273 = vst.msk [vmem:[#allocation2] sm:$0xff] %vm1551_vm4, %v3271_v20  ;;  %v4599_v20 = vld [vmem:[%s5877_s26 + $0x10] sm:$0xff] }
0x14e9   : > { %v3984_v21 = vpop.permute.xlu0 %3983 }
0x14ea   : > { %3986 = vst.msk [vmem:[#allocation2 + $0x8] sm:$0xff] %vm1551_vm4, %v3984_v21  ;;  %v4598_v21 = vld [vmem:[%s5877_s26 + $0x8] sm:$0xff] }
0x14ed   : > { %v4164_v14 = vpop.permute.xlu0 %4163 }
0x14ee   : > { %4166 = vst.msk [vmem:[#allocation2 + $0x8] sm:$0xff] %vm1723_vm5, %v4164_v14  ;;  %v4597_v14 = vld [vmem:[%s5877_s26] sm:$0xff] }
0x14ef   : > { %v5619_v58 = vpop.eup %5618 }
0x14f0   : > { %v4256_v22 = vsel %vm3001_vm7, %v5619_v58, 0.0 }
0x14f1   : > { %4257 = vadd.xlane.f32.xlu1 %v4256_v22 }
0x1502   : > { %4263 = vrot.lane.b32.xlu1 %v6321_v51, %s5648_s27 }
0x1506   : > { %3450 = vrot.lane.b32.xlu1 %v6297_v61, %s5656_s1 }
0x150a   : > { %3630 = vrot.lane.b32.xlu1 %v6330_v7, %s5657_s0  ;;  %v4352_v7 = vld [vmem:[%s5850_s4 + $0x18] sm:$0xff] }
0x157a   : > { %v4258_v36 = vpop.xlane.xlu1 %4257 }
0x157b   : > { %5620 = vrcp.f32 %v4258_v36 }
0x157e   : > { %v4264_v23 = vpop.permute.xlu1 %4263 }
0x157f   : > { %5481 = vmatpush3.msra.mxu0 %v4264_v23 }
0x1580   : > { %5485 = vmatprep.subr.mxu0 %v4352_v7 }
0x1582   : > { %v3451_v24 = vpop.permute.xlu1 %3450 }
0x1583   : > { %3453 = vst.msk [vmem:[#allocation2] sm:$0xff] %vm1723_vm5, %v3451_v24 }
0x1586   : > { %v3631_v25 = vpop.permute.xlu1 %3630 }
0x1587   : > { %3633 = vst.msk [vmem:[#allocation2] sm:$0xff] %vm1895_vm6, %v3631_v25 }
0x1588   : > { %v5621_v51 = vpop.eup %5620 }
0x1589   : > { %v4260_v26 = vmul.f32 %v5621_v51, %v5619_v58 }
0x158b   : > { %5093 = vst.msk [vmem:[%s5894_s19 + $0x38] sm:$0xff] %vm3001_vm7, %v4260_v26  ;;  %5483 = vmatmul.mubr.msk.f32.vlgmr.msra.gmra.mxu0 %vm3001_vm7, %v4260_v26  ;;  %s6615_s19 = sld [smem:[#allocation25_spill]] }
0x158c   : > { %5486 = vmatpush3.msra.mxu0 %v4352_v7 }
0x158d   : > { %5487 = vmatprep.subr.mxu0 %v4351_v27 }
0x158e   : > { %v4347_v61 = vld [vmem:[#allocation2] sm:$0xff]  ;;  %5488 = vmatpush3.msra.mxu0 %v4351_v27 }
0x158f   : > { %5493 = vmatprep.mubr.msk.f32.mxu0 %vm1132_vm1, %v4347_v61  ;;  %5489 = vmatprep.subr.mxu0 %v4350_v28 }
0x1590   : > { %5490 = vmatpush3.msra.mxu0 %v4350_v28 }
0x1591   : > { %5491 = vmatprep.subr.mxu0 %v4349_v29  ;;  %s6616_s2 = scalar_lea.vmem %s6615_s19, %s5800_s6 }
0x1592   : > { %5492 = vmatpush3.msra.mxu0 %v4349_v29 }
0x1593   : > { %5507 = vmatprep.subr.mxu0 %v4604_v8 }
0x164b   : > { %v4338_v30 = vpop.f32.mrf.mxu0 }
0x164c   : > { %4343 = vrot.lane.b32.xlu1 %v4338_v30, %s5657_s0  ;;  %s6610_s0 = sld [smem:[#allocation21_spill]] }
0x164d   : > { %v5484_v31 = vpop.f32.mrf.mxu0 }
0x1652   : > { %s6611_s10 = scalar_lea.vmem %s6610_s0, %s5800_s6 }
0x1653   : > { %v5100_v58 = vld [vmem:[%s6611_s10] ss:$0 sm:$0xff] }
0x16be   : > { %v4344_v33 = vpop.permute.xlu1 %4343 }
0x16bf   : > { %4346 = vst.msk [vmem:[#allocation2 + $0x8] sm:$0xff] %vm1895_vm6, %v4344_v33 }
0x16c6   : > { %v4348_v34 = vld [vmem:[#allocation2 + $0x8] sm:$0xff] }
0x16c7   : > { %5494 = vmatmul.mubr.msk.f32.vlgmr.msra.gmra.mxu0 %vm1132_vm1, %v4348_v34 }
0x16c8   : > { %5508 = vmatpush3.msra.mxu0 %v4604_v8 }
0x16c9   : > { %5509 = vmatprep.subr.mxu0 %v4603_v17 }
0x16ca   : > { %5510 = vmatpush3.msra.mxu0 %v4603_v17 }
0x16cb   : > { %5511 = vmatprep.subr.mxu0 %v4602_v18 }
0x16cc   : > { %5512 = vmatpush3.msra.mxu0 %v4602_v18 }
0x16cd   : > { %5513 = vmatprep.subr.mxu0 %v4601_v32 }
0x16ce   : > { %5514 = vmatpush3.msra.mxu0 %v4601_v32 }
0x16cf   : > { %5515 = vmatprep.subr.mxu0 %v4600_v19 }
0x16d0   : > { %5516 = vmatpush3.msra.mxu0 %v4600_v19 }
0x16d1   : > { %5517 = vmatprep.subr.mxu0 %v4599_v20 }
0x16d2   : > { %5518 = vmatpush3.msra.mxu0 %v4599_v20 }
0x16d3   : > { %5519 = vmatprep.subr.mxu0 %v4598_v21 }
0x16d4   : > { %5520 = vmatpush3.msra.mxu0 %v4598_v21 }
0x16d5   : > { %5521 = vmatprep.subr.mxu0 %v4597_v14 }
0x16d6   : > { %5522 = vmatpush3.msra.mxu0 %v4597_v14 }
0x1787   : > { %v5495_v38 = vpop.f32.mrf.mxu0 }
0x1788   : > { %v4438_v39 = vadd.f32 %v5495_v38, %v5095_v37 }
0x1789   : > { %v4432_v42 = vpop.f32.mrf.mxu0 }
0x178a   : > { %v4442_v43 = vadd.f32 %v4438_v39, %v6164_v48  ;;  %v4433_v40 = vadd.f32 %v5095_v37, %v4432_v42 }
0x178c   : > { %v4441_v44 = vadd.f32 %v4433_v40, %v6160_v46  ;;  %v4448_v45 = vsel %vm1132_vm1, %v4442_v43, 0.0 }
0x178d   : > { %4449 = vadd.xlane.f32.xlu1 %v4448_v45 }
0x178e   : > { %v4445_v47 = vsel %vm1132_vm1, %v4441_v44, 0.0 }
0x178f   : > { %4446 = vadd.xlane.f32.xlu0 %v4445_v47 }
0x1816   : > { %v4450_v50 = vpop.xlane.xlu1 %4449 }
0x1817   : > { %v4452_v52 = vmul.f32 0.03125, %v4450_v50 }
0x1818   : > { %v4447_v54 = vpop.xlane.xlu0 %4446 }
0x1819   : > { %v4451_v55 = vmul.f32 0.03125, %v4447_v54  ;;  %v4454_v56 = vsub.f32 %v4442_v43, %v4452_v52 }
0x181b   : > { %v4453_v57 = vsub.f32 %v4441_v44, %v4451_v55  ;;  %v4456_v46 = vmul.f32 %v4454_v56, %v4454_v56  ;;  %v5103_v44 = vld [vmem:[%s1053_s25] ss:$0 sm:$0xff] }
0x181d   : > { %v4455_v48 = vmul.f32 %v4453_v57, %v4453_v57  ;;  %v4460_v62 = vsel %vm1132_vm1, %v4456_v46, 0.0 }
0x181f   : > { %v4457_v59 = vsel %vm1132_vm1, %v4455_v48, 0.0 }
0x1820   : > { %4458 = vadd.xlane.f32.xlu0 %v4457_v59 }
0x1824   : > { %4461 = vadd.xlane.f32.xlu0 %v4460_v62 }
0x18a9   : > { %v4459_v3 = vpop.xlane.xlu0 %4458 }
0x18aa   : > { %v4463_v4 = vmul.f32 0.03125, %v4459_v3 }
0x18ac   : > { %v4465_v5 = vadd.f32 1e-12, %v4463_v4 }
0x18ad   : > { %v4462_v6 = vpop.xlane.xlu0 %4461 }
0x18ae   : > { %5622 = vrsqrt.f32 %v4465_v5  ;;  %v4464_v9 = vmul.f32 0.03125, %v4462_v6 }
0x18b0   : > { %v4466_v60 = vadd.f32 1e-12, %v4464_v9 }
0x18b2   : > { %5624 = vrsqrt.f32 %v4466_v60 }
0x18bb   : > { %v5623_v10 = vpop.eup %5622 }
0x18bc   : > { %v4469_v12 = vmul.f32 %v5623_v10, %v4453_v57 }
0x18be   : > { %v4477_v13 = vmul.f32 %v5098_v11, %v4469_v12 }
0x18bf   : > { %v5625_v41 = vpop.eup %5624 }
0x18c0   : > { %v4470_v15 = vmul.f32 %v5625_v41, %v4454_v56  ;;  %v6464_v16 = vadd.f32 %v5099_v53, %v4477_v13 }
0x18c2   : > { %v4478_v35 = vmul.f32 %v5098_v11, %v4470_v15  ;;  %5504 = vmatprep.mubr.msk.f32.mxu1 %vm1132_vm1, %v6464_v16  ;;  %v5107_v15 = vld [vmem:[%s6616_s2] ss:$0 sm:$0xff] }
0x18c4   : > { %v4486_v49 = vadd.f32 %v5099_v53, %v4478_v35  ;;  %v5106_v53 = vld [vmem:[%s6614_s14] ss:$0 sm:$0xff] }
0x18c6   : > { %5505 = vmatmul.mubr.msk.f32.vlgmr.msra.gmra.mxu1 %vm1132_vm1, %v4486_v49 }
0x1986   : > { %v5506_v22 = vpop.f32.mrf.mxu1 }
0x1987   : > { %v4576_v36 = vadd.f32 %v5506_v22, %v5100_v58 }
0x1988   : > { %v4570_v23 = vpop.f32.mrf.mxu1 }
0x1989   : > { %v4580_v24 = vmul.f32 %v4576_v36, %v4576_v36  ;;  %v4571_v25 = vadd.f32 %v5100_v58, %v4570_v23 }
0x198b   : > { %v4582_v51 = vmul.f32 %v4580_v24, %v4576_v36  ;;  %v4579_v26 = vmul.f32 %v4571_v25, %v4571_v25 }
0x198d   : > { %v4584_v61 = vmul.f32 0.044715, %v4582_v51  ;;  %v4581_v7 = vmul.f32 %v4579_v26, %v4571_v25 }
0x198f   : > { %v4586_v27 = vadd.f32 %v4584_v61, %v4576_v36  ;;  %v4583_v28 = vmul.f32 0.044715, %v4581_v7 }
0x1991   : > { %v4588_v29 = vmul.f32 0.7978846, %v4586_v27  ;;  %v4585_v30 = vadd.f32 %v4583_v28, %v4571_v25 }
0x1993   : > { %5626 = vtanh.f32 %v4588_v29  ;;  %v4587_v31 = vmul.f32 0.7978846, %v4585_v30 }
0x1995   : > { %5628 = vtanh.f32 %v4587_v31 }
0x19a0   : > { %v5627_v33 = vpop.eup %5626 }
0x19a1   : > { %v4592_v34 = vadd.f32 1.0, %v5627_v33 }
0x19a2   : > { %v5629_v37 = vpop.eup %5628 }
0x19a3   : > { %v4591_v38 = vadd.f32 1.0, %v5629_v37  ;;  %v4594_v39 = vmul.f32 0.5, %v4592_v34 }
0x19a5   : > { %v4593_v42 = vmul.f32 0.5, %v4591_v38  ;;  %v4596_v40 = vmul.f32 %v4594_v39, %v4576_v36 }
0x19a7   : > { %v4595_v43 = vmul.f32 %v4593_v42, %v4571_v25 }
0x19a9   : > { %5523 = vmatprep.mubr.msk.f32.mxu0 %vm4612_vm8, %v4595_v43 }
0x19aa   : > { %5524 = vmatmul.mubr.msk.f32.vlgmr.msra.gmra.mxu0 %vm4612_vm8, %v4596_v40 }
0x1a6a   : > { %v5525_v45 = vpop.f32.mrf.mxu0 }
0x1a6b   : > { %v4691_v47 = vadd.f32 %v5525_v45, %v5103_v44 }
0x1a6c   : > { %v4685_v50 = vpop.f32.mrf.mxu0 }
0x1a6d   : > { %v4695_v52 = vadd.f32 %v4691_v47, %v4486_v49  ;;  %v4686_v54 = vadd.f32 %v5103_v44, %v4685_v50 }
0x1a6f   : > { %v4694_v55 = vadd.f32 %v4686_v54, %v6464_v16  ;;  %v4701_v56 = vsel %vm1132_vm1, %v4695_v52, 0.0 }
0x1a70   : > { %4702 = vadd.xlane.f32.xlu0 %v4701_v56 }
0x1a71   : > { %v4698_v57 = vsel %vm1132_vm1, %v4694_v55, 0.0 }
0x1a72   : > { %4699 = vadd.xlane.f32.xlu1 %v4698_v57 }
0x1af9   : > { %v4703_v48 = vpop.xlane.xlu0 %4702 }
0x1afa   : > { %v4705_v59 = vmul.f32 0.03125, %v4703_v48 }
0x1afb   : > { %v4700_v46 = vpop.xlane.xlu1 %4699 }
0x1afc   : > { %v4707_v62 = vsub.f32 %v4695_v52, %v4705_v59  ;;  %v4704_v63 = vmul.f32 0.03125, %v4700_v46 }
0x1afe   : > { %v4706_v0 = vsub.f32 %v4694_v55, %v4704_v63  ;;  %v4709_v1 = vmul.f32 %v4707_v62, %v4707_v62 }
0x1b00   : > { %v4713_v2 = vsel %vm1132_vm1, %v4709_v1, 0.0  ;;  %v4708_v3 = vmul.f32 %v4706_v0, %v4706_v0 }
0x1b01   : > { %4714 = vadd.xlane.f32.xlu0 %v4713_v2 }
0x1b02   : > { %v4710_v4 = vsel %vm1132_vm1, %v4708_v3, 0.0 }
0x1b03   : > { %4711 = vadd.xlane.f32.xlu1 %v4710_v4 }
0x1b8a   : > { %v4715_v5 = vpop.xlane.xlu0 %4714 }
0x1b8b   : > { %v4717_v6 = vmul.f32 0.03125, %v4715_v5 }
0x1b8c   : > { %v4712_v9 = vpop.xlane.xlu1 %4711 }
0x1b8d   : > { %v4719_v60 = vadd.f32 1e-12, %v4717_v6  ;;  %v4716_v10 = vmul.f32 0.03125, %v4712_v9 }
0x1b8f   : > { %5630 = vrsqrt.f32 %v4719_v60  ;;  %v4718_v11 = vadd.f32 1e-12, %v4716_v10 }
0x1b91   : > { %5632 = vrsqrt.f32 %v4718_v11 }
0x1b9c   : > { %v5631_v12 = vpop.eup %5630 }
0x1b9d   : > { %v4723_v13 = vmul.f32 %v5631_v12, %v4707_v62 }
0x1b9e   : > { %v5633_v41 = vpop.eup %5632 }
0x1b9f   : > { %v4731_v16 = vmul.f32 %v5106_v53, %v4723_v13  ;;  %v4722_v35 = vmul.f32 %v5633_v41, %v4706_v0 }
0x1ba1   : > { %v4739_v49 = vadd.f32 %v5107_v15, %v4731_v16  ;;  %v4730_v8 = vmul.f32 %v5106_v53, %v4722_v35 }
0x1ba3   : > { %4741 = vst.msk [vmem:[%s6594_s23 + $0x8] sm:$0xff] %vm1132_vm1, %v4739_v49  ;;  %v4738_v17 = vadd.f32 %v5107_v15, %v4730_v8 }
0x1ba5   : > { %4740 = vst.msk [vmem:[%s6594_s23] sm:$0xff] %vm1132_vm1, %v4738_v17 }
0x1ba6 PF: > { %s6617_s3 = sld [smem:[#allocation3_spill]] }
0x1bac   : > { %s36_s29 = sadd.s32 1, %s6617_s3  }
0x1bad   : > { %p33_p5 = scmp.ge.s32.totalorder %s36_s29, 4  }
0x1baf   :  { %35 = sbr.rel (!%p33_p5) target bundleno = 23 (0x17), region = 222 }

</bundles_post_ra>
